<compile_context>
chip_gen: v6e
topology: v6e:2x2x1
jax: 0.10.0
libtpu: 0.0.40
codegen_flags: <defaults>
</compile_context>

<pallas_src>
import functools

import jax
import jax.numpy as jnp
from jax.experimental import pallas as pl
from jax.experimental.pallas import tpu as pltpu

BN_EPS = 1e-5


# ---------------------------------------------------------------------------
# Pallas kernel: fused (conv3x3 + bias + ReLU + BN) x 2 on one image plane
# ---------------------------------------------------------------------------
def _decoder_block_kernel(cat_ref, mask_ref, w1_ref, b1_ref, s1_ref, h1_ref,
                          w2_ref, b2_ref, s2_ref, h2_ref, o_ref, f2_ref,
                          *, wp, mo, guard):
    """One batch element per grid step.

    cat_ref : (1, (Ho+3)*wp, Cin)  zero-padded, spatially flattened plane, f32
    mask_ref: (mo, 1) f32          1.0 where flat column index < Wo
    w*_ref  : (9, Cin*, Cout) bf16 conv taps, tap index = kh*3 + kw
    b*/s*/h*: (1, Cout) f32        conv bias / folded BN scale / BN shift
    o_ref   : (1, mo, Cout) f32    flattened output plane (row stride = wp)
    f2_ref  : (guard+mo+guard, Cout) f32 VMEM scratch for the conv1 output;
              the zeroed guard rows provide conv2's zero padding.
    """
    cout = o_ref.shape[2]

    # ---- conv1: 9 taps, each a (mo, Cin) x (Cin, Cout) MXU matmul ----------
    acc = jnp.zeros((mo, cout), jnp.float32)
    for kh in range(3):
        for kw in range(3):
            patch = cat_ref[0, pl.ds(kh * wp + kw, mo), :].astype(jnp.bfloat16)
            acc += jnp.dot(patch, w1_ref[kh * 3 + kw],
                           preferred_element_type=jnp.float32)
    y = jnp.maximum(acc + b1_ref[...], 0.0)           # bias + ReLU
    y = y * s1_ref[...] + h1_ref[...]                 # BN1 (inference, folded)
    y = y * mask_ref[...]                             # zero wrap-around cols

    # ---- stage conv1 output in VMEM (padded flat layout) for conv2 ---------
    f2_ref[...] = jnp.zeros_like(f2_ref)
    f2_ref[pl.ds(guard, mo), :] = y                   # tile-aligned offset

    # ---- conv2 --------------------------------------------------------------
    acc2 = jnp.zeros((mo, cout), jnp.float32)
    for kh in range(3):
        for kw in range(3):
            off = guard + (kh - 1) * wp + (kw - 1)
            patch = f2_ref[pl.ds(off, mo), :].astype(jnp.bfloat16)
            acc2 += jnp.dot(patch, w2_ref[kh * 3 + kw],
                            preferred_element_type=jnp.float32)
    y2 = jnp.maximum(acc2 + b2_ref[...], 0.0)         # bias + ReLU
    y2 = y2 * s2_ref[...] + h2_ref[...]               # BN2 (inference, folded)
    o_ref[0] = y2


# ---------------------------------------------------------------------------
# Wrapper
# ---------------------------------------------------------------------------
def decoder_block_forward(prev_feature_map, x, params):
    """prev: (N, Cp, D, 2H, 2W), x: (N, Cx, D, H, W) -> (N, Cout, D, 2H, 2W)."""
    N, Cx, D, H, W = x.shape
    _, Cp, Dp, Hpv, Wpv = prev_feature_map.shape
    Ho, Wo = 2 * H, 2 * W
    assert (Dp, Hpv, Wpv) == (D, Ho, Wo)
    B = N * D
    Cin1 = Cx + Cp
    Cout = params["w2"].shape[-1]

    # NCDHW -> (B=N*D, H, W, C): depth folds into batch (all kernels (1,3,3)).
    xl = jnp.transpose(x, (0, 2, 3, 4, 1)).reshape(B, H, W, Cx)
    pv = jnp.transpose(prev_feature_map, (0, 2, 3, 4, 1)).reshape(B, Ho, Wo, Cp)

    # Fused XLA prologue: nearest (1,2,2) upsample, concat((x, getCenter(prev))),
    # zero pad (1 top, 2 bottom guard, 1 left, 1 right), flatten the plane so
    # that every conv tap inside the kernel is a contiguous slice.
    # TODO(synk): getCenter() is not defined in the reference source; treated
    # as identity (prev already has the same depth as the upsampled x).
    xu = jnp.repeat(jnp.repeat(xl, 2, axis=1), 2, axis=2)     # (B, Ho, Wo, Cx)
    cat = jnp.concatenate([xu, pv], axis=-1)                  # (B, Ho, Wo, Cin1)
    wp = Wo + 2
    mo = Ho * wp
    catp = jnp.pad(cat, ((0, 0), (1, 2), (1, 1), (0, 0)))
    catf = catp.reshape(B, (Ho + 3) * wp, Cin1)

    guard = ((wp + 1 + 15) // 16) * 16                        # aligned, >= wp+1
    f2_rows = guard + mo + guard
    mask = (jnp.arange(mo) % wp < Wo).astype(jnp.float32).reshape(mo, 1)

    kernel = functools.partial(_decoder_block_kernel, wp=wp, mo=mo, guard=guard)
    out_flat = pl.pallas_call(
        kernel,
        out_shape=jax.ShapeDtypeStruct((B, mo, Cout), jnp.float32),
        grid=(B,),
        in_specs=[
            pl.BlockSpec((1, (Ho + 3) * wp, Cin1), lambda b: (b, 0, 0)),
            pl.BlockSpec((mo, 1), lambda b: (0, 0)),
            pl.BlockSpec((9, Cin1, Cout), lambda b: (0, 0, 0)),
            pl.BlockSpec((1, Cout), lambda b: (0, 0)),
            pl.BlockSpec((1, Cout), lambda b: (0, 0)),
            pl.BlockSpec((1, Cout), lambda b: (0, 0)),
            pl.BlockSpec((9, Cout, Cout), lambda b: (0, 0, 0)),
            pl.BlockSpec((1, Cout), lambda b: (0, 0)),
            pl.BlockSpec((1, Cout), lambda b: (0, 0)),
            pl.BlockSpec((1, Cout), lambda b: (0, 0)),
        ],
        out_specs=pl.BlockSpec((1, mo, Cout), lambda b: (b, 0, 0)),
        scratch_shapes=[pltpu.VMEM((f2_rows, Cout), jnp.float32)],
        compiler_params=pltpu.CompilerParams(
            dimension_semantics=("parallel",)),
    )(catf, mask, params["w1"], params["b1"], params["s1"], params["h1"],
      params["w2"], params["b2"], params["s2"], params["h2"])

    # Flattened (wp-stride) plane -> (B, Ho, Wo, Cout) -> NCDHW.
    out = out_flat.reshape(B, Ho, wp, Cout)[:, :, :Wo, :]
    out = out.reshape(N, D, Ho, Wo, Cout)
    return jnp.transpose(out, (0, 4, 1, 2, 3))


# ---------------------------------------------------------------------------
# Pure-XLA f32 reference (for validation only)
# ---------------------------------------------------------------------------
def decoder_block_reference(prev_feature_map, x, p):
    N, Cx, D, H, W = x.shape
    Ho, Wo = 2 * H, 2 * W
    B = N * D
    xl = jnp.transpose(x, (0, 2, 3, 4, 1)).reshape(B, H, W, Cx)
    pv = jnp.transpose(prev_feature_map, (0, 2, 3, 4, 1)).reshape(B, Ho, Wo, -1)
    xu = jnp.repeat(jnp.repeat(xl, 2, axis=1), 2, axis=2)
    h = jnp.concatenate([xu, pv], axis=-1)

    def conv_relu_bn(v, w, b, s, t):
        v = jax.lax.conv_general_dilated(
            v, w, window_strides=(1, 1), padding=((1, 1), (1, 1)),
            dimension_numbers=("NHWC", "HWIO", "NHWC"),
            precision=jax.lax.Precision.HIGHEST)
        v = jnp.maximum(v + b, 0.0)
        return v * s + t

    h = conv_relu_bn(h, p["w1"], p["b1"], p["s1"], p["h1"])
    h = conv_relu_bn(h, p["w2"], p["b2"], p["s2"], p["h2"])
    Cout = h.shape[-1]
    h = h.reshape(N, D, Ho, Wo, Cout)
    return jnp.transpose(h, (0, 4, 1, 2, 3))


# ---------------------------------------------------------------------------
# Deterministic parameter init (PyTorch-default-style), BN folded for inference
# ---------------------------------------------------------------------------
def init_decoder_params(key, prev_channel, input_channel, output_channel):
    cin1 = prev_channel + input_channel
    ks = jax.random.split(key, 12)

    def conv_init(kw_, kb_, cin, cout):
        fan_in = 9 * cin
        bound = 1.0 / (fan_in ** 0.5)
        w = jax.random.uniform(kw_, (3, 3, cin, cout), jnp.float32, -bound, bound)
        b = jax.random.uniform(kb_, (cout,), jnp.float32, -bound, bound)
        return w, b

    def bn_init(kg, kb, km, kv, cout):
        # TODO(synk): BatchNorm3d is applied in inference mode with running
        # statistics folded to scale/shift; train-mode batch statistics are
        # not reproduced.
        gamma = 1.0 + 0.1 * jax.random.normal(kg, (cout,), jnp.float32)
        beta = 0.1 * jax.random.normal(kb, (cout,), jnp.float32)
        mean = 0.1 * jax.random.normal(km, (cout,), jnp.float32)
        var = 0.5 + jax.random.uniform(kv, (cout,), jnp.float32)
        scale = gamma / jnp.sqrt(var + BN_EPS)
        shift = beta - mean * scale
        return scale, shift

    w1, b1 = conv_init(ks[0], ks[1], cin1, output_channel)
    s1, h1 = bn_init(ks[2], ks[3], ks[4], ks[5], output_channel)
    w2, b2 = conv_init(ks[6], ks[7], output_channel, output_channel)
    s2, h2 = bn_init(ks[8], ks[9], ks[10], ks[11], output_channel)

    ref_params = dict(w1=w1, b1=b1, s1=s1, h1=h1, w2=w2, b2=b2, s2=s2, h2=h2)
    kernel_params = dict(
        w1=w1.reshape(9, cin1, output_channel).astype(jnp.bfloat16),
        w2=w2.reshape(9, output_channel, output_channel).astype(jnp.bfloat16),
        b1=b1.reshape(1, -1), s1=s1.reshape(1, -1), h1=h1.reshape(1, -1),
        b2=b2.reshape(1, -1), s2=s2.reshape(1, -1), h2=h2.reshape(1, -1),
    )
    return kernel_params, ref_params


# ---------------------------------------------------------------------------
if __name__ == "__main__":
    key = jax.random.PRNGKey(0)
    kp, kx, kprev = jax.random.split(key, 3)

    # DecoderBlock(prev_channel=16, input_channel=32, output_channel=32)
    # x: (N=2, 32, D=1, 8, 8), prev_feature_map: (2, 16, 1, 16, 16)  [NCDHW]
    prev_channel, input_channel, output_channel = 16, 32, 32
    N, D, H, W = 2, 1, 8, 8
    x = jax.random.normal(kx, (N, input_channel, D, H, W), jnp.float32)
    prev = jax.random.normal(
        kprev, (N, prev_channel, D, 2 * H, 2 * W), jnp.float32)

    kernel_params, ref_params = init_decoder_params(
        kp, prev_channel, input_channel, output_channel)

    fwd = jax.jit(lambda pv, xv: decoder_block_forward(pv, xv, kernel_params))
    out = fwd(prev, x)
    jax.block_until_ready(out)
    assert out.shape == (N, output_channel, D, 2 * H, 2 * W), out.shape

    # Validate against the pure-XLA f32 reference (kernel matmuls run in bf16).
    ref = jax.jit(
        lambda pv, xv: decoder_block_reference(pv, xv, ref_params))(prev, x)
    jax.block_until_ready(ref)
    max_err = float(jnp.max(jnp.abs(out - ref)))
    tol = 0.05 * float(jnp.max(jnp.abs(ref))) + 2e-2
    assert max_err <= tol, (max_err, tol)

    print("KERNEL_OK")
</pallas_src>

<mosaic_0001>
module attributes {stable_mosaic.version = 11 : i64} {
  func.func @_decoder_block_kernel(%arg0: i32, %arg1: memref<1x342x48xf32, #tpu.memory_space<vmem>>, %arg2: memref<288x1xf32, #tpu.memory_space<vmem>>, %arg3: memref<9x48x32xbf16, #tpu.memory_space<vmem>>, %arg4: memref<1x32xf32, #tpu.memory_space<vmem>>, %arg5: memref<1x32xf32, #tpu.memory_space<vmem>>, %arg6: memref<1x32xf32, #tpu.memory_space<vmem>>, %arg7: memref<9x32x32xbf16, #tpu.memory_space<vmem>>, %arg8: memref<1x32xf32, #tpu.memory_space<vmem>>, %arg9: memref<1x32xf32, #tpu.memory_space<vmem>>, %arg10: memref<1x32xf32, #tpu.memory_space<vmem>>, %arg11: memref<1x288x32xf32, #tpu.memory_space<vmem>>, %arg12: memref<352x32xf32, #tpu.memory_space<vmem>>) attributes {dimension_semantics = [#tpu.dimension_semantics<parallel>], iteration_bounds = array<i64: 2>, scalar_prefetch = 0 : i64, scratch_operands = 1 : i64, tpu.core_type = #tpu.core_type<tc>, window_params = [{transform_indices = @transform_0, window_bounds = array<i64: 1, 342, 48>}, {pipeline_mode = #tpu.pipeline_mode<synchronous>, transform_indices = @transform_1, window_bounds = array<i64: 288, 1>}, {pipeline_mode = #tpu.pipeline_mode<synchronous>, transform_indices = @transform_2, window_bounds = array<i64: 9, 48, 32>}, {pipeline_mode = #tpu.pipeline_mode<synchronous>, transform_indices = @transform_3, window_bounds = array<i64: 1, 32>}, {pipeline_mode = #tpu.pipeline_mode<synchronous>, transform_indices = @transform_4, window_bounds = array<i64: 1, 32>}, {pipeline_mode = #tpu.pipeline_mode<synchronous>, transform_indices = @transform_5, window_bounds = array<i64: 1, 32>}, {pipeline_mode = #tpu.pipeline_mode<synchronous>, transform_indices = @transform_6, window_bounds = array<i64: 9, 32, 32>}, {pipeline_mode = #tpu.pipeline_mode<synchronous>, transform_indices = @transform_7, window_bounds = array<i64: 1, 32>}, {pipeline_mode = #tpu.pipeline_mode<synchronous>, transform_indices = @transform_8, window_bounds = array<i64: 1, 32>}, {pipeline_mode = #tpu.pipeline_mode<synchronous>, transform_indices = @transform_9, window_bounds = array<i64: 1, 32>}, {transform_indices = @transform_10, window_bounds = array<i64: 1, 288, 32>}]} {
    %cst = arith.constant 0.000000e+00 : f32
    %0 = vector.broadcast %cst : f32 to vector<288x32xf32>
    %c0 = arith.constant 0 : index
    %c0_0 = arith.constant 0 : index
    %c0_1 = arith.constant 0 : index
    %1 = vector.load %arg1[%c0, %c0_0, %c0_1] : memref<1x342x48xf32, #tpu.memory_space<vmem>>, vector<1x288x48xf32>
    %2 = vector.shape_cast %1 : vector<1x288x48xf32> to vector<288x48xf32>
    %3 = arith.truncf %2 : vector<288x48xf32> to vector<288x48xbf16>
    %c0_2 = arith.constant 0 : index
    %c0_3 = arith.constant 0 : index
    %c0_4 = arith.constant 0 : index
    %4 = vector.load %arg3[%c0_2, %c0_3, %c0_4] : memref<9x48x32xbf16, #tpu.memory_space<vmem>>, vector<1x48x32xbf16>
    %5 = vector.shape_cast %4 : vector<1x48x32xbf16> to vector<48x32xbf16>
    %cst_5 = arith.constant dense<0.000000e+00> : vector<288x32xf32>
    %6 = tpu.matmul %3, %5, %cst_5 {dimension_numbers = #tpu.dot_dimension_numbers<[1], [0], [0], [1], [0, 0, 1, 1], [], []>} : vector<288x48xbf16>, vector<48x32xbf16>, vector<288x32xf32> -> vector<288x32xf32>
    %7 = arith.addf %0, %6 : vector<288x32xf32>
    %c0_6 = arith.constant 0 : index
    %c1 = arith.constant 1 : index
    %c0_7 = arith.constant 0 : index
    %8 = vector.load %arg1[%c0_6, %c1, %c0_7] : memref<1x342x48xf32, #tpu.memory_space<vmem>>, vector<1x288x48xf32>
    %9 = vector.shape_cast %8 : vector<1x288x48xf32> to vector<288x48xf32>
    %10 = arith.truncf %9 : vector<288x48xf32> to vector<288x48xbf16>
    %c1_8 = arith.constant 1 : index
    %c0_9 = arith.constant 0 : index
    %c0_10 = arith.constant 0 : index
    %11 = vector.load %arg3[%c1_8, %c0_9, %c0_10] : memref<9x48x32xbf16, #tpu.memory_space<vmem>>, vector<1x48x32xbf16>
    %12 = vector.shape_cast %11 : vector<1x48x32xbf16> to vector<48x32xbf16>
    %cst_11 = arith.constant dense<0.000000e+00> : vector<288x32xf32>
    %13 = tpu.matmul %10, %12, %cst_11 {dimension_numbers = #tpu.dot_dimension_numbers<[1], [0], [0], [1], [0, 0, 1, 1], [], []>} : vector<288x48xbf16>, vector<48x32xbf16>, vector<288x32xf32> -> vector<288x32xf32>
    %14 = arith.addf %7, %13 : vector<288x32xf32>
    %c0_12 = arith.constant 0 : index
    %c2 = arith.constant 2 : index
    %c0_13 = arith.constant 0 : index
    %15 = vector.load %arg1[%c0_12, %c2, %c0_13] : memref<1x342x48xf32, #tpu.memory_space<vmem>>, vector<1x288x48xf32>
    %16 = vector.shape_cast %15 : vector<1x288x48xf32> to vector<288x48xf32>
    %17 = arith.truncf %16 : vector<288x48xf32> to vector<288x48xbf16>
    %c2_14 = arith.constant 2 : index
    %c0_15 = arith.constant 0 : index
    %c0_16 = arith.constant 0 : index
    %18 = vector.load %arg3[%c2_14, %c0_15, %c0_16] : memref<9x48x32xbf16, #tpu.memory_space<vmem>>, vector<1x48x32xbf16>
    %19 = vector.shape_cast %18 : vector<1x48x32xbf16> to vector<48x32xbf16>
    %cst_17 = arith.constant dense<0.000000e+00> : vector<288x32xf32>
    %20 = tpu.matmul %17, %19, %cst_17 {dimension_numbers = #tpu.dot_dimension_numbers<[1], [0], [0], [1], [0, 0, 1, 1], [], []>} : vector<288x48xbf16>, vector<48x32xbf16>, vector<288x32xf32> -> vector<288x32xf32>
    %21 = arith.addf %14, %20 : vector<288x32xf32>
    %c0_18 = arith.constant 0 : index
    %c18 = arith.constant 18 : index
    %c0_19 = arith.constant 0 : index
    %22 = vector.load %arg1[%c0_18, %c18, %c0_19] : memref<1x342x48xf32, #tpu.memory_space<vmem>>, vector<1x288x48xf32>
    %23 = vector.shape_cast %22 : vector<1x288x48xf32> to vector<288x48xf32>
    %24 = arith.truncf %23 : vector<288x48xf32> to vector<288x48xbf16>
    %c3 = arith.constant 3 : index
    %c0_20 = arith.constant 0 : index
    %c0_21 = arith.constant 0 : index
    %25 = vector.load %arg3[%c3, %c0_20, %c0_21] : memref<9x48x32xbf16, #tpu.memory_space<vmem>>, vector<1x48x32xbf16>
    %26 = vector.shape_cast %25 : vector<1x48x32xbf16> to vector<48x32xbf16>
    %cst_22 = arith.constant dense<0.000000e+00> : vector<288x32xf32>
    %27 = tpu.matmul %24, %26, %cst_22 {dimension_numbers = #tpu.dot_dimension_numbers<[1], [0], [0], [1], [0, 0, 1, 1], [], []>} : vector<288x48xbf16>, vector<48x32xbf16>, vector<288x32xf32> -> vector<288x32xf32>
    %28 = arith.addf %21, %27 : vector<288x32xf32>
    %c0_23 = arith.constant 0 : index
    %c19 = arith.constant 19 : index
    %c0_24 = arith.constant 0 : index
    %29 = vector.load %arg1[%c0_23, %c19, %c0_24] : memref<1x342x48xf32, #tpu.memory_space<vmem>>, vector<1x288x48xf32>
    %30 = vector.shape_cast %29 : vector<1x288x48xf32> to vector<288x48xf32>
    %31 = arith.truncf %30 : vector<288x48xf32> to vector<288x48xbf16>
    %c4 = arith.constant 4 : index
    %c0_25 = arith.constant 0 : index
    %c0_26 = arith.constant 0 : index
    %32 = vector.load %arg3[%c4, %c0_25, %c0_26] : memref<9x48x32xbf16, #tpu.memory_space<vmem>>, vector<1x48x32xbf16>
    %33 = vector.shape_cast %32 : vector<1x48x32xbf16> to vector<48x32xbf16>
    %cst_27 = arith.constant dense<0.000000e+00> : vector<288x32xf32>
    %34 = tpu.matmul %31, %33, %cst_27 {dimension_numbers = #tpu.dot_dimension_numbers<[1], [0], [0], [1], [0, 0, 1, 1], [], []>} : vector<288x48xbf16>, vector<48x32xbf16>, vector<288x32xf32> -> vector<288x32xf32>
    %35 = arith.addf %28, %34 : vector<288x32xf32>
    %c0_28 = arith.constant 0 : index
    %c20 = arith.constant 20 : index
    %c0_29 = arith.constant 0 : index
    %36 = vector.load %arg1[%c0_28, %c20, %c0_29] : memref<1x342x48xf32, #tpu.memory_space<vmem>>, vector<1x288x48xf32>
    %37 = vector.shape_cast %36 : vector<1x288x48xf32> to vector<288x48xf32>
    %38 = arith.truncf %37 : vector<288x48xf32> to vector<288x48xbf16>
    %c5 = arith.constant 5 : index
    %c0_30 = arith.constant 0 : index
    %c0_31 = arith.constant 0 : index
    %39 = vector.load %arg3[%c5, %c0_30, %c0_31] : memref<9x48x32xbf16, #tpu.memory_space<vmem>>, vector<1x48x32xbf16>
    %40 = vector.shape_cast %39 : vector<1x48x32xbf16> to vector<48x32xbf16>
    %cst_32 = arith.constant dense<0.000000e+00> : vector<288x32xf32>
    %41 = tpu.matmul %38, %40, %cst_32 {dimension_numbers = #tpu.dot_dimension_numbers<[1], [0], [0], [1], [0, 0, 1, 1], [], []>} : vector<288x48xbf16>, vector<48x32xbf16>, vector<288x32xf32> -> vector<288x32xf32>
    %42 = arith.addf %35, %41 : vector<288x32xf32>
    %c0_33 = arith.constant 0 : index
    %c36 = arith.constant 36 : index
    %c0_34 = arith.constant 0 : index
    %43 = vector.load %arg1[%c0_33, %c36, %c0_34] : memref<1x342x48xf32, #tpu.memory_space<vmem>>, vector<1x288x48xf32>
    %44 = vector.shape_cast %43 : vector<1x288x48xf32> to vector<288x48xf32>
    %45 = arith.truncf %44 : vector<288x48xf32> to vector<288x48xbf16>
    %c6 = arith.constant 6 : index
    %c0_35 = arith.constant 0 : index
    %c0_36 = arith.constant 0 : index
    %46 = vector.load %arg3[%c6, %c0_35, %c0_36] : memref<9x48x32xbf16, #tpu.memory_space<vmem>>, vector<1x48x32xbf16>
    %47 = vector.shape_cast %46 : vector<1x48x32xbf16> to vector<48x32xbf16>
    %cst_37 = arith.constant dense<0.000000e+00> : vector<288x32xf32>
    %48 = tpu.matmul %45, %47, %cst_37 {dimension_numbers = #tpu.dot_dimension_numbers<[1], [0], [0], [1], [0, 0, 1, 1], [], []>} : vector<288x48xbf16>, vector<48x32xbf16>, vector<288x32xf32> -> vector<288x32xf32>
    %49 = arith.addf %42, %48 : vector<288x32xf32>
    %c0_38 = arith.constant 0 : index
    %c37 = arith.constant 37 : index
    %c0_39 = arith.constant 0 : index
    %50 = vector.load %arg1[%c0_38, %c37, %c0_39] : memref<1x342x48xf32, #tpu.memory_space<vmem>>, vector<1x288x48xf32>
    %51 = vector.shape_cast %50 : vector<1x288x48xf32> to vector<288x48xf32>
    %52 = arith.truncf %51 : vector<288x48xf32> to vector<288x48xbf16>
    %c7 = arith.constant 7 : index
    %c0_40 = arith.constant 0 : index
    %c0_41 = arith.constant 0 : index
    %53 = vector.load %arg3[%c7, %c0_40, %c0_41] : memref<9x48x32xbf16, #tpu.memory_space<vmem>>, vector<1x48x32xbf16>
    %54 = vector.shape_cast %53 : vector<1x48x32xbf16> to vector<48x32xbf16>
    %cst_42 = arith.constant dense<0.000000e+00> : vector<288x32xf32>
    %55 = tpu.matmul %52, %54, %cst_42 {dimension_numbers = #tpu.dot_dimension_numbers<[1], [0], [0], [1], [0, 0, 1, 1], [], []>} : vector<288x48xbf16>, vector<48x32xbf16>, vector<288x32xf32> -> vector<288x32xf32>
    %56 = arith.addf %49, %55 : vector<288x32xf32>
    %c0_43 = arith.constant 0 : index
    %c38 = arith.constant 38 : index
    %c0_44 = arith.constant 0 : index
    %57 = vector.load %arg1[%c0_43, %c38, %c0_44] : memref<1x342x48xf32, #tpu.memory_space<vmem>>, vector<1x288x48xf32>
    %58 = vector.shape_cast %57 : vector<1x288x48xf32> to vector<288x48xf32>
    %59 = arith.truncf %58 : vector<288x48xf32> to vector<288x48xbf16>
    %c8 = arith.constant 8 : index
    %c0_45 = arith.constant 0 : index
    %c0_46 = arith.constant 0 : index
    %60 = vector.load %arg3[%c8, %c0_45, %c0_46] : memref<9x48x32xbf16, #tpu.memory_space<vmem>>, vector<1x48x32xbf16>
    %61 = vector.shape_cast %60 : vector<1x48x32xbf16> to vector<48x32xbf16>
    %cst_47 = arith.constant dense<0.000000e+00> : vector<288x32xf32>
    %62 = tpu.matmul %59, %61, %cst_47 {dimension_numbers = #tpu.dot_dimension_numbers<[1], [0], [0], [1], [0, 0, 1, 1], [], []>} : vector<288x48xbf16>, vector<48x32xbf16>, vector<288x32xf32> -> vector<288x32xf32>
    %63 = arith.addf %56, %62 : vector<288x32xf32>
    %c0_48 = arith.constant 0 : index
    %c0_49 = arith.constant 0 : index
    %64 = vector.load %arg4[%c0_48, %c0_49] : memref<1x32xf32, #tpu.memory_space<vmem>>, vector<1x32xf32>
    %65 = vector.broadcast %64 : vector<1x32xf32> to vector<288x32xf32>
    %66 = arith.addf %63, %65 : vector<288x32xf32>
    %cst_50 = arith.constant 0.000000e+00 : f32
    %67 = vector.broadcast %cst_50 : f32 to vector<288x32xf32>
    %68 = arith.maximumf %66, %67 : vector<288x32xf32>
    %c0_51 = arith.constant 0 : index
    %c0_52 = arith.constant 0 : index
    %69 = vector.load %arg5[%c0_51, %c0_52] : memref<1x32xf32, #tpu.memory_space<vmem>>, vector<1x32xf32>
    %70 = vector.broadcast %69 : vector<1x32xf32> to vector<288x32xf32>
    %71 = arith.mulf %68, %70 : vector<288x32xf32>
    %c0_53 = arith.constant 0 : index
    %c0_54 = arith.constant 0 : index
    %72 = vector.load %arg6[%c0_53, %c0_54] : memref<1x32xf32, #tpu.memory_space<vmem>>, vector<1x32xf32>
    %73 = vector.broadcast %72 : vector<1x32xf32> to vector<288x32xf32>
    %74 = arith.addf %71, %73 : vector<288x32xf32>
    %c0_55 = arith.constant 0 : index
    %c0_56 = arith.constant 0 : index
    %75 = vector.load %arg2[%c0_55, %c0_56] : memref<288x1xf32, #tpu.memory_space<vmem>>, vector<288x1xf32>
    %76 = vector.broadcast %75 : vector<288x1xf32> to vector<288x32xf32>
    %77 = arith.mulf %74, %76 : vector<288x32xf32>
    %cst_57 = arith.constant 0.000000e+00 : f32
    %78 = vector.broadcast %cst_57 : f32 to vector<352x32xf32>
    %c0_58 = arith.constant 0 : index
    %c0_59 = arith.constant 0 : index
    %79 = vector.load %arg12[%c0_58, %c0_59] : memref<352x32xf32, #tpu.memory_space<vmem>>, vector<352x32xf32>
    tpu.vector_store %arg12[%c0_58, %c0_59], %78 {strides = array<i32>} : memref<352x32xf32, #tpu.memory_space<vmem>>, vector<352x32xf32>,
    %c32 = arith.constant 32 : index
    %c0_60 = arith.constant 0 : index
    %80 = vector.load %arg12[%c32, %c0_60] : memref<352x32xf32, #tpu.memory_space<vmem>>, vector<288x32xf32>
    tpu.vector_store %arg12[%c32, %c0_60], %77 {strides = array<i32>} : memref<352x32xf32, #tpu.memory_space<vmem>>, vector<288x32xf32>,
    %cst_61 = arith.constant 0.000000e+00 : f32
    %81 = vector.broadcast %cst_61 : f32 to vector<288x32xf32>
    %c13 = arith.constant 13 : index
    %c0_62 = arith.constant 0 : index
    %82 = vector.load %arg12[%c13, %c0_62] : memref<352x32xf32, #tpu.memory_space<vmem>>, vector<288x32xf32>
    %83 = arith.truncf %82 : vector<288x32xf32> to vector<288x32xbf16>
    %c0_63 = arith.constant 0 : index
    %c0_64 = arith.constant 0 : index
    %c0_65 = arith.constant 0 : index
    %84 = vector.load %arg7[%c0_63, %c0_64, %c0_65] : memref<9x32x32xbf16, #tpu.memory_space<vmem>>, vector<1x32x32xbf16>
    %85 = vector.shape_cast %84 : vector<1x32x32xbf16> to vector<32x32xbf16>
    %cst_66 = arith.constant dense<0.000000e+00> : vector<288x32xf32>
    %86 = tpu.matmul %83, %85, %cst_66 {dimension_numbers = #tpu.dot_dimension_numbers<[1], [0], [0], [1], [0, 0, 1, 1], [], []>} : vector<288x32xbf16>, vector<32x32xbf16>, vector<288x32xf32> -> vector<288x32xf32>
    %87 = arith.addf %81, %86 : vector<288x32xf32>
    %c14 = arith.constant 14 : index
    %c0_67 = arith.constant 0 : index
    %88 = vector.load %arg12[%c14, %c0_67] : memref<352x32xf32, #tpu.memory_space<vmem>>, vector<288x32xf32>
    %89 = arith.truncf %88 : vector<288x32xf32> to vector<288x32xbf16>
    %c1_68 = arith.constant 1 : index
    %c0_69 = arith.constant 0 : index
    %c0_70 = arith.constant 0 : index
    %90 = vector.load %arg7[%c1_68, %c0_69, %c0_70] : memref<9x32x32xbf16, #tpu.memory_space<vmem>>, vector<1x32x32xbf16>
    %91 = vector.shape_cast %90 : vector<1x32x32xbf16> to vector<32x32xbf16>
    %cst_71 = arith.constant dense<0.000000e+00> : vector<288x32xf32>
    %92 = tpu.matmul %89, %91, %cst_71 {dimension_numbers = #tpu.dot_dimension_numbers<[1], [0], [0], [1], [0, 0, 1, 1], [], []>} : vector<288x32xbf16>, vector<32x32xbf16>, vector<288x32xf32> -> vector<288x32xf32>
    %93 = arith.addf %87, %92 : vector<288x32xf32>
    %c15 = arith.constant 15 : index
    %c0_72 = arith.constant 0 : index
    %94 = vector.load %arg12[%c15, %c0_72] : memref<352x32xf32, #tpu.memory_space<vmem>>, vector<288x32xf32>
    %95 = arith.truncf %94 : vector<288x32xf32> to vector<288x32xbf16>
    %c2_73 = arith.constant 2 : index
    %c0_74 = arith.constant 0 : index
    %c0_75 = arith.constant 0 : index
    %96 = vector.load %arg7[%c2_73, %c0_74, %c0_75] : memref<9x32x32xbf16, #tpu.memory_space<vmem>>, vector<1x32x32xbf16>
    %97 = vector.shape_cast %96 : vector<1x32x32xbf16> to vector<32x32xbf16>
    %cst_76 = arith.constant dense<0.000000e+00> : vector<288x32xf32>
    %98 = tpu.matmul %95, %97, %cst_76 {dimension_numbers = #tpu.dot_dimension_numbers<[1], [0], [0], [1], [0, 0, 1, 1], [], []>} : vector<288x32xbf16>, vector<32x32xbf16>, vector<288x32xf32> -> vector<288x32xf32>
    %99 = arith.addf %93, %98 : vector<288x32xf32>
    %c31 = arith.constant 31 : index
    %c0_77 = arith.constant 0 : index
    %100 = vector.load %arg12[%c31, %c0_77] : memref<352x32xf32, #tpu.memory_space<vmem>>, vector<288x32xf32>
    %101 = arith.truncf %100 : vector<288x32xf32> to vector<288x32xbf16>
    %c3_78 = arith.constant 3 : index
    %c0_79 = arith.constant 0 : index
    %c0_80 = arith.constant 0 : index
    %102 = vector.load %arg7[%c3_78, %c0_79, %c0_80] : memref<9x32x32xbf16, #tpu.memory_space<vmem>>, vector<1x32x32xbf16>
    %103 = vector.shape_cast %102 : vector<1x32x32xbf16> to vector<32x32xbf16>
    %cst_81 = arith.constant dense<0.000000e+00> : vector<288x32xf32>
    %104 = tpu.matmul %101, %103, %cst_81 {dimension_numbers = #tpu.dot_dimension_numbers<[1], [0], [0], [1], [0, 0, 1, 1], [], []>} : vector<288x32xbf16>, vector<32x32xbf16>, vector<288x32xf32> -> vector<288x32xf32>
    %105 = arith.addf %99, %104 : vector<288x32xf32>
    %c32_82 = arith.constant 32 : index
    %c0_83 = arith.constant 0 : index
    %106 = vector.load %arg12[%c32_82, %c0_83] : memref<352x32xf32, #tpu.memory_space<vmem>>, vector<288x32xf32>
    %107 = arith.truncf %106 : vector<288x32xf32> to vector<288x32xbf16>
    %c4_84 = arith.constant 4 : index
    %c0_85 = arith.constant 0 : index
    %c0_86 = arith.constant 0 : index
    %108 = vector.load %arg7[%c4_84, %c0_85, %c0_86] : memref<9x32x32xbf16, #tpu.memory_space<vmem>>, vector<1x32x32xbf16>
    %109 = vector.shape_cast %108 : vector<1x32x32xbf16> to vector<32x32xbf16>
    %cst_87 = arith.constant dense<0.000000e+00> : vector<288x32xf32>
    %110 = tpu.matmul %107, %109, %cst_87 {dimension_numbers = #tpu.dot_dimension_numbers<[1], [0], [0], [1], [0, 0, 1, 1], [], []>} : vector<288x32xbf16>, vector<32x32xbf16>, vector<288x32xf32> -> vector<288x32xf32>
    %111 = arith.addf %105, %110 : vector<288x32xf32>
    %c33 = arith.constant 33 : index
    %c0_88 = arith.constant 0 : index
    %112 = vector.load %arg12[%c33, %c0_88] : memref<352x32xf32, #tpu.memory_space<vmem>>, vector<288x32xf32>
    %113 = arith.truncf %112 : vector<288x32xf32> to vector<288x32xbf16>
    %c5_89 = arith.constant 5 : index
    %c0_90 = arith.constant 0 : index
    %c0_91 = arith.constant 0 : index
    %114 = vector.load %arg7[%c5_89, %c0_90, %c0_91] : memref<9x32x32xbf16, #tpu.memory_space<vmem>>, vector<1x32x32xbf16>
    %115 = vector.shape_cast %114 : vector<1x32x32xbf16> to vector<32x32xbf16>
    %cst_92 = arith.constant dense<0.000000e+00> : vector<288x32xf32>
    %116 = tpu.matmul %113, %115, %cst_92 {dimension_numbers = #tpu.dot_dimension_numbers<[1], [0], [0], [1], [0, 0, 1, 1], [], []>} : vector<288x32xbf16>, vector<32x32xbf16>, vector<288x32xf32> -> vector<288x32xf32>
    %117 = arith.addf %111, %116 : vector<288x32xf32>
    %c49 = arith.constant 49 : index
    %c0_93 = arith.constant 0 : index
    %118 = vector.load %arg12[%c49, %c0_93] : memref<352x32xf32, #tpu.memory_space<vmem>>, vector<288x32xf32>
    %119 = arith.truncf %118 : vector<288x32xf32> to vector<288x32xbf16>
    %c6_94 = arith.constant 6 : index
    %c0_95 = arith.constant 0 : index
    %c0_96 = arith.constant 0 : index
    %120 = vector.load %arg7[%c6_94, %c0_95, %c0_96] : memref<9x32x32xbf16, #tpu.memory_space<vmem>>, vector<1x32x32xbf16>
    %121 = vector.shape_cast %120 : vector<1x32x32xbf16> to vector<32x32xbf16>
    %cst_97 = arith.constant dense<0.000000e+00> : vector<288x32xf32>
    %122 = tpu.matmul %119, %121, %cst_97 {dimension_numbers = #tpu.dot_dimension_numbers<[1], [0], [0], [1], [0, 0, 1, 1], [], []>} : vector<288x32xbf16>, vector<32x32xbf16>, vector<288x32xf32> -> vector<288x32xf32>
    %123 = arith.addf %117, %122 : vector<288x32xf32>
    %c50 = arith.constant 50 : index
    %c0_98 = arith.constant 0 : index
    %124 = vector.load %arg12[%c50, %c0_98] : memref<352x32xf32, #tpu.memory_space<vmem>>, vector<288x32xf32>
    %125 = arith.truncf %124 : vector<288x32xf32> to vector<288x32xbf16>
    %c7_99 = arith.constant 7 : index
    %c0_100 = arith.constant 0 : index
    %c0_101 = arith.constant 0 : index
    %126 = vector.load %arg7[%c7_99, %c0_100, %c0_101] : memref<9x32x32xbf16, #tpu.memory_space<vmem>>, vector<1x32x32xbf16>
    %127 = vector.shape_cast %126 : vector<1x32x32xbf16> to vector<32x32xbf16>
    %cst_102 = arith.constant dense<0.000000e+00> : vector<288x32xf32>
    %128 = tpu.matmul %125, %127, %cst_102 {dimension_numbers = #tpu.dot_dimension_numbers<[1], [0], [0], [1], [0, 0, 1, 1], [], []>} : vector<288x32xbf16>, vector<32x32xbf16>, vector<288x32xf32> -> vector<288x32xf32>
    %129 = arith.addf %123, %128 : vector<288x32xf32>
    %c51 = arith.constant 51 : index
    %c0_103 = arith.constant 0 : index
    %130 = vector.load %arg12[%c51, %c0_103] : memref<352x32xf32, #tpu.memory_space<vmem>>, vector<288x32xf32>
    %131 = arith.truncf %130 : vector<288x32xf32> to vector<288x32xbf16>
    %c8_104 = arith.constant 8 : index
    %c0_105 = arith.constant 0 : index
    %c0_106 = arith.constant 0 : index
    %132 = vector.load %arg7[%c8_104, %c0_105, %c0_106] : memref<9x32x32xbf16, #tpu.memory_space<vmem>>, vector<1x32x32xbf16>
    %133 = vector.shape_cast %132 : vector<1x32x32xbf16> to vector<32x32xbf16>
    %cst_107 = arith.constant dense<0.000000e+00> : vector<288x32xf32>
    %134 = tpu.matmul %131, %133, %cst_107 {dimension_numbers = #tpu.dot_dimension_numbers<[1], [0], [0], [1], [0, 0, 1, 1], [], []>} : vector<288x32xbf16>, vector<32x32xbf16>, vector<288x32xf32> -> vector<288x32xf32>
    %135 = arith.addf %129, %134 : vector<288x32xf32>
    %c0_108 = arith.constant 0 : index
    %c0_109 = arith.constant 0 : index
    %136 = vector.load %arg8[%c0_108, %c0_109] : memref<1x32xf32, #tpu.memory_space<vmem>>, vector<1x32xf32>
    %137 = vector.broadcast %136 : vector<1x32xf32> to vector<288x32xf32>
    %138 = arith.addf %135, %137 : vector<288x32xf32>
    %cst_110 = arith.constant 0.000000e+00 : f32
    %139 = vector.broadcast %cst_110 : f32 to vector<288x32xf32>
    %140 = arith.maximumf %138, %139 : vector<288x32xf32>
    %c0_111 = arith.constant 0 : index
    %c0_112 = arith.constant 0 : index
    %141 = vector.load %arg9[%c0_111, %c0_112] : memref<1x32xf32, #tpu.memory_space<vmem>>, vector<1x32xf32>
    %142 = vector.broadcast %141 : vector<1x32xf32> to vector<288x32xf32>
    %143 = arith.mulf %140, %142 : vector<288x32xf32>
    %c0_113 = arith.constant 0 : index
    %c0_114 = arith.constant 0 : index
    %144 = vector.load %arg10[%c0_113, %c0_114] : memref<1x32xf32, #tpu.memory_space<vmem>>, vector<1x32xf32>
    %145 = vector.broadcast %144 : vector<1x32xf32> to vector<288x32xf32>
    %146 = arith.addf %143, %145 : vector<288x32xf32>
    %c0_115 = arith.constant 0 : index
    %c0_116 = arith.constant 0 : index
    %c0_117 = arith.constant 0 : index
    %147 = vector.load %arg11[%c0_115, %c0_116, %c0_117] : memref<1x288x32xf32, #tpu.memory_space<vmem>>, vector<1x288x32xf32>
    %148 = vector.shape_cast %147 : vector<1x288x32xf32> to vector<288x32xf32>
    %149 = vector.shape_cast %146 : vector<288x32xf32> to vector<1x288x32xf32>
    tpu.vector_store %arg11[%c0_115, %c0_116, %c0_117], %149 {strides = array<i32>} : memref<1x288x32xf32, #tpu.memory_space<vmem>>, vector<1x288x32xf32>,
    return
  }
  func.func @transform_0(%arg0: i32) -> (i32, i32, i32) {
    %c0_i32 = arith.constant 0 : i32
    %c0_i32_0 = arith.constant 0 : i32
    %c0_i32_1 = arith.constant 0 : i32
    return %arg0, %c0_i32, %c0_i32_0 : i32, i32, i32
  }
  func.func @transform_1(%arg0: i32) -> (i32, i32) {
    %c0_i32 = arith.constant 0 : i32
    %c0_i32_0 = arith.constant 0 : i32
    %c0_i32_1 = arith.constant 0 : i32
    return %c0_i32, %c0_i32_0 : i32, i32
  }
  func.func @transform_2(%arg0: i32) -> (i32, i32, i32) {
    %c0_i32 = arith.constant 0 : i32
    %c0_i32_0 = arith.constant 0 : i32
    %c0_i32_1 = arith.constant 0 : i32
    %c0_i32_2 = arith.constant 0 : i32
    return %c0_i32, %c0_i32_0, %c0_i32_1 : i32, i32, i32
  }
  func.func @transform_3(%arg0: i32) -> (i32, i32) {
    %c0_i32 = arith.constant 0 : i32
    %c0_i32_0 = arith.constant 0 : i32
    %c0_i32_1 = arith.constant 0 : i32
    return %c0_i32, %c0_i32_0 : i32, i32
  }
  func.func @transform_4(%arg0: i32) -> (i32, i32) {
    %c0_i32 = arith.constant 0 : i32
    %c0_i32_0 = arith.constant 0 : i32
    %c0_i32_1 = arith.constant 0 : i32
    return %c0_i32, %c0_i32_0 : i32, i32
  }
  func.func @transform_5(%arg0: i32) -> (i32, i32) {
    %c0_i32 = arith.constant 0 : i32
    %c0_i32_0 = arith.constant 0 : i32
    %c0_i32_1 = arith.constant 0 : i32
    return %c0_i32, %c0_i32_0 : i32, i32
  }
  func.func @transform_6(%arg0: i32) -> (i32, i32, i32) {
    %c0_i32 = arith.constant 0 : i32
    %c0_i32_0 = arith.constant 0 : i32
    %c0_i32_1 = arith.constant 0 : i32
    %c0_i32_2 = arith.constant 0 : i32
    return %c0_i32, %c0_i32_0, %c0_i32_1 : i32, i32, i32
  }
  func.func @transform_7(%arg0: i32) -> (i32, i32) {
    %c0_i32 = arith.constant 0 : i32
    %c0_i32_0 = arith.constant 0 : i32
    %c0_i32_1 = arith.constant 0 : i32
    return %c0_i32, %c0_i32_0 : i32, i32
  }
  func.func @transform_8(%arg0: i32) -> (i32, i32) {
    %c0_i32 = arith.constant 0 : i32
    %c0_i32_0 = arith.constant 0 : i32
    %c0_i32_1 = arith.constant 0 : i32
    return %c0_i32, %c0_i32_0 : i32, i32
  }
  func.func @transform_9(%arg0: i32) -> (i32, i32) {
    %c0_i32 = arith.constant 0 : i32
    %c0_i32_0 = arith.constant 0 : i32
    %c0_i32_1 = arith.constant 0 : i32
    return %c0_i32, %c0_i32_0 : i32, i32
  }
  func.func @transform_10(%arg0: i32) -> (i32, i32, i32) {
    %c0_i32 = arith.constant 0 : i32
    %c0_i32_0 = arith.constant 0 : i32
    %c0_i32_1 = arith.constant 0 : i32
    return %arg0, %c0_i32, %c0_i32_0 : i32, i32, i32
  }
}

</mosaic_0001>

<bundles_post_ra>
// kernel: _lambda_.1
= control target key start
LH: loop header
LB: loop body
LE: loop exit
PB: predicated region body
PF: predicated region fallthrough
CT: control target
= control target key end

     0   :  { %s8821_s13 = smov 0   ;;  %s11512_s0 = inlined_call_operand.vmem [shape: f32[2,342,48], index: 0, kind: input, shape index: {}]   ;;  %s11513_s1 = inlined_call_operand.vmem [shape: f32[288,1], index: 1, kind: input, shape index: {}]   ;;  %s11514_s2 = inlined_call_operand.vmem [shape: bf16[9,48,32], index: 2, kind: input, shape index: {}]   ;;  %s11515_s3 = inlined_call_operand.vmem [shape: f32[1,32], index: 3, kind: input, shape index: {}]   ;;  %s11516_s4 = inlined_call_operand.vmem [shape: f32[1,32], index: 4, kind: input, shape index: {}]   ;;  %s11517_s5 = inlined_call_operand.vmem [shape: f32[1,32], index: 5, kind: input, shape index: {}]   ;;  %s11518_s6 = inlined_call_operand.vmem [shape: bf16[9,32,32], index: 6, kind: input, shape index: {}]   ;;  %s11519_s7 = inlined_call_operand.vmem [shape: f32[1,32], index: 7, kind: input, shape index: {}]   ;;  %s11520_s8 = inlined_call_operand.vmem [shape: f32[1,32], index: 8, kind: input, shape index: {}]   ;;  %s11521_s9 = inlined_call_operand.vmem [shape: f32[1,32], index: 9, kind: input, shape index: {}]   ;;  %s11522_s10 = inlined_call_operand.vmem [shape: f32[2,288,32], index: 10, kind: output, shape index: {}]  }
   0x1 LB: > { %s7126_s14 = sadd.s32 4294967295, %s8762_s13   ;;  %p7130_p0 = scmp.ge.s32.totalorder %s8762_s13, 1  ;;  %s8762_s13 = sphi %s8821_s13, %s20_s13  }
   0x2   : > { %p312_p1 = scmp.lt.s32.totalorder %s8762_s13, 3 }
   0x4   : > { %p313_p2 = pnand %p7130_p0, %p312_p1 }
   0x6   : > { %316 = sbr.rel (%p313_p2) target bundleno = 1099 (0x44b), region = 60 }
   0xb   : > { %v8711_v0 = vld [vmem:[%s11514_s2 + $0x28] sm:$0xff]   ;;  %p350_p3 = scmp.lt.s32.totalorder %s7126_s14, 1  ;;  %v8712_v1 = vld [vmem:[%s11514_s2 + $0x10] sm:$0xff]   ;;  %v8713_v2 = vld [vmem:[%s11514_s2 + $0x20] sm:$0xff]   ;;  %vm500_vm0 = vcmask 392192   ;;  %vm3820_vm1 = vcmask 261120  }
   0xc   : > { %7959 = vmatprep.subr.bf16.mxu0 %v8711_v0  ;;  %8001 = vmatprep.subr.bf16.mxu1 %v8712_v1  ;;  %v8714_v3 = vld [vmem:[%s11514_s2 + $0x8] sm:$0xff]   ;;  %v8715_v4 = vld [vmem:[%s11514_s2 + $0x18] sm:$0xff]   ;;  %v8716_v5 = vld [vmem:[%s11514_s2] sm:$0xff]  }
   0xd   : > { %s11624_s14 = smov (!%p350_p3, %s7126_s14), 1  ;;  %7960 = vmatpush3.bf16.msra.mxu0 %v8711_v0  ;;  %8002 = vmatpush3.bf16.msra.mxu1 %v8712_v1  ;;  %v8717_v6 = vld [vmem:[%s11514_s2 + $0x40] sm:$0xff]   ;;  %v8718_v34 = vld [vmem:[%s11514_s2 + $0x38] sm:$0xff]   ;;  %v8719_v49 = vld [vmem:[%s11514_s2 + $0x30] sm:$0xff]  }
   0xe   : > { %7961 = vmatprep.subr.bf16.mxu0 %v8713_v2  ;;  %s8697_s25 = smul.u32 344, %s11624_s14  ;;  %8003 = vmatprep.subr.bf16.mxu1 %v8714_v3  ;;  %v8720_v54 = vld [vmem:[%s11514_s2 + $0x58] sm:$0xff]   ;;  %v8721_v61 = vld [vmem:[%s11514_s2 + $0x50] sm:$0xff]   ;;  %v8722_v1 = vld [vmem:[%s11514_s2 + $0x48] sm:$0xff]  }
   0xf   : > { %s8698_s15 = smul.u32 288, %s11624_s14 }
  0x10   : > { %s8853_s30 = scalar_lea.vmem %s11512_s0, %s8697_s25 }
  0x11   : > { %7962 = vmatpush3.bf16.msra.mxu0 %v8713_v2  ;;  %v421_v7 = vld [vmem:[%s8853_s30 + $0x1] sm:$0xff]  ;;  %v422_v8 = vld [vmem:[%s8853_s30 + $0x9] sm:$0xff]  ;;  %8004 = vmatpush3.bf16.msra.mxu1 %v8714_v3  ;;  %v423_v12 = vld [vmem:[%s8853_s30 + $0x11] sm:$0xff]  ;;  %s11259_s21 = scalar_lea.vmem %s11522_s10, %s8698_s15 }
  0x12   : > { %v361_v9 = vld [vmem:[%s8853_s30] sm:$0xff]  ;;  %7963 = vmatprep.subr.bf16.mxu0 %v8715_v4  ;;  %v457_v10 = vpack.c.bf16 %v422_v8, %v421_v7  ;;  %v362_v11 = vld [vmem:[%s8853_s30 + $0x8] sm:$0xff]  ;;  %8005 = vmatprep.subr.bf16.mxu1 %v8716_v5  ;;  %v363_v15 = vld [vmem:[%s8853_s30 + $0x10] sm:$0xff] }
  0x13   : > { %v424_v13 = vld [vmem:[%s8853_s30 + $0x19] sm:$0xff]  ;;  %v397_v14 = vpack.c.bf16 %v362_v11, %v361_v9  ;;  %v425_v17 = vld [vmem:[%s8853_s30 + $0x21] sm:$0xff]  ;;  %v426_v19 = vld [vmem:[%s8853_s30 + $0x29] sm:$0xff] }
  0x14   : > { %v364_v16 = vld [vmem:[%s8853_s30 + $0x18] sm:$0xff]  ;;  %7965 = vmatprep.mubr.msk.bf16.mxu0 %vm500_vm0, %v457_v10  ;;  %v458_v18 = vpack.c.bf16 %v424_v13, %v423_v12  ;;  %v365_v20 = vld [vmem:[%s8853_s30 + $0x20] sm:$0xff]  ;;  %v366_v21 = vld [vmem:[%s8853_s30 + $0x28] sm:$0xff]  ;;  %v459_v23 = vpack.c.bf16 %v426_v19, %v425_v17 }
  0x15   : > { %7964 = vmatpush3.bf16.msra.mxu0 %v8715_v4  ;;  %8007 = vmatprep.mubr.msk.bf16.mxu1 %vm500_vm0, %v397_v14  ;;  %v398_v22 = vpack.c.bf16 %v364_v16, %v363_v15  ;;  %v399_v24 = vpack.c.bf16 %v366_v21, %v365_v20  ;;  %v427_v25 = vld [vmem:[%s8853_s30 + $0x31] sm:$0xff]  ;;  %v428_v26 = vld [vmem:[%s8853_s30 + $0x39] sm:$0xff]  ;;  %v429_v29 = vld [vmem:[%s8853_s30 + $0x41] sm:$0xff] }
  0x16   : > { %8006 = vmatpush3.bf16.msra.mxu1 %v8716_v5  ;;  %8043 = vmatprep.subr.bf16.mxu0 %v8717_v6  ;;  %v367_v27 = vld [vmem:[%s8853_s30 + $0x30] sm:$0xff]  ;;  %v368_v28 = vld [vmem:[%s8853_s30 + $0x38] sm:$0xff]  ;;  %v369_v31 = vld [vmem:[%s8853_s30 + $0x40] sm:$0xff]  ;;  %v460_v33 = vpack.c.bf16 %v428_v26, %v427_v25 }
  0x17   : > { %v430_v30 = vld [vmem:[%s8853_s30 + $0x49] sm:$0xff]  ;;  %v400_v35 = vpack.c.bf16 %v368_v28, %v367_v27  ;;  %v431_v38 = vld [vmem:[%s8853_s30 + $0x51] sm:$0xff]  ;;  %v432_v39 = vld [vmem:[%s8853_s30 + $0x59] sm:$0xff]  ;;  %8085 = vmatprep.subr.bf16.mxu1 %v8720_v54 }
  0x18   : > { %7966 = vmatmul.mubr.msk.bf16.vlgmr.msra.gmra.mxu0 %vm500_vm0, %v458_v18  ;;  %v370_v32 = vld [vmem:[%s8853_s30 + $0x48] sm:$0xff]  ;;  %v461_v36 = vpack.c.bf16 %v430_v30, %v429_v29  ;;  %v371_v40 = vld [vmem:[%s8853_s30 + $0x50] sm:$0xff]  ;;  %v372_v41 = vld [vmem:[%s8853_s30 + $0x58] sm:$0xff]  ;;  %v462_v46 = vpack.c.bf16 %v432_v39, %v431_v38 }
  0x19   : > { %8008 = vmatmul.mubr.msk.bf16.vlgmr.msra.gmra.mxu1 %vm500_vm0, %v398_v22  ;;  %8044 = vmatpush3.bf16.msra.mxu0 %v8717_v6  ;;  %v401_v37 = vpack.c.bf16 %v370_v32, %v369_v31  ;;  %v433_v42 = vld [vmem:[%s8853_s30 + $0x61] sm:$0xff]  ;;  %v434_v43 = vld [vmem:[%s8853_s30 + $0x69] sm:$0xff]  ;;  %v402_v47 = vpack.c.bf16 %v372_v41, %v371_v40  ;;  %v435_v51 = vld [vmem:[%s8853_s30 + $0x71] sm:$0xff] }
  0x1a   : > { %7969 = vmatprep.mubr.msk.bf16.mxu0 %vm500_vm0, %v459_v23  ;;  %8011 = vmatprep.mubr.msk.bf16.mxu1 %vm500_vm0, %v399_v24  ;;  %v373_v44 = vld [vmem:[%s8853_s30 + $0x60] sm:$0xff]  ;;  %v374_v45 = vld [vmem:[%s8853_s30 + $0x68] sm:$0xff]  ;;  %v463_v48 = vpack.c.bf16 %v434_v43, %v433_v42  ;;  %v375_v53 = vld [vmem:[%s8853_s30 + $0x70] sm:$0xff] }
  0x1b   : > { %8045 = vmatprep.subr.bf16.mxu0 %v8718_v34  ;;  %v403_v50 = vpack.c.bf16 %v374_v45, %v373_v44  ;;  %v436_v52 = vld [vmem:[%s8853_s30 + $0x79] sm:$0xff]  ;;  %v437_v56 = vld [vmem:[%s8853_s30 + $0x81] sm:$0xff]  ;;  %v438_v57 = vld [vmem:[%s8853_s30 + $0x89] sm:$0xff]  ;;  %8086 = vmatpush3.bf16.msra.mxu1 %v8720_v54 }
  0x1c   : > { %v376_v55 = vld [vmem:[%s8853_s30 + $0x78] sm:$0xff]  ;;  %v377_v58 = vld [vmem:[%s8853_s30 + $0x80] sm:$0xff]  ;;  %v378_v59 = vld [vmem:[%s8853_s30 + $0x88] sm:$0xff]  ;;  %v464_v60 = vpack.c.bf16 %v436_v52, %v435_v51  ;;  %v465_v63 = vpack.c.bf16 %v438_v57, %v437_v56  ;;  %8087 = vmatprep.subr.bf16.mxu1 %v8721_v61 }
  0x1d   : > { %8046 = vmatpush3.bf16.msra.mxu0 %v8718_v34  ;;  %v404_v62 = vpack.c.bf16 %v376_v55, %v375_v53  ;;  %v405_v0 = vpack.c.bf16 %v378_v59, %v377_v58  ;;  %v8927_v2 = vld [vmem:[%s11514_s2 + $0x70] sm:$0xff]   ;;  %v440_v4 = vld [vmem:[%s8853_s30 + $0x99] sm:$0xff]  ;;  %v441_v7 = vld [vmem:[%s8853_s30 + $0xa1] sm:$0xff] }
  0x1e   : > { %8047 = vmatprep.subr.bf16.mxu0 %v8719_v49  ;;  %v439_v3 = vld [vmem:[%s8853_s30 + $0x91] sm:$0xff]  ;;  %v442_v8 = vld [vmem:[%s8853_s30 + $0xa9] sm:$0xff]  ;;  %v381_v9 = vld [vmem:[%s8853_s30 + $0xa0] sm:$0xff] }
  0x1f   : > { %8088 = vmatpush3.bf16.msra.mxu1 %v8721_v61  ;;  %v379_v5 = vld [vmem:[%s8853_s30 + $0x90] sm:$0xff]  ;;  %v380_v6 = vld [vmem:[%s8853_s30 + $0x98] sm:$0xff]  ;;  %v382_v10 = vld [vmem:[%s8853_s30 + $0xa8] sm:$0xff]  ;;  %v466_v11 = vpack.c.bf16 %v440_v4, %v439_v3  ;;  %v467_v13 = vpack.c.bf16 %v442_v8, %v441_v7 }
  0x20   : > { %7970 = vmatmul.mubr.msk.bf16.gmra.mxu0 %vm500_vm0, %v460_v33  ;;  %8089 = vmatprep.subr.bf16.mxu1 %v8722_v1  ;;  %v406_v12 = vpack.c.bf16 %v380_v6, %v379_v5  ;;  %v407_v14 = vpack.c.bf16 %v382_v10, %v381_v9  ;;  %v443_v15 = vld [vmem:[%s8853_s30 + $0xb1] sm:$0xff]  ;;  %v444_v16 = vld [vmem:[%s8853_s30 + $0xb9] sm:$0xff]  ;;  %v445_v19 = vld [vmem:[%s8853_s30 + $0xc1] sm:$0xff] }
  0x21   : > { %8012 = vmatmul.mubr.msk.bf16.gmra.mxu1 %vm500_vm0, %v400_v35  ;;  %7973 = vmatprep.mubr.msk.bf16.mxu0 %vm500_vm0, %v461_v36  ;;  %v383_v17 = vld [vmem:[%s8853_s30 + $0xb0] sm:$0xff]  ;;  %v384_v18 = vld [vmem:[%s8853_s30 + $0xb8] sm:$0xff]  ;;  %v385_v21 = vld [vmem:[%s8853_s30 + $0xc0] sm:$0xff]  ;;  %v468_v23 = vpack.c.bf16 %v444_v16, %v443_v15 }
  0x22   : > { %8015 = vmatprep.mubr.msk.bf16.mxu1 %vm500_vm0, %v401_v37  ;;  %8048 = vmatpush3.bf16.msra.mxu0 %v8719_v49  ;;  %v446_v20 = vld [vmem:[%s8853_s30 + $0xc9] sm:$0xff]  ;;  %v408_v24 = vpack.c.bf16 %v384_v18, %v383_v17  ;;  %v447_v28 = vld [vmem:[%s8853_s30 + $0xd1] sm:$0xff]  ;;  %v448_v29 = vld [vmem:[%s8853_s30 + $0xd9] sm:$0xff] }
  0x23   : > { %8127 = vmatprep.subr.bf16.mxu0 %v8927_v2  ;;  %8090 = vmatpush3.bf16.msra.mxu1 %v8722_v1  ;;  %v386_v22 = vld [vmem:[%s8853_s30 + $0xc8] sm:$0xff]  ;;  %v469_v25 = vpack.c.bf16 %v446_v20, %v445_v19  ;;  %v387_v30 = vld [vmem:[%s8853_s30 + $0xd0] sm:$0xff]  ;;  %v388_v31 = vld [vmem:[%s8853_s30 + $0xd8] sm:$0xff]  ;;  %v470_v36 = vpack.c.bf16 %v448_v29, %v447_v28 }
  0x24   : > { %v8956_v26 = vld [vmem:[%s11514_s2 + $0x88] sm:$0xff]   ;;  %v409_v27 = vpack.c.bf16 %v386_v22, %v385_v21  ;;  %v389_v34 = vld [vmem:[%s8853_s30 + $0xe0] sm:$0xff]  ;;  %v410_v37 = vpack.c.bf16 %v388_v31, %v387_v30  ;;  %v451_v40 = vld [vmem:[%s8853_s30 + $0xf1] sm:$0xff] }
  0x25   : > { %8169 = vmatprep.subr.bf16.mxu1 %v8956_v26  ;;  %v449_v32 = vld [vmem:[%s8853_s30 + $0xe1] sm:$0xff]  ;;  %v450_v33 = vld [vmem:[%s8853_s30 + $0xe9] sm:$0xff]  ;;  %v452_v41 = vld [vmem:[%s8853_s30 + $0xf9] sm:$0xff] }
  0x26   : > { %v390_v35 = vld [vmem:[%s8853_s30 + $0xe8] sm:$0xff]  ;;  %v471_v38 = vpack.c.bf16 %v450_v33, %v449_v32  ;;  %v391_v42 = vld [vmem:[%s8853_s30 + $0xf0] sm:$0xff]  ;;  %v392_v43 = vld [vmem:[%s8853_s30 + $0xf8] sm:$0xff] }
  0x27   : > { %v411_v39 = vpack.c.bf16 %v390_v35, %v389_v34  ;;  %v453_v44 = vld [vmem:[%s8853_s30 + $0x101] sm:$0xff]  ;;  %v454_v45 = vld [vmem:[%s8853_s30 + $0x109] sm:$0xff]  ;;  %v412_v49 = vpack.c.bf16 %v392_v43, %v391_v42  ;;  %v455_v52 = vld [vmem:[%s8853_s30 + $0x111] sm:$0xff] }
  0x28   : > { %7974 = vmatmul.mubr.msk.bf16.gmra.mxu0 %vm500_vm0, %v462_v46  ;;  %v393_v46 = vld [vmem:[%s8853_s30 + $0x100] sm:$0xff]  ;;  %v395_v54 = vld [vmem:[%s8853_s30 + $0x110] sm:$0xff]  ;;  %v396_v55 = vld [vmem:[%s8853_s30 + $0x118] sm:$0xff] }
  0x29   : > { %8016 = vmatmul.mubr.msk.bf16.gmra.mxu1 %vm500_vm0, %v402_v47  ;;  %7977 = vmatprep.mubr.msk.bf16.mxu0 %vm500_vm0, %v463_v48  ;;  %v394_v47 = vld [vmem:[%s8853_s30 + $0x108] sm:$0xff]  ;;  %v472_v48 = vpack.c.bf16 %v452_v41, %v451_v40  ;;  %v456_v53 = vld [vmem:[%s8853_s30 + $0x119] sm:$0xff]  ;;  %v414_v61 = vpack.c.bf16 %v396_v55, %v395_v54 }
  0x2a   : > { %8019 = vmatprep.mubr.msk.bf16.mxu1 %vm500_vm0, %v403_v50  ;;  %v473_v50 = vpack.c.bf16 %v454_v45, %v453_v44  ;;  %v413_v51 = vpack.c.bf16 %v394_v47, %v393_v46  ;;  %v981_v56 = vld [vmem:[%s8853_s30 + $0x2] sm:$0xff]  ;;  %v982_v57 = vld [vmem:[%s8853_s30 + $0xa] sm:$0xff]  ;;  %v983_v58 = vld [vmem:[%s8853_s30 + $0x12] sm:$0xff] }
  0x2b   : > { %v984_v59 = vld [vmem:[%s8853_s30 + $0x1a] sm:$0xff]  ;;  %v1330_v1 = vld [vmem:[%s8853_s30 + $0x2a] sm:$0xff]  ;;  %v987_v3 = vld [vmem:[%s8853_s30 + $0x32] sm:$0xff] }
  0x2c   : > { %v988_v4 = vld [vmem:[%s8853_s30 + $0x3a] sm:$0xff]  ;;  %v8724_v7 = vld [vmem:[%s11514_s2 + $0x68] sm:$0xff]   ;;  %v995_v20 = vld [vmem:[%s8853_s30 + $0x72] sm:$0xff] }
  0x2d   : > { %v1020_v6 = vpack.c.bf16 %v988_v4, %v987_v3  ;;  %v1333_v8 = vld [vmem:[%s8853_s30 + $0x42] sm:$0xff]  ;;  %v1334_v9 = vld [vmem:[%s8853_s30 + $0x4a] sm:$0xff]  ;;  %v9036_v19 = vld [vmem:[%s11514_s2 + $0xb8] sm:$0xff]  }
  0x2e   : > { %v8725_v10 = vld [vmem:[%s11514_s2 + $0x60] sm:$0xff]   ;;  %v1338_v18 = vld [vmem:[%s8853_s30 + $0x6a] sm:$0xff]  ;;  %v1003_v32 = vld [vmem:[%s8853_s30 + $0xb2] sm:$0xff] }
  0x2f   : > { %v9028_v16 = vld [vmem:[%s11514_s2 + $0xa0] sm:$0xff]   ;;  %v1346_v31 = vld [vmem:[%s8853_s30 + $0xaa] sm:$0xff]  ;;  %v1011_v44 = vld [vmem:[%s8853_s30 + $0xf2] sm:$0xff] }
  0x30   : > { %7978 = vmatmul.mubr.msk.bf16.gmra.mxu0 %vm500_vm0, %v464_v60  ;;  %v474_v60 = vpack.c.bf16 %v456_v53, %v455_v52  ;;  %v1337_v17 = vld [vmem:[%s8853_s30 + $0x62] sm:$0xff]  ;;  %v996_v21 = vld [vmem:[%s8853_s30 + $0x7a] sm:$0xff]  ;;  %v1354_v43 = vld [vmem:[%s8853_s30 + $0xea] sm:$0xff] }
  0x31   : > { %8020 = vmatmul.mubr.msk.bf16.gmra.mxu1 %vm500_vm0, %v404_v62  ;;  %7981 = vmatprep.mubr.msk.bf16.mxu0 %vm500_vm0, %v465_v63  ;;  %v1017_v62 = vpack.c.bf16 %v982_v57, %v981_v56  ;;  %v1018_v63 = vpack.c.bf16 %v984_v59, %v983_v58  ;;  %v1368_v22 = vpack.c.bf16 %v1338_v18, %v1337_v17  ;;  %v1345_v30 = vld [vmem:[%s8853_s30 + $0xa2] sm:$0xff]  ;;  %v1004_v33 = vld [vmem:[%s8853_s30 + $0xba] sm:$0xff]  ;;  %v1362_v55 = vld [vmem:[%s8853_s30 + $0x12a] sm:$0xff] }
  0x32   : > { %8023 = vmatprep.mubr.msk.bf16.mxu1 %vm500_vm0, %v405_v0  ;;  %v1329_v0 = vld [vmem:[%s8853_s30 + $0x22] sm:$0xff]  ;;  %v1372_v34 = vpack.c.bf16 %v1346_v31, %v1345_v30  ;;  %v1028_v35 = vpack.c.bf16 %v1004_v33, %v1003_v32  ;;  %v1012_v45 = vld [vmem:[%s8853_s30 + $0xfa] sm:$0xff]  ;;  %v2022_v3 = vld [vmem:[%s8853_s30 + $0x2c] sm:$0xff] }
  0x33   : > { %v1364_v5 = vpack.c.bf16 %v1330_v1, %v1329_v0  ;;  %v1353_v42 = vld [vmem:[%s8853_s30 + $0xe2] sm:$0xff]  ;;  %v1032_v47 = vpack.c.bf16 %v1012_v45, %v1011_v44  ;;  %v1673_v56 = vld [vmem:[%s8853_s30 + $0x13] sm:$0xff]  ;;  %v1676_v0 = vld [vmem:[%s8853_s30 + $0x2b] sm:$0xff] }
  0x34   : > { %v1376_v46 = vpack.c.bf16 %v1354_v43, %v1353_v42  ;;  %v1361_v54 = vld [vmem:[%s8853_s30 + $0x122] sm:$0xff]  ;;  %v2019_v58 = vld [vmem:[%s8853_s30 + $0x14] sm:$0xff]  ;;  %v2026_v17 = vld [vmem:[%s8853_s30 + $0x4c] sm:$0xff] }
  0x35   : > { %v1674_v57 = vld [vmem:[%s8853_s30 + $0x1b] sm:$0xff]  ;;  %v2021_v1 = vld [vmem:[%s8853_s30 + $0x24] sm:$0xff]  ;;  %v1677_v4 = vld [vmem:[%s8853_s30 + $0x33] sm:$0xff] }
  0x36   : > { %v2020_v59 = vld [vmem:[%s8853_s30 + $0x1c] sm:$0xff]  ;;  %v1681_v18 = vld [vmem:[%s8853_s30 + $0x53] sm:$0xff]  ;;  %v2029_v30 = vld [vmem:[%s8853_s30 + $0x64] sm:$0xff] }
  0x37   : > { %v2030_v31 = vld [vmem:[%s8853_s30 + $0x6c] sm:$0xff]  ;;  %v1686_v33 = vld [vmem:[%s8853_s30 + $0x7b] sm:$0xff]  ;;  %v2033_v42 = vld [vmem:[%s8853_s30 + $0x84] sm:$0xff] }
  0x38   : > { %7982 = vmatmul.mubr.msk.bf16.gmra.mxu0 %vm500_vm0, %v466_v11  ;;  %v8727_v11 = vld [vmem:[%s11514_s2 + $0x80] sm:$0xff]   ;;  %v1685_v32 = vld [vmem:[%s8853_s30 + $0x73] sm:$0xff] }
  0x39   : > { %8024 = vmatmul.mubr.msk.bf16.gmra.mxu1 %vm500_vm0, %v406_v12  ;;  %7985 = vmatprep.mubr.msk.bf16.mxu0 %vm500_vm0, %v467_v13  ;;  %v991_v12 = vld [vmem:[%s8853_s30 + $0x52] sm:$0xff]  ;;  %v992_v13 = vld [vmem:[%s8853_s30 + $0x5a] sm:$0xff] }
  0x3a   : > { %8027 = vmatprep.mubr.msk.bf16.mxu1 %vm500_vm0, %v407_v14  ;;  %v8728_v14 = vld [vmem:[%s11514_s2 + $0x78] sm:$0xff]   ;;  %v1022_v15 = vpack.c.bf16 %v992_v13, %v991_v12  ;;  %v1679_v13 = vld [vmem:[%s8853_s30 + $0x43] sm:$0xff]  ;;  %v2034_v43 = vld [vmem:[%s8853_s30 + $0x8c] sm:$0xff] }
  0x3b   : > { %v8730_v12 = vld [vmem:[%s11514_s2 + $0x98] sm:$0xff]  }
  0x3c   : > { %v1689_v44 = vld [vmem:[%s8853_s30 + $0x93] sm:$0xff]  ;;  %v1690_v45 = vld [vmem:[%s8853_s30 + $0x9b] sm:$0xff] }
  0x40   : > { %7986 = vmatmul.mubr.msk.bf16.gmra.mxu0 %vm500_vm0, %v468_v23  ;;  %v1024_v23 = vpack.c.bf16 %v996_v21, %v995_v20  ;;  %v1682_v20 = vld [vmem:[%s8853_s30 + $0x5b] sm:$0xff]  ;;  %v8731_v21 = vld [vmem:[%s11514_s2 + $0x90] sm:$0xff]  }
  0x41   : > { %8028 = vmatmul.mubr.msk.bf16.gmra.mxu1 %vm500_vm0, %v408_v24  ;;  %7989 = vmatprep.mubr.msk.bf16.mxu0 %vm500_vm0, %v469_v25  ;;  %v1341_v24 = vld [vmem:[%s8853_s30 + $0x82] sm:$0xff]  ;;  %v1342_v25 = vld [vmem:[%s8853_s30 + $0x8a] sm:$0xff] }
  0x42   : > { %8031 = vmatprep.mubr.msk.bf16.mxu1 %vm500_vm0, %v409_v27  ;;  %v1000_v27 = vld [vmem:[%s8853_s30 + $0x9a] sm:$0xff]  ;;  %v1370_v28 = vpack.c.bf16 %v1342_v25, %v1341_v24  ;;  %v8734_v24 = vld [vmem:[%s11514_s2 + $0xa8] sm:$0xff]  }
  0x48   : > { %7990 = vmatmul.mubr.msk.bf16.gmra.mxu0 %vm500_vm0, %v470_v36  ;;  %v1349_v36 = vld [vmem:[%s8853_s30 + $0xc2] sm:$0xff] }
  0x49   : > { %8032 = vmatmul.mubr.msk.bf16.gmra.mxu1 %vm500_vm0, %v410_v37  ;;  %7993 = vmatprep.mubr.msk.bf16.mxu0 %vm500_vm0, %v471_v38  ;;  %v1350_v37 = vld [vmem:[%s8853_s30 + $0xca] sm:$0xff]  ;;  %v1007_v38 = vld [vmem:[%s8853_s30 + $0xd2] sm:$0xff] }
  0x4a   : > { %8035 = vmatprep.mubr.msk.bf16.mxu1 %vm500_vm0, %v411_v39  ;;  %v1008_v39 = vld [vmem:[%s8853_s30 + $0xda] sm:$0xff]  ;;  %v1374_v40 = vpack.c.bf16 %v1350_v37, %v1349_v36  ;;  %v9163_v37 = vpack.c.bf16 %v2030_v31, %v2029_v30 }
  0x4b   : > { %v1030_v41 = vpack.c.bf16 %v1008_v39, %v1007_v38  ;;  %v1715_v38 = vpack.c.bf16 %v1686_v33, %v1685_v32  ;;  %v1702_v30 = vld [vmem:[%s8853_s30 + $0xfb] sm:$0xff] }
  0x4c   : > { %v2047_v31 = vld [vmem:[%s8853_s30 + $0xf4] sm:$0xff]  ;;  %v2048_v32 = vld [vmem:[%s8853_s30 + $0xfc] sm:$0xff] }
  0x50   : > { %7994 = vmatmul.mubr.msk.bf16.gmra.mxu0 %vm500_vm0, %v472_v48  ;;  %v1357_v48 = vld [vmem:[%s8853_s30 + $0x102] sm:$0xff] }
  0x51   : > { %8036 = vmatmul.mubr.msk.bf16.gmra.mxu1 %vm500_vm0, %v412_v49  ;;  %7997 = vmatprep.mubr.msk.bf16.mxu0 %vm500_vm0, %v473_v50  ;;  %v1358_v49 = vld [vmem:[%s8853_s30 + $0x10a] sm:$0xff]  ;;  %v1015_v50 = vld [vmem:[%s8853_s30 + $0x112] sm:$0xff] }
  0x52   : > { %8039 = vmatprep.mubr.msk.bf16.mxu1 %vm500_vm0, %v413_v51  ;;  %v1016_v51 = vld [vmem:[%s8853_s30 + $0x11a] sm:$0xff]  ;;  %v1378_v52 = vpack.c.bf16 %v1358_v49, %v1357_v48  ;;  %v9181_v49 = vpack.c.bf16 %v2034_v43, %v2033_v42  ;;  %v1703_v42 = vld [vmem:[%s8853_s30 + $0x103] sm:$0xff]  ;;  %v1704_v43 = vld [vmem:[%s8853_s30 + $0x10b] sm:$0xff] }
  0x53   : > { %v1034_v53 = vpack.c.bf16 %v1016_v51, %v1015_v50  ;;  %v1717_v50 = vpack.c.bf16 %v1690_v45, %v1689_v44  ;;  %v2049_v45 = vld [vmem:[%s8853_s30 + $0x104] sm:$0xff] }
  0x58   : > { %7998 = vmatmul.mubr.msk.bf16.gmra.mxu0 %vm500_vm0, %v474_v60  ;;  %v1380_v60 = vpack.c.bf16 %v1362_v55, %v1361_v54  ;;  %v2037_v54 = vld [vmem:[%s8853_s30 + $0xa4] sm:$0xff]  ;;  %v2038_v55 = vld [vmem:[%s8853_s30 + $0xac] sm:$0xff] }
  0x59   : > { %8040 = vmatmul.mubr.msk.bf16.gmra.mxu1 %vm500_vm0, %v414_v61  ;;  %8049 = vmatprep.mubr.msk.bf16.mxu0 %vm500_vm0, %v1017_v62  ;;  %v1709_v61 = vpack.c.bf16 %v1674_v57, %v1673_v56  ;;  %v2055_v62 = vpack.c.bf16 %v2020_v59, %v2019_v58  ;;  %v1693_v56 = vld [vmem:[%s8853_s30 + $0xb3] sm:$0xff]  ;;  %v1694_v57 = vld [vmem:[%s8853_s30 + $0xbb] sm:$0xff] }
  0x5a   : > { %8091 = vmatprep.mubr.msk.bf16.mxu1 %vm500_vm0, %v1018_v63  ;;  %v2039_v58 = vld [vmem:[%s8853_s30 + $0xb4] sm:$0xff]  ;;  %v2040_v59 = vld [vmem:[%s8853_s30 + $0xbc] sm:$0xff] }
  0x60   : > { %8050 = vmatmul.mubr.msk.bf16.vlgmr.msra.gmra.mxu0 %vm500_vm0, %v1018_v63  ;;  %v1675_v63 = vld [vmem:[%s8853_s30 + $0x23] sm:$0xff] }
  0x61   : > { %8128 = vmatpush3.bf16.msra.mxu0 %v8927_v2  ;;  %8092 = vmatmul.mubr.msk.bf16.vlgmr.msra.gmra.mxu1 %vm500_vm0, %v1364_v5  ;;  %v1366_v2 = vpack.c.bf16 %v1334_v9, %v1333_v8  ;;  %v1710_v8 = vpack.c.bf16 %v1676_v0, %v1675_v63  ;;  %v9107_v9 = vpack.c.bf16 %v2022_v3, %v2021_v1  ;;  %v8764_v63 = vmov 0   ;;  %v3568_v0 = vld [vmem:[%s11513_s1] sm:$0xff] }
  0x62   : > { %8053 = vmatprep.mubr.msk.bf16.mxu0 %vm500_vm0, %v1364_v5  ;;  %8095 = vmatprep.mubr.msk.bf16.mxu1 %vm500_vm0, %v1020_v6  ;;  %v1678_v5 = vld [vmem:[%s8853_s30 + $0x3b] sm:$0xff]  ;;  %v9204_v1 = vpack.c.bf16 %v2040_v59, %v2039_v58  ;;  %v1695_v3 = vld [vmem:[%s8853_s30 + $0xc3] sm:$0xff] }
  0x63   : > { %8129 = vmatprep.subr.bf16.mxu0 %v8724_v7  ;;  %8170 = vmatpush3.bf16.msra.mxu1 %v8956_v26  ;;  %v999_v26 = vld [vmem:[%s8853_s30 + $0x92] sm:$0xff] }
  0x64   : > { %8171 = vmatprep.subr.bf16.mxu1 %v8727_v11  ;;  %v1026_v29 = vpack.c.bf16 %v1000_v27, %v999_v26  ;;  %v1713_v26 = vpack.c.bf16 %v1682_v20, %v1681_v18  ;;  %8709 = vset.pattern.permute.xlu0 %v8764_v63  ;;  %v3571_v18 = vld [vmem:[%s11513_s1 + $0x18] sm:$0xff]  ;;  %v3572_v20 = vld [vmem:[%s11513_s1 + $0x20] sm:$0xff] }
  0x65   : > { %8130 = vmatpush3.bf16.msra.mxu0 %v8724_v7  ;;  %v2024_v7 = vld [vmem:[%s8853_s30 + $0x3c] sm:$0xff]  ;;  %8710 = vset.pattern.permute.xlu1 %v8764_v63 }
  0x66   : > { %8131 = vmatprep.subr.bf16.mxu0 %v8725_v10  ;;  %3606 = vperm.xlu0 %8709, %v3568_v0  }
  0x67   : > { %8172 = vmatpush3.bf16.msra.mxu1 %v8727_v11 }
  0x68   : > { %8054 = vmatmul.mubr.msk.bf16.gmra.mxu0 %vm500_vm0, %v1020_v6  ;;  %8173 = vmatprep.subr.bf16.mxu1 %v8728_v14  ;;  %v2023_v6 = vld [vmem:[%s8853_s30 + $0x34] sm:$0xff] }
  0x69   : > { %8096 = vmatmul.mubr.msk.bf16.gmra.mxu1 %vm500_vm0, %v1366_v2  ;;  %8057 = vmatprep.mubr.msk.bf16.mxu0 %vm500_vm0, %v1366_v2  ;;  %v9109_v11 = vpack.c.bf16 %v2024_v7, %v2023_v6  ;;  %v1680_v2 = vld [vmem:[%s8853_s30 + $0x4b] sm:$0xff] }
  0x6a   : > { %8099 = vmatprep.mubr.msk.bf16.mxu1 %vm500_vm0, %v1022_v15  ;;  %8132 = vmatpush3.bf16.msra.mxu0 %v8725_v10  ;;  %v1711_v10 = vpack.c.bf16 %v1678_v5, %v1677_v4  ;;  %v1696_v4 = vld [vmem:[%s8853_s30 + $0xcb] sm:$0xff] }
  0x6b   : > { %8174 = vmatpush3.bf16.msra.mxu1 %v8728_v14  ;;  %8211 = vmatprep.subr.bf16.mxu0 %v9028_v16  ;;  %v8733_v14 = vld [vmem:[%s11514_s2 + $0xb0] sm:$0xff]   ;;  %v2041_v5 = vld [vmem:[%s8853_s30 + $0xc4] sm:$0xff] }
  0x6c   : > { %8253 = vmatprep.subr.bf16.mxu1 %v9036_v19  ;;  %v3570_v6 = vld [vmem:[%s11513_s1 + $0x10] sm:$0xff]  ;;  %v3569_v7 = vld [vmem:[%s11513_s1 + $0x8] sm:$0xff] }
  0x6d   : > { %3616 = vperm.xlu1 %8710, %v3570_v6   ;;  %3611 = vperm.xlu0 %8709, %v3569_v7  }
  0x70   : > { %8058 = vmatmul.mubr.msk.bf16.gmra.mxu0 %vm500_vm0, %v1022_v15  ;;  %v2025_v15 = vld [vmem:[%s8853_s30 + $0x44] sm:$0xff] }
  0x71   : > { %8100 = vmatmul.mubr.msk.bf16.gmra.mxu1 %vm500_vm0, %v1368_v22  ;;  %8061 = vmatprep.mubr.msk.bf16.mxu0 %vm500_vm0, %v1368_v22  ;;  %v2027_v22 = vld [vmem:[%s8853_s30 + $0x54] sm:$0xff]  ;;  %v9139_v25 = vpack.c.bf16 %v2026_v17, %v2025_v15 }
  0x72   : > { %8103 = vmatprep.mubr.msk.bf16.mxu1 %vm500_vm0, %v1024_v23  ;;  %3621 = vperm.xlu1 %8710, %v3571_v18   ;;  %v3582_v18 = vld [vmem:[%s11513_s1 + $0x70] sm:$0xff] }
  0x73   : > { %3626 = vperm.xlu0 %8709, %v3572_v20  }
  0x78   : > { %8062 = vmatmul.mubr.msk.bf16.gmra.mxu0 %vm500_vm0, %v1024_v23  ;;  %v2028_v23 = vld [vmem:[%s8853_s30 + $0x5c] sm:$0xff] }
  0x79   : > { %8104 = vmatmul.mubr.msk.bf16.gmra.mxu1 %vm500_vm0, %v1370_v28  ;;  %8065 = vmatprep.mubr.msk.bf16.mxu0 %vm500_vm0, %v1370_v28  ;;  %v9141_v27 = vpack.c.bf16 %v2028_v23, %v2027_v22  ;;  %v1683_v28 = vld [vmem:[%s8853_s30 + $0x63] sm:$0xff]  ;;  %v1700_v23 = vld [vmem:[%s8853_s30 + $0xeb] sm:$0xff] }
  0x7a   : > { %8107 = vmatprep.mubr.msk.bf16.mxu1 %vm500_vm0, %v1026_v29  ;;  %v1699_v22 = vld [vmem:[%s8853_s30 + $0xe3] sm:$0xff] }
  0x7b   : > { %v1722_v33 = vpack.c.bf16 %v1700_v23, %v1699_v22  ;;  %v2053_v23 = vld [vmem:[%s8853_s30 + $0x124] sm:$0xff] }
  0x80   : > { %8066 = vmatmul.mubr.msk.bf16.gmra.mxu0 %vm500_vm0, %v1026_v29  ;;  %v1684_v29 = vld [vmem:[%s8853_s30 + $0x6b] sm:$0xff] }
  0x81   : > { %8108 = vmatmul.mubr.msk.bf16.gmra.mxu1 %vm500_vm0, %v1372_v34  ;;  %8069 = vmatprep.mubr.msk.bf16.mxu0 %vm500_vm0, %v1372_v34  ;;  %v2031_v34 = vld [vmem:[%s8853_s30 + $0x74] sm:$0xff]  ;;  %v1714_v36 = vpack.c.bf16 %v1684_v29, %v1683_v28  ;;  %v2046_v28 = vld [vmem:[%s8853_s30 + $0xec] sm:$0xff] }
  0x82   : > { %8111 = vmatprep.mubr.msk.bf16.mxu1 %vm500_vm0, %v1028_v35  ;;  %v1701_v29 = vld [vmem:[%s8853_s30 + $0xf3] sm:$0xff] }
  0x88   : > { %8070 = vmatmul.mubr.msk.bf16.gmra.mxu0 %vm500_vm0, %v1028_v35  ;;  %v2032_v35 = vld [vmem:[%s8853_s30 + $0x7c] sm:$0xff] }
  0x89   : > { %8112 = vmatmul.mubr.msk.bf16.gmra.mxu1 %vm500_vm0, %v1374_v40  ;;  %8073 = vmatprep.mubr.msk.bf16.mxu0 %vm500_vm0, %v1374_v40  ;;  %v9165_v39 = vpack.c.bf16 %v2032_v35, %v2031_v34  ;;  %v1687_v40 = vld [vmem:[%s8853_s30 + $0x83] sm:$0xff]  ;;  %v1723_v35 = vpack.c.bf16 %v1702_v30, %v1701_v29 }
  0x8a   : > { %8115 = vmatprep.mubr.msk.bf16.mxu1 %vm500_vm0, %v1030_v41 }
  0x90   : > { %8074 = vmatmul.mubr.msk.bf16.gmra.mxu0 %vm500_vm0, %v1030_v41  ;;  %v1688_v41 = vld [vmem:[%s8853_s30 + $0x8b] sm:$0xff] }
  0x91   : > { %8116 = vmatmul.mubr.msk.bf16.gmra.mxu1 %vm500_vm0, %v1376_v46  ;;  %8077 = vmatprep.mubr.msk.bf16.mxu0 %vm500_vm0, %v1376_v46  ;;  %v2035_v46 = vld [vmem:[%s8853_s30 + $0x94] sm:$0xff]  ;;  %v1716_v48 = vpack.c.bf16 %v1688_v41, %v1687_v40  ;;  %v9264_v40 = vpack.c.bf16 %v2048_v32, %v2047_v31 }
  0x92   : > { %8119 = vmatprep.mubr.msk.bf16.mxu1 %vm500_vm0, %v1032_v47 }
  0x98   : > { %8078 = vmatmul.mubr.msk.bf16.gmra.mxu0 %vm500_vm0, %v1032_v47  ;;  %v2036_v47 = vld [vmem:[%s8853_s30 + $0x9c] sm:$0xff] }
  0x99   : > { %8120 = vmatmul.mubr.msk.bf16.gmra.mxu1 %vm500_vm0, %v1378_v52  ;;  %8081 = vmatprep.mubr.msk.bf16.mxu0 %vm500_vm0, %v1378_v52  ;;  %v9183_v51 = vpack.c.bf16 %v2036_v47, %v2035_v46  ;;  %v1691_v52 = vld [vmem:[%s8853_s30 + $0xa3] sm:$0xff]  ;;  %v3578_v47 = vld [vmem:[%s11513_s1 + $0x50] sm:$0xff] }
  0x9a   : > { %8123 = vmatprep.mubr.msk.bf16.mxu1 %vm500_vm0, %v1034_v53  ;;  %v3577_v46 = vld [vmem:[%s11513_s1 + $0x48] sm:$0xff] }
  0xa0   : > { %8082 = vmatmul.mubr.msk.bf16.gmra.mxu0 %vm500_vm0, %v1034_v53  ;;  %v1692_v53 = vld [vmem:[%s8853_s30 + $0xab] sm:$0xff] }
  0xa1   : > { %8124 = vmatmul.mubr.msk.bf16.gmra.mxu1 %vm500_vm0, %v1380_v60  ;;  %8133 = vmatprep.mubr.msk.bf16.mxu0 %vm500_vm0, %v1709_v61  ;;  %v1718_v60 = vpack.c.bf16 %v1692_v53, %v1691_v52  ;;  %v9199_v61 = vpack.c.bf16 %v2038_v55, %v2037_v54  ;;  %v2050_v52 = vld [vmem:[%s8853_s30 + $0x10c] sm:$0xff]  ;;  %v1706_v54 = vld [vmem:[%s8853_s30 + $0x11b] sm:$0xff] }
  0xa2   : > { %8175 = vmatprep.mubr.msk.bf16.mxu1 %vm500_vm0, %v2055_v62  ;;  %v1719_v62 = vpack.c.bf16 %v1694_v57, %v1693_v56  ;;  %v1705_v53 = vld [vmem:[%s8853_s30 + $0x113] sm:$0xff]  ;;  %v2052_v57 = vld [vmem:[%s8853_s30 + $0x11c] sm:$0xff]  ;;  %v9290_v63 = vpack.c.bf16 %v2050_v52, %v2049_v45 }
  0xa3   : > { %v2051_v56 = vld [vmem:[%s8853_s30 + $0x114] sm:$0xff]  ;;  %v1725_v0 = vpack.c.bf16 %v1706_v54, %v1705_v53 }
  0xa4   : > { %v9300_v7 = vpack.c.bf16 %v2052_v57, %v2051_v56  ;;  %v2713_v54 = vld [vmem:[%s8853_s30 + $0x35] sm:$0xff]  ;;  %v2715_v57 = vld [vmem:[%s8853_s30 + $0x45] sm:$0xff] }
  0xa8   : > { %8134 = vmatmul.mubr.msk.bf16.vlgmr.msra.gmra.mxu0 %vm500_vm0, %v1710_v8  ;;  %v2042_v8 = vld [vmem:[%s8853_s30 + $0xcc] sm:$0xff] }
  0xa9   : > { %8212 = vmatpush3.bf16.msra.mxu0 %v9028_v16  ;;  %8176 = vmatmul.mubr.msk.bf16.vlgmr.msra.gmra.mxu1 %vm500_vm0, %v9107_v9  ;;  %v1712_v16 = vpack.c.bf16 %v1680_v2, %v1679_v13  ;;  %v2043_v13 = vld [vmem:[%s8853_s30 + $0xd4] sm:$0xff]  ;;  %v1720_v2 = vpack.c.bf16 %v1696_v4, %v1695_v3  ;;  %v9226_v15 = vpack.c.bf16 %v2042_v8, %v2041_v5  ;;  %v3580_v4 = vld [vmem:[%s11513_s1 + $0x60] sm:$0xff] }
  0xaa   : > { %8137 = vmatprep.mubr.msk.bf16.mxu0 %vm500_vm0, %v1711_v10  ;;  %8179 = vmatprep.mubr.msk.bf16.mxu1 %vm500_vm0, %v9109_v11  ;;  %v1697_v10 = vld [vmem:[%s8853_s30 + $0xd3] sm:$0xff] }
  0xab   : > { %8213 = vmatprep.subr.bf16.mxu0 %v8730_v12  ;;  %8254 = vmatpush3.bf16.msra.mxu1 %v9036_v19  ;;  %v9146_v19 = vld [vmem:[%s11514_s2 + $0xd0] sm:$0xff]   ;;  %v3579_v3 = vld [vmem:[%s11513_s1 + $0x58] sm:$0xff] }
  0xac   : > { %8255 = vmatprep.subr.bf16.mxu1 %v8733_v14 }
  0xad   : > { %8214 = vmatpush3.bf16.msra.mxu0 %v8730_v12  ;;  %v1698_v12 = vld [vmem:[%s8853_s30 + $0xdb] sm:$0xff] }
  0xae   : > { %8215 = vmatprep.subr.bf16.mxu0 %v8731_v21  ;;  %v1721_v17 = vpack.c.bf16 %v1698_v12, %v1697_v10 }
  0xaf   : > { %8256 = vmatpush3.bf16.msra.mxu1 %v8733_v14  ;;  %v2044_v14 = vld [vmem:[%s8853_s30 + $0xdc] sm:$0xff] }
  0xb0   : > { %8138 = vmatmul.mubr.msk.bf16.gmra.mxu0 %vm500_vm0, %v1712_v16  ;;  %8257 = vmatprep.subr.bf16.mxu1 %v8734_v24  ;;  %v2045_v16 = vld [vmem:[%s8853_s30 + $0xe4] sm:$0xff] }
  0xb1   : > { %8180 = vmatmul.mubr.msk.bf16.gmra.mxu1 %vm500_vm0, %v9139_v25  ;;  %8141 = vmatprep.mubr.msk.bf16.mxu0 %vm500_vm0, %v1713_v26  ;;  %v3574_v26 = vld [vmem:[%s11513_s1 + $0x30] sm:$0xff]  ;;  %v9256_v34 = vpack.c.bf16 %v2046_v28, %v2045_v16 }
  0xb2   : > { %8183 = vmatprep.mubr.msk.bf16.mxu1 %vm500_vm0, %v9141_v27  ;;  %8216 = vmatpush3.bf16.msra.mxu0 %v8731_v21  ;;  %v9234_v21 = vpack.c.bf16 %v2044_v14, %v2043_v13  ;;  %v1707_v13 = vld [vmem:[%s8853_s30 + $0x123] sm:$0xff]  ;;  %v2054_v16 = vld [vmem:[%s8853_s30 + $0x12c] sm:$0xff] }
  0xb3   : > { %8258 = vmatpush3.bf16.msra.mxu1 %v8734_v24  ;;  %8295 = vmatprep.subr.bf16.mxu0 %v9146_v19  ;;  %v3573_v24 = vld [vmem:[%s11513_s1 + $0x28] sm:$0xff] }
  0xb4   : > { %3631 = vperm.xlu1 %8710, %v3573_v24   ;;  %3636 = vperm.xlu0 %8709, %v3574_v26   ;;  %v2711_v26 = vld [vmem:[%s8853_s30 + $0x25] sm:$0xff]  ;;  %v2712_v28 = vld [vmem:[%s8853_s30 + $0x2d] sm:$0xff] }
  0xb8   : > { %8142 = vmatmul.mubr.msk.bf16.gmra.mxu0 %vm500_vm0, %v1714_v36  ;;  %v3575_v36 = vld [vmem:[%s11513_s1 + $0x38] sm:$0xff] }
  0xb9   : > { %8184 = vmatmul.mubr.msk.bf16.gmra.mxu1 %vm500_vm0, %v9163_v37  ;;  %8145 = vmatprep.mubr.msk.bf16.mxu0 %vm500_vm0, %v1715_v38  ;;  %v3576_v38 = vld [vmem:[%s11513_s1 + $0x40] sm:$0xff] }
  0xba   : > { %8187 = vmatprep.mubr.msk.bf16.mxu1 %vm500_vm0, %v9165_v39  ;;  %3641 = vperm.xlu1 %8710, %v3575_v36   ;;  %v3584_v36 = vld [vmem:[%s11513_s1 + $0x80] sm:$0xff] }
  0xbb   : > { %3646 = vperm.xlu0 %8709, %v3576_v38  }
  0xbe   : > { %3651 = vperm.xlu1 %8710, %v3577_v46  }
  0xbf   : > { %3656 = vperm.xlu0 %8709, %v3578_v47   ;;  %v3585_v47 = vld [vmem:[%s11513_s1 + $0x88] sm:$0xff] }
  0xc0   : > { %8146 = vmatmul.mubr.msk.bf16.gmra.mxu0 %vm500_vm0, %v1716_v48 }
  0xc1   : > { %8188 = vmatmul.mubr.msk.bf16.gmra.mxu1 %vm500_vm0, %v9181_v49  ;;  %8149 = vmatprep.mubr.msk.bf16.mxu0 %vm500_vm0, %v1717_v50 }
  0xc2   : > { %8191 = vmatprep.mubr.msk.bf16.mxu1 %vm500_vm0, %v9183_v51  ;;  %3661 = vperm.xlu1 %8710, %v3579_v3   ;;  %v3587_v3 = vld [vmem:[%s11513_s1 + $0x98] sm:$0xff] }
  0xc3   : > { %3666 = vperm.xlu0 %8709, %v3580_v4   ;;  %v3588_v4 = vld [vmem:[%s11513_s1 + $0xa0] sm:$0xff] }
  0xc7   : > { %3676 = vperm.xlu0 %8709, %v3582_v18  }
  0xc8   : > { %8150 = vmatmul.mubr.msk.bf16.gmra.mxu0 %vm500_vm0, %v1718_v60  ;;  %v1724_v60 = vpack.c.bf16 %v1704_v43, %v1703_v42  ;;  %v2747_v42 = vpack.c.bf16 %v2712_v28, %v2711_v26  ;;  %v8737_v26 = vld [vmem:[%s11514_s2 + $0xc0] sm:$0xff]  }
  0xc9   : > { %8192 = vmatmul.mubr.msk.bf16.gmra.mxu1 %vm500_vm0, %v9199_v61  ;;  %8153 = vmatprep.mubr.msk.bf16.mxu0 %vm500_vm0, %v1719_v62 }
  0xca   : > { %8195 = vmatprep.mubr.msk.bf16.mxu1 %vm500_vm0, %v9204_v1 }
  0xcb   : > { %3686 = vperm.xlu0 %8709, %v3584_v36  }
  0xd0   : > { %8154 = vmatmul.mubr.msk.bf16.gmra.mxu0 %vm500_vm0, %v1720_v2  ;;  %v1708_v2 = vld [vmem:[%s8853_s30 + $0x12b] sm:$0xff] }
  0xd1   : > { %8196 = vmatmul.mubr.msk.bf16.gmra.mxu1 %vm500_vm0, %v9226_v15  ;;  %8157 = vmatprep.mubr.msk.bf16.mxu0 %vm500_vm0, %v1721_v17  ;;  %v3581_v17 = vld [vmem:[%s11513_s1 + $0x68] sm:$0xff]  ;;  %v1726_v31 = vpack.c.bf16 %v1708_v2, %v1707_v13 }
  0xd2   : > { %8199 = vmatprep.mubr.msk.bf16.mxu1 %vm500_vm0, %v9234_v21  ;;  %3671 = vperm.xlu1 %8710, %v3581_v17  }
  0xd8   : > { %v7967_v41 = vpop.f32.mrf.mxu0  ;;  %8158 = vmatmul.mubr.msk.bf16.gmra.mxu0 %vm500_vm0, %v1722_v33  ;;  %v9326_v33 = vpack.c.bf16 %v2054_v16, %v2053_v23  ;;  %v3590_v23 = vld [vmem:[%s11513_s1 + $0xb0] sm:$0xff] }
  0xd9   : > { %v8009_v44 = vpop.f32.mrf.mxu1  ;;  %8200 = vmatmul.mubr.msk.bf16.gmra.mxu1 %vm500_vm0, %v9256_v34  ;;  %8161 = vmatprep.mubr.msk.bf16.mxu0 %vm500_vm0, %v1723_v35  ;;  %v3583_v35 = vld [vmem:[%s11513_s1 + $0x78] sm:$0xff] }
  0xda   : > { %v9279_v48 = vadd.f32 %v8009_v44, %v7967_v41  ;;  %v589_v50 = vpop.f32.mrf.mxu0  ;;  %8203 = vmatprep.mubr.msk.bf16.mxu1 %vm500_vm0, %v9264_v40  ;;  %3681 = vperm.xlu1 %8710, %v3583_v35  }
  0xdb   : > { %v838_v55 = vpop.f32.mrf.mxu1 }
  0xdc   : > { %v9288_v58 = vadd.f32 %v838_v55, %v589_v50  ;;  %v7968_v59 = vpop.f32.mrf.mxu0  ;;  %v3586_v50 = vld [vmem:[%s11513_s1 + $0x90] sm:$0xff]  ;;  %v2714_v55 = vld [vmem:[%s8853_s30 + $0x3d] sm:$0xff] }
  0xdd   : > { %v8010_v62 = vpop.f32.mrf.mxu1  ;;  %3696 = vperm.xlu0 %8709, %v3586_v50  }
  0xde   : > { %v9298_v5 = vadd.f32 %v8010_v62, %v7968_v59  ;;  %v592_v6 = vpop.f32.mrf.mxu0  ;;  %3691 = vperm.xlu1 %8710, %v3585_v47   ;;  %v2716_v59 = vld [vmem:[%s8853_s30 + $0x4d] sm:$0xff] }
  0xdf   : > { %v841_v8 = vpop.f32.mrf.mxu1 }
  0xe0   : > { %v9302_v10 = vadd.f32 %v841_v8, %v592_v6  ;;  %v7971_v12 = vpop.f32.mrf.mxu0  ;;  %8162 = vmatmul.mubr.msk.bf16.gmra.mxu0 %vm500_vm0, %v1724_v60 }
  0xe1   : > { %v8013_v14 = vpop.f32.mrf.mxu1  ;;  %8204 = vmatmul.mubr.msk.bf16.gmra.mxu1 %vm500_vm0, %v9290_v63  ;;  %8165 = vmatprep.mubr.msk.bf16.mxu0 %vm500_vm0, %v1725_v0  ;;  %v2748_v0 = vpack.c.bf16 %v2714_v55, %v2713_v54  ;;  %v3593_v55 = vld [vmem:[%s11513_s1 + $0xc8] sm:$0xff] }
  0xe2   : > { %v9316_v20 = vadd.f32 %v8013_v14, %v7971_v12  ;;  %v605_v22 = vpop.f32.mrf.mxu0  ;;  %8207 = vmatprep.mubr.msk.bf16.mxu1 %vm500_vm0, %v9300_v7  ;;  %v2749_v12 = vpack.c.bf16 %v2716_v59, %v2715_v57  ;;  %3701 = vperm.xlu1 %8710, %v3587_v3   ;;  %v8736_v14 = vld [vmem:[%s11514_s2 + $0xc8] sm:$0xff]  }
  0xe3   : > { %v854_v24 = vpop.f32.mrf.mxu1  ;;  %3706 = vperm.xlu0 %8709, %v3588_v4   ;;  %v2724_v3 = vld [vmem:[%s8853_s30 + $0x8d] sm:$0xff] }
  0xe4   : > { %v9324_v29 = vadd.f32 %v854_v24, %v605_v22  ;;  %v7972_v30 = vpop.f32.mrf.mxu0  ;;  %v3589_v22 = vld [vmem:[%s11513_s1 + $0xa8] sm:$0xff] }
  0xe5   : > { %v8014_v32 = vpop.f32.mrf.mxu1 }
  0xe6   : > { %v9334_v38 = vadd.f32 %v8014_v32, %v7972_v30  ;;  %v608_v41 = vpop.f32.mrf.mxu0  ;;  %v2719_v30 = vld [vmem:[%s8853_s30 + $0x65] sm:$0xff]  ;;  %3711 = vperm.xlu1 %8710, %v3589_v22  }
  0xe7   : > { %v857_v43 = vpop.f32.mrf.mxu1  ;;  %3716 = vperm.xlu0 %8709, %v3590_v23  }
  0xe8   : > { %v9336_v44 = vadd.f32 %v857_v43, %v608_v41  ;;  %v7975_v45 = vpop.f32.mrf.mxu0  ;;  %8166 = vmatmul.mubr.msk.bf16.gmra.mxu0 %vm500_vm0, %v1726_v31  ;;  %v2720_v31 = vld [vmem:[%s8853_s30 + $0x6d] sm:$0xff] }
  0xe9   : > { %v8017_v46 = vpop.f32.mrf.mxu1  ;;  %8208 = vmatmul.mubr.msk.bf16.gmra.mxu1 %vm500_vm0, %v9326_v33  ;;  %8217 = vmatprep.mubr.msk.bf16.mxu0 %vm500_vm0, %v9107_v9 }
  0xea   : > { %v9349_v52 = vadd.f32 %v8017_v46, %v7975_v45  ;;  %v621_v53 = vpop.f32.mrf.mxu0  ;;  %8259 = vmatprep.mubr.msk.bf16.mxu1 %vm500_vm0, %v2747_v42  ;;  %v3592_v42 = vld [vmem:[%s11513_s1 + $0xc0] sm:$0xff]  ;;  %v2751_v46 = vpack.c.bf16 %v2720_v31, %v2719_v30 }
  0xeb   : > { %v870_v56 = vpop.f32.mrf.mxu1  ;;  %3726 = vperm.xlu0 %8709, %v3592_v42  }
  0xec   : > { %v9356_v9 = vadd.f32 %v870_v56, %v621_v53  ;;  %v7976_v60 = vpop.f32.mrf.mxu0  ;;  %v3594_v56 = vld [vmem:[%s11513_s1 + $0xd0] sm:$0xff] }
  0xed   : > { %v8018_v62 = vpop.f32.mrf.mxu1 }
  0xee   : > { %v9364_v6 = vadd.f32 %v8018_v62, %v7976_v60  ;;  %v624_v8 = vpop.f32.mrf.mxu0  ;;  %v2722_v60 = vld [vmem:[%s8853_s30 + $0x7d] sm:$0xff] }
  0xef   : > { %v873_v13 = vpop.f32.mrf.mxu1  ;;  %3736 = vperm.xlu0 %8709, %v3594_v56  }
  0xf0   : > { %v9369_v2 = vadd.f32 %v873_v13, %v624_v8  ;;  %v7979_v17 = vpop.f32.mrf.mxu0  ;;  %8218 = vmatmul.mubr.msk.bf16.vlgmr.msra.gmra.mxu0 %vm500_vm0, %v9109_v11  ;;  %v2717_v11 = vld [vmem:[%s8853_s30 + $0x55] sm:$0xff] }
  0xf1   : > { %v8021_v18 = vpop.f32.mrf.mxu1  ;;  %8296 = vmatpush3.bf16.msra.mxu0 %v9146_v19  ;;  %8260 = vmatmul.mubr.msk.bf16.vlgmr.msra.gmra.mxu1 %vm500_vm0, %v2748_v0  ;;  %v2718_v19 = vld [vmem:[%s8853_s30 + $0x5d] sm:$0xff]  ;;  %v2723_v0 = vld [vmem:[%s8853_s30 + $0x85] sm:$0xff] }
  0xf2   : > { %v9381_v16 = vadd.f32 %v8021_v18, %v7979_v17  ;;  %v637_v24 = vpop.f32.mrf.mxu0  ;;  %8221 = vmatprep.mubr.msk.bf16.mxu0 %vm500_vm0, %v9139_v25  ;;  %8263 = vmatprep.mubr.msk.bf16.mxu1 %vm500_vm0, %v2749_v12  ;;  %v2750_v41 = vpack.c.bf16 %v2718_v19, %v2717_v11  ;;  %v3591_v25 = vld [vmem:[%s11513_s1 + $0xb8] sm:$0xff]  ;;  %v2753_v22 = vpack.c.bf16 %v2724_v3, %v2723_v0  ;;  %v3601_v0 = vld [vmem:[%s11513_s1 + $0x108] sm:$0xff]  ;;  %v3602_v3 = vld [vmem:[%s11513_s1 + $0x110] sm:$0xff] }
  0xf3   : > { %v886_v28 = vpop.f32.mrf.mxu1  ;;  %8297 = vmatprep.subr.bf16.mxu0 %v8736_v14  ;;  %3721 = vperm.xlu1 %8710, %v3591_v25   ;;  %v3595_v13 = vld [vmem:[%s11513_s1 + $0xd8] sm:$0xff]  ;;  %v2728_v25 = vld [vmem:[%s8853_s30 + $0xad] sm:$0xff] }
  0xf4   : > { %v9393_v32 = vadd.f32 %v886_v28, %v637_v24  ;;  %v7980_v35 = vpop.f32.mrf.mxu0  ;;  %v3598_v28 = vld [vmem:[%s11513_s1 + $0xf0] sm:$0xff] }
  0xf5   : > { %v8022_v36 = vpop.f32.mrf.mxu1  ;;  %8298 = vmatpush3.bf16.msra.mxu0 %v8736_v14  ;;  %v3596_v14 = vld [vmem:[%s11513_s1 + $0xe0] sm:$0xff] }
  0xf6   : > { %v9401_v43 = vadd.f32 %v8022_v36, %v7980_v35  ;;  %v640_v45 = vpop.f32.mrf.mxu0  ;;  %8299 = vmatprep.subr.bf16.mxu0 %v8737_v26  ;;  %3746 = vperm.xlu0 %8709, %v3596_v14   ;;  %v2726_v35 = vld [vmem:[%s8853_s30 + $0x9d] sm:$0xff]  ;;  %v2731_v14 = vld [vmem:[%s8853_s30 + $0xc5] sm:$0xff] }
  0xf7   : > { %v889_v47 = vpop.f32.mrf.mxu1  ;;  %3731 = vperm.xlu1 %8710, %v3593_v55  }
  0xf8   : > { %v9403_v50 = vadd.f32 %v889_v47, %v640_v45  ;;  %v7983_v53 = vpop.f32.mrf.mxu0  ;;  %8222 = vmatmul.mubr.msk.bf16.gmra.mxu0 %vm500_vm0, %v9141_v27  ;;  %v2721_v27 = vld [vmem:[%s8853_s30 + $0x75] sm:$0xff] }
  0xf9   : > { %v8025_v54 = vpop.f32.mrf.mxu1  ;;  %8264 = vmatmul.mubr.msk.bf16.gmra.mxu1 %vm500_vm0, %v2750_v41  ;;  %8225 = vmatprep.mubr.msk.bf16.mxu0 %vm500_vm0, %v9163_v37  ;;  %v2752_v12 = vpack.c.bf16 %v2722_v60, %v2721_v27  ;;  %v2727_v41 = vld [vmem:[%s8853_s30 + $0xa5] sm:$0xff]  ;;  %v3599_v47 = vld [vmem:[%s11513_s1 + $0xf8] sm:$0xff] }
  0xfa   : > { %v9416_v57 = vadd.f32 %v8025_v54, %v7983_v53  ;;  %v653_v59 = vpop.f32.mrf.mxu0  ;;  %8267 = vmatprep.mubr.msk.bf16.mxu1 %vm500_vm0, %v2751_v46  ;;  %8300 = vmatpush3.bf16.msra.mxu0 %v8737_v26  ;;  %v3597_v26 = vld [vmem:[%s11513_s1 + $0xe8] sm:$0xff]  ;;  %v3600_v53 = vld [vmem:[%s11513_s1 + $0x100] sm:$0xff]  ;;  %v2755_v56 = vpack.c.bf16 %v2728_v25, %v2727_v41 }
  0xfb   : > { %v902_v62 = vpop.f32.mrf.mxu1  ;;  %3741 = vperm.xlu1 %8710, %v3595_v13   ;;  %3756 = vperm.xlu0 %8709, %v3598_v28  }
  0xfc   : > { %v9423_v37 = vadd.f32 %v902_v62, %v653_v59  ;;  %v7984_v4 = vpop.f32.mrf.mxu0 }
  0xfd   : > { %v8026_v8 = vpop.f32.mrf.mxu1 }
  0xfe   : > { %v9431_v17 = vadd.f32 %v8026_v8, %v7984_v4  ;;  %v656_v18 = vpop.f32.mrf.mxu0 }
  0xff   : > { %v905_v23 = vpop.f32.mrf.mxu1  ;;  %3751 = vperm.xlu1 %8710, %v3597_v26   ;;  %3766 = vperm.xlu0 %8709, %v3600_v53   ;;  %v2735_v53 = vld [vmem:[%s8853_s30 + $0xe5] sm:$0xff] }
 0x100   : > { %v9433_v24 = vadd.f32 %v905_v23, %v656_v18  ;;  %v7987_v11 = vpop.f32.mrf.mxu0  ;;  %8226 = vmatmul.mubr.msk.bf16.gmra.mxu0 %vm500_vm0, %v9165_v39  ;;  %v2725_v39 = vld [vmem:[%s8853_s30 + $0x95] sm:$0xff]  ;;  %v2732_v18 = vld [vmem:[%s8853_s30 + $0xcd] sm:$0xff] }
 0x101   : > { %v8029_v19 = vpop.f32.mrf.mxu1  ;;  %8268 = vmatmul.mubr.msk.bf16.gmra.mxu1 %vm500_vm0, %v2752_v12  ;;  %8229 = vmatprep.mubr.msk.bf16.mxu0 %vm500_vm0, %v9181_v49  ;;  %v2754_v46 = vpack.c.bf16 %v2726_v35, %v2725_v39  ;;  %v2730_v12 = vld [vmem:[%s8853_s30 + $0xbd] sm:$0xff] }
 0x102   : > { %v9446_v30 = vadd.f32 %v8029_v19, %v7987_v11  ;;  %v669_v31 = vpop.f32.mrf.mxu0  ;;  %8271 = vmatprep.mubr.msk.bf16.mxu1 %vm500_vm0, %v2753_v22  ;;  %v3603_v19 = vld [vmem:[%s11513_s1 + $0x118] sm:$0xff] }
 0x103   : > { %v918_v36 = vpop.f32.mrf.mxu1  ;;  %3761 = vperm.xlu1 %8710, %v3599_v47   ;;  %3776 = vperm.xlu0 %8709, %v3602_v3  }
 0x104   : > { %v9453_v49 = vadd.f32 %v918_v36, %v669_v31  ;;  %v7988_v42 = vpop.f32.mrf.mxu0  ;;  %v2757_v31 = vpack.c.bf16 %v2732_v18, %v2731_v14  ;;  %v2737_v18 = vld [vmem:[%s8853_s30 + $0xf5] sm:$0xff] }
 0x105   : > { %v8030_v45 = vpop.f32.mrf.mxu1 }
 0x106   : > { %v9461_v54 = vadd.f32 %v8030_v45, %v7988_v42  ;;  %v672_v55 = vpop.f32.mrf.mxu0  ;;  %v2733_v45 = vld [vmem:[%s8853_s30 + $0xd5] sm:$0xff] }
 0x107   : > { %v921_v59 = vpop.f32.mrf.mxu1  ;;  %3771 = vperm.xlu1 %8710, %v3601_v0  }
 0x108   : > { %v9463_v27 = vadd.f32 %v921_v59, %v672_v55  ;;  %v7991_v60 = vpop.f32.mrf.mxu0  ;;  %8230 = vmatmul.mubr.msk.bf16.gmra.mxu0 %vm500_vm0, %v9183_v51  ;;  %v2729_v51 = vld [vmem:[%s8853_s30 + $0xb5] sm:$0xff]  ;;  %v2736_v55 = vld [vmem:[%s8853_s30 + $0xed] sm:$0xff] }
 0x109   : > { %v8033_v62 = vpop.f32.mrf.mxu1  ;;  %8272 = vmatmul.mubr.msk.bf16.gmra.mxu1 %vm500_vm0, %v2754_v46  ;;  %8233 = vmatprep.mubr.msk.bf16.mxu0 %vm500_vm0, %v9199_v61  ;;  %v2756_v11 = vpack.c.bf16 %v2730_v12, %v2729_v51  ;;  %v2734_v46 = vld [vmem:[%s8853_s30 + $0xdd] sm:$0xff]  ;;  %v2759_v0 = vpack.c.bf16 %v2736_v55, %v2735_v53  ;;  %v2741_v55 = vld [vmem:[%s8853_s30 + $0x115] sm:$0xff] }
 0x10a   : > { %v9476_v4 = vadd.f32 %v8033_v62, %v7991_v60  ;;  %v685_v8 = vpop.f32.mrf.mxu0  ;;  %8275 = vmatprep.mubr.msk.bf16.mxu1 %vm500_vm0, %v2755_v56  ;;  %v2758_v60 = vpack.c.bf16 %v2734_v46, %v2733_v45 }
 0x10b   : > { %v934_v13 = vpop.f32.mrf.mxu1  ;;  %3781 = vperm.xlu1 %8710, %v3603_v19   ;;  %v2740_v19 = vld [vmem:[%s8853_s30 + $0x10d] sm:$0xff] }
 0x10c   : > { %v9483_v61 = vadd.f32 %v934_v13, %v685_v8  ;;  %v7992_v22 = vpop.f32.mrf.mxu0 }
 0x10d   : > { %v8034_v23 = vpop.f32.mrf.mxu1 }
 0x10e   : > { %v9488_v26 = vadd.f32 %v8034_v23, %v7992_v22  ;;  %v688_v28 = vpop.f32.mrf.mxu0  ;;  %v2738_v22 = vld [vmem:[%s8853_s30 + $0xfd] sm:$0xff] }
 0x10f   : > { %v937_v39 = vpop.f32.mrf.mxu1 }
 0x110   : > { %v9490_v35 = vadd.f32 %v937_v39, %v688_v28  ;;  %v7995_v36 = vpop.f32.mrf.mxu0  ;;  %8234 = vmatmul.mubr.msk.bf16.gmra.mxu0 %vm500_vm0, %v9204_v1  ;;  %v2760_v39 = vpack.c.bf16 %v2738_v22, %v2737_v18 }
 0x111   : > { %v8037_v41 = vpop.f32.mrf.mxu1  ;;  %8276 = vmatmul.mubr.msk.bf16.gmra.mxu1 %vm500_vm0, %v2756_v11  ;;  %8237 = vmatprep.mubr.msk.bf16.mxu0 %vm500_vm0, %v9226_v15  ;;  %v2739_v11 = vld [vmem:[%s8853_s30 + $0x105] sm:$0xff] }
 0x112   : > { %v9497_v25 = vadd.f32 %v8037_v41, %v7995_v36  ;;  %v701_v42 = vpop.f32.mrf.mxu0  ;;  %8279 = vmatprep.mubr.msk.bf16.mxu1 %vm500_vm0, %v2757_v31  ;;  %v2761_v41 = vpack.c.bf16 %v2740_v19, %v2739_v11 }
 0x113   : > { %v950_v47 = vpop.f32.mrf.mxu1 }
 0x114   : > { %v9504_v56 = vadd.f32 %v950_v47, %v701_v42  ;;  %v7996_v59 = vpop.f32.mrf.mxu0 }
 0x115   : > { %v8038_v1 = vpop.f32.mrf.mxu1 }
 0x116   : > { %v9506_v62 = vadd.f32 %v8038_v1, %v7996_v59  ;;  %v704_v15 = vpop.f32.mrf.mxu0  ;;  %v2742_v59 = vld [vmem:[%s8853_s30 + $0x11d] sm:$0xff] }
 0x117   : > { %v953_v3 = vpop.f32.mrf.mxu1 }
 0x118   : > { %v9508_v8 = vadd.f32 %v953_v3, %v704_v15  ;;  %v7999_v51 = vpop.f32.mrf.mxu0  ;;  %8238 = vmatmul.mubr.msk.bf16.gmra.mxu0 %vm500_vm0, %v9234_v21 }
 0x119   : > { %v8041_v12 = vpop.f32.mrf.mxu1  ;;  %8280 = vmatmul.mubr.msk.bf16.gmra.mxu1 %vm500_vm0, %v2758_v60  ;;  %8241 = vmatprep.mubr.msk.bf16.mxu0 %vm500_vm0, %v9256_v34 }
 0x11a   : > { %v9515_v13 = vadd.f32 %v8041_v12, %v7999_v51  ;;  %v717_v14 = vpop.f32.mrf.mxu0  ;;  %8283 = vmatprep.mubr.msk.bf16.mxu1 %vm500_vm0, %v2759_v0  ;;  %v2743_v0 = vld [vmem:[%s8853_s30 + $0x125] sm:$0xff]  ;;  %v2762_v12 = vpack.c.bf16 %v2742_v59, %v2741_v55 }
 0x11b   : > { %v966_v23 = vpop.f32.mrf.mxu1 }
 0x11c   : > { %v9522_v28 = vadd.f32 %v966_v23, %v717_v14  ;;  %v8000_v21 = vpop.f32.mrf.mxu0 }
 0x11d   : > { %v8042_v31 = vpop.f32.mrf.mxu1 }
 0x11e   : > { %v9524_v36 = vadd.f32 %v8042_v31, %v8000_v21  ;;  %v9526_v34 = vpop.f32.mrf.mxu0  ;;  %v2399_v21 = vld [vmem:[%s8853_s30 + $0x134] sm:$0xff] }
 0x11f   : > { %v9528_v42 = vpop.f32.mrf.mxu1  ;;  %v2745_v31 = vld [vmem:[%s8853_s30 + $0x135] sm:$0xff] }
 0x120   : > { %v8051_v45 = vpop.f32.mrf.mxu0  ;;  %8242 = vmatmul.mubr.msk.bf16.gmra.mxu0 %vm500_vm0, %v9264_v40  ;;  %v2744_v40 = vld [vmem:[%s8853_s30 + $0x12d] sm:$0xff] }
 0x121   : > { %v1293_v46 = vadd.f32 %v8051_v45, %v9279_v48  ;;  %v8093_v47 = vpop.f32.mrf.mxu1  ;;  %8284 = vmatmul.mubr.msk.bf16.gmra.mxu1 %vm500_vm0, %v2760_v39  ;;  %8245 = vmatprep.mubr.msk.bf16.mxu0 %vm500_vm0, %v9290_v63  ;;  %v2763_v18 = vpack.c.bf16 %v2744_v40, %v2743_v0  ;;  %v3057_v45 = vld [vmem:[%s8853_s30 + $0x26] sm:$0xff] }
 0x122   : > { %v1148_v53 = vpop.f32.mrf.mxu0  ;;  %8287 = vmatprep.mubr.msk.bf16.mxu1 %vm500_vm0, %v2761_v41  ;;  %v2746_v41 = vld [vmem:[%s8853_s30 + $0x13d] sm:$0xff] }
 0x123   : > { %v1291_v1 = vadd.f32 %v1148_v53, %v9288_v58  ;;  %v9540_v60 = vadd.f32 %v8093_v47, %v1293_v46  ;;  %v1494_v15 = vpop.f32.mrf.mxu1  ;;  %v3058_v46 = vld [vmem:[%s8853_s30 + $0x2e] sm:$0xff] }
 0x124   : > { %v8052_v3 = vpop.f32.mrf.mxu0  ;;  %v3093_v0 = vpack.c.bf16 %v3058_v46, %v3057_v45 }
 0x125   : > { %v1294_v48 = vadd.f32 %v8052_v3, %v9298_v5  ;;  %v9545_v51 = vadd.f32 %v1494_v15, %v1291_v1  ;;  %v8094_v63 = vpop.f32.mrf.mxu1  ;;  %v2764_v15 = vpack.c.bf16 %v2746_v41, %v2745_v31 }
 0x126   : > { %v1151_v14 = vpop.f32.mrf.mxu0 }
 0x127   : > { %v9548_v58 = vadd.f32 %v1151_v14, %v9302_v10  ;;  %v9550_v22 = vadd.f32 %v8094_v63, %v1294_v48  ;;  %v9552_v23 = vpop.f32.mrf.mxu1  ;;  %v2400_v10 = vld [vmem:[%s8853_s30 + $0x13c] sm:$0xff] }
 0x128   : > { %v8055_v11 = vpop.f32.mrf.mxu0  ;;  %8246 = vmatmul.mubr.msk.bf16.gmra.mxu0 %vm500_vm0, %v9300_v7  ;;  %v2418_v55 = vpack.c.bf16 %v2400_v10, %v2399_v21  ;;  %v3059_v14 = vld [vmem:[%s8853_s30 + $0x36] sm:$0xff] }
 0x129   : > { %v1297_v5 = vadd.f32 %v8055_v11, %v9316_v20  ;;  %v8097_v19 = vpop.f32.mrf.mxu1  ;;  %8288 = vmatmul.mubr.msk.bf16.gmra.mxu1 %vm500_vm0, %v2762_v12  ;;  %8249 = vmatprep.mubr.msk.bf16.mxu0 %vm500_vm0, %v9326_v33 }
 0x12a   : > { %v1164_v39 = vpop.f32.mrf.mxu0  ;;  %8291 = vmatprep.mubr.msk.bf16.mxu1 %vm500_vm0, %v2763_v18  ;;  %v3060_v18 = vld [vmem:[%s8853_s30 + $0x3e] sm:$0xff] }
 0x12b   : > { %v1295_v47 = vadd.f32 %v1164_v39, %v9324_v29  ;;  %v9568_v7 = vadd.f32 %v8097_v19, %v1297_v5  ;;  %v1510_v20 = vpop.f32.mrf.mxu1  ;;  %v3061_v5 = vld [vmem:[%s8853_s30 + $0x46] sm:$0xff]  ;;  %v3094_v39 = vpack.c.bf16 %v3060_v18, %v3059_v14 }
 0x12c   : > { %v8056_v53 = vpop.f32.mrf.mxu0 }
 0x12d   : > { %v1298_v59 = vadd.f32 %v8056_v53, %v9334_v38  ;;  %v9571_v33 = vadd.f32 %v1510_v20, %v1295_v47  ;;  %v8098_v1 = vpop.f32.mrf.mxu1 }
 0x12e   : > { %v1167_v40 = vpop.f32.mrf.mxu0 }
 0x12f   : > { %v9574_v3 = vadd.f32 %v1167_v40, %v9336_v44  ;;  %v9576_v29 = vadd.f32 %v8098_v1, %v1298_v59  ;;  %v9578_v48 = vpop.f32.mrf.mxu1  ;;  %v3062_v44 = vld [vmem:[%s8853_s30 + $0x4e] sm:$0xff]  ;;  %v3063_v1 = vld [vmem:[%s8853_s30 + $0x56] sm:$0xff]  ;;  %v3065_v40 = vld [vmem:[%s8853_s30 + $0x66] sm:$0xff] }
 0x130   : > { %v8059_v63 = vpop.f32.mrf.mxu0  ;;  %8250 = vmatmul.mubr.msk.bf16.gmra.mxu0 %vm500_vm0, %v2418_v55  ;;  %v3095_v46 = vpack.c.bf16 %v3062_v44, %v3061_v5 }
 0x131   : > { %v1301_v38 = vadd.f32 %v8059_v63, %v9349_v52  ;;  %v8101_v12 = vpop.f32.mrf.mxu1  ;;  %8292 = vmatmul.mubr.msk.bf16.gmra.mxu1 %vm500_vm0, %v2764_v15  ;;  %8301 = vmatprep.mubr.msk.bf16.mxu0 %vm500_vm0, %v3093_v0  ;;  %v3064_v15 = vld [vmem:[%s8853_s30 + $0x5e] sm:$0xff]  ;;  %v3066_v63 = vld [vmem:[%s8853_s30 + $0x6e] sm:$0xff] }
 0x132   : > { %v1180_v11 = vpop.f32.mrf.mxu0  ;;  %v3096_v18 = vpack.c.bf16 %v3064_v15, %v3063_v1  ;;  %v3097_v44 = vpack.c.bf16 %v3066_v63, %v3065_v40 }
 0x133   : > { %v1299_v19 = vadd.f32 %v1180_v11, %v9356_v9  ;;  %v9589_v21 = vadd.f32 %v8101_v12, %v1301_v38  ;;  %v1526_v10 = vpop.f32.mrf.mxu1 }
 0x134   : > { %v8060_v31 = vpop.f32.mrf.mxu0 }
 0x135   : > { %v1302_v52 = vadd.f32 %v8060_v31, %v9364_v6  ;;  %v9592_v41 = vadd.f32 %v1526_v10, %v1299_v19  ;;  %v8102_v45 = vpop.f32.mrf.mxu1 }
 0x136   : > { %v1183_v47 = vpop.f32.mrf.mxu0 }
 0x137   : > { %v9595_v20 = vadd.f32 %v1183_v47, %v9369_v2  ;;  %v9597_v9 = vadd.f32 %v8102_v45, %v1302_v52  ;;  %v9599_v53 = vpop.f32.mrf.mxu1  ;;  %v3067_v45 = vld [vmem:[%s8853_s30 + $0x76] sm:$0xff] }
 0x138   : > { %v8063_v55 = vpop.f32.mrf.mxu0  ;;  %8302 = vmatmul.mubr.msk.bf16.vlgmr.msra.gmra.mxu0 %vm500_vm0, %v3094_v39 }
 0x139   : > { %v1305_v59 = vadd.f32 %v8063_v55, %v9381_v16  ;;  %v8105_v6 = vpop.f32.mrf.mxu1  ;;  %8305 = vmatprep.mubr.msk.bf16.mxu0 %vm500_vm0, %v3095_v46  ;;  %v3068_v46 = vld [vmem:[%s8853_s30 + $0x7e] sm:$0xff]  ;;  %v3069_v55 = vld [vmem:[%s8853_s30 + $0x86] sm:$0xff] }
 0x13a   : > { %v1196_v0 = vpop.f32.mrf.mxu0 }
 0x13b   : > { %v1303_v2 = vadd.f32 %v1196_v0, %v9393_v32  ;;  %v9609_v38 = vadd.f32 %v8105_v6, %v1305_v59  ;;  %v1542_v12 = vpop.f32.mrf.mxu1  ;;  %v3070_v59 = vld [vmem:[%s8853_s30 + $0x8e] sm:$0xff]  ;;  %v3098_v0 = vpack.c.bf16 %v3068_v46, %v3067_v45 }
 0x13c   : > { %v8064_v14 = vpop.f32.mrf.mxu0 }
 0x13d   : > { %v1306_v11 = vadd.f32 %v8064_v14, %v9401_v43  ;;  %v9612_v16 = vadd.f32 %v1542_v12, %v1303_v2  ;;  %v8106_v5 = vpop.f32.mrf.mxu1  ;;  %v3099_v2 = vpack.c.bf16 %v3070_v59, %v3069_v55 }
 0x13e   : > { %v1199_v19 = vpop.f32.mrf.mxu0 }
 0x13f   : > { %v9615_v10 = vadd.f32 %v1199_v19, %v9403_v50  ;;  %v9617_v32 = vadd.f32 %v8106_v5, %v1306_v11  ;;  %v9619_v31 = vpop.f32.mrf.mxu1  ;;  %v3072_v19 = vld [vmem:[%s8853_s30 + $0x9e] sm:$0xff] }
 0x140   : > { %v8067_v39 = vpop.f32.mrf.mxu0  ;;  %8306 = vmatmul.mubr.msk.bf16.gmra.mxu0 %vm500_vm0, %v3096_v18 }
 0x141   : > { %v1309_v52 = vadd.f32 %v8067_v39, %v9416_v57  ;;  %v8109_v43 = vpop.f32.mrf.mxu1  ;;  %8309 = vmatprep.mubr.msk.bf16.mxu0 %vm500_vm0, %v3097_v44  ;;  %v3071_v44 = vld [vmem:[%s8853_s30 + $0x96] sm:$0xff] }
 0x142   : > { %v1212_v47 = vpop.f32.mrf.mxu0  ;;  %v3100_v55 = vpack.c.bf16 %v3072_v19, %v3071_v44  ;;  %v3077_v44 = vld [vmem:[%s8853_s30 + $0xc6] sm:$0xff] }
 0x143   : > { %v1307_v50 = vadd.f32 %v1212_v47, %v9423_v37  ;;  %v9629_v6 = vadd.f32 %v8109_v43, %v1309_v52  ;;  %v1558_v1 = vpop.f32.mrf.mxu1  ;;  %v3073_v52 = vld [vmem:[%s8853_s30 + $0xa6] sm:$0xff]  ;;  %v3074_v43 = vld [vmem:[%s8853_s30 + $0xae] sm:$0xff] }
 0x144   : > { %v8068_v15 = vpop.f32.mrf.mxu0 }
 0x145   : > { %v1310_v40 = vadd.f32 %v8068_v15, %v9431_v17  ;;  %v9632_v57 = vadd.f32 %v1558_v1, %v1307_v50  ;;  %v8110_v63 = vpop.f32.mrf.mxu1  ;;  %v3101_v1 = vpack.c.bf16 %v3074_v43, %v3073_v52  ;;  %v8738_v15 = vld [vmem:[%s11518_s6 + $0x18] sm:$0xff]  }
 0x146   : > { %v1215_v12 = vpop.f32.mrf.mxu0  ;;  %8337 = vmatprep.subr.bf16.mxu1 %v8738_v15 }
 0x147   : > { %v9635_v14 = vadd.f32 %v1215_v12, %v9433_v24  ;;  %v9637_v37 = vadd.f32 %v8110_v63, %v1310_v40  ;;  %v9639_v18 = vpop.f32.mrf.mxu1  ;;  %8338 = vmatpush3.bf16.msra.mxu1 %v8738_v15 }
 0x148   : > { %v8071_v11 = vpop.f32.mrf.mxu0  ;;  %8310 = vmatmul.mubr.msk.bf16.gmra.mxu0 %vm500_vm0, %v3098_v0 }
 0x149   : > { %v1313_v5 = vadd.f32 %v8071_v11, %v9446_v30  ;;  %v8113_v17 = vpop.f32.mrf.mxu1  ;;  %8313 = vmatprep.mubr.msk.bf16.mxu0 %vm500_vm0, %v3099_v2  ;;  %v3075_v11 = vld [vmem:[%s8853_s30 + $0xb6] sm:$0xff] }
 0x14a   : > { %v1228_v39 = vpop.f32.mrf.mxu0 }
 0x14b   : > { %v1311_v24 = vadd.f32 %v1228_v39, %v9453_v49  ;;  %v9649_v45 = vadd.f32 %v8113_v17, %v1313_v5  ;;  %v1574_v46 = vpop.f32.mrf.mxu1  ;;  %v3076_v5 = vld [vmem:[%s8853_s30 + $0xbe] sm:$0xff] }
 0x14c   : > { %v8072_v47 = vpop.f32.mrf.mxu0 }
 0x14d   : > { %v1314_v59 = vadd.f32 %v8072_v47, %v9461_v54  ;;  %v9652_v50 = vadd.f32 %v1574_v46, %v1311_v24  ;;  %v8114_v30 = vpop.f32.mrf.mxu1  ;;  %v3102_v24 = vpack.c.bf16 %v3076_v5, %v3075_v11  ;;  %v3081_v11 = vld [vmem:[%s8853_s30 + $0xe6] sm:$0xff]  ;;  %v3082_v5 = vld [vmem:[%s8853_s30 + $0xee] sm:$0xff] }
 0x14e   : > { %v1231_v49 = vpop.f32.mrf.mxu0 }
 0x14f   : > { %v9658_v0 = vadd.f32 %v1231_v49, %v9463_v27  ;;  %v9660_v40 = vadd.f32 %v8114_v30, %v1314_v59  ;;  %v9662_v63 = vpop.f32.mrf.mxu1  ;;  %v3078_v27 = vld [vmem:[%s8853_s30 + $0xce] sm:$0xff] }
 0x150   : > { %v8075_v54 = vpop.f32.mrf.mxu0  ;;  %8314 = vmatmul.mubr.msk.bf16.gmra.mxu0 %vm500_vm0, %v3100_v55  ;;  %v3103_v55 = vpack.c.bf16 %v3078_v27, %v3077_v44 }
 0x151   : > { %v1317_v2 = vadd.f32 %v8075_v54, %v9476_v4  ;;  %v8117_v12 = vpop.f32.mrf.mxu1  ;;  %8317 = vmatprep.mubr.msk.bf16.mxu0 %vm500_vm0, %v3101_v1  ;;  %v3079_v54 = vld [vmem:[%s8853_s30 + $0xd6] sm:$0xff] }
 0x152   : > { %v1244_v17 = vpop.f32.mrf.mxu0 }
 0x153   : > { %v1315_v19 = vadd.f32 %v1244_v17, %v9483_v61  ;;  %v9672_v39 = vadd.f32 %v8117_v12, %v1317_v2  ;;  %v1590_v52 = vpop.f32.mrf.mxu1  ;;  %v3080_v2 = vld [vmem:[%s8853_s30 + $0xde] sm:$0xff] }
 0x154   : > { %v8076_v43 = vpop.f32.mrf.mxu0 }
 0x155   : > { %v1318_v46 = vadd.f32 %v8076_v43, %v9488_v26  ;;  %v9675_v4 = vadd.f32 %v1590_v52, %v1315_v19  ;;  %v8118_v47 = vpop.f32.mrf.mxu1  ;;  %v3104_v19 = vpack.c.bf16 %v3080_v2, %v3079_v54  ;;  %v3085_v2 = vld [vmem:[%s8853_s30 + $0x106] sm:$0xff] }
 0x156   : > { %v1247_v59 = vpop.f32.mrf.mxu0 }
 0x157   : > { %v9678_v30 = vadd.f32 %v1247_v59, %v9490_v35  ;;  %v9680_v61 = vadd.f32 %v8118_v47, %v1318_v46  ;;  %v9682_v1 = vpop.f32.mrf.mxu1 }
 0x158   : > { %v8079_v15 = vpop.f32.mrf.mxu0  ;;  %8318 = vmatmul.mubr.msk.bf16.gmra.mxu0 %vm500_vm0, %v3102_v24  ;;  %v3105_v24 = vpack.c.bf16 %v3082_v5, %v3081_v11 }
 0x159   : > { %v1321_v49 = vadd.f32 %v8079_v15, %v9497_v25  ;;  %v8121_v26 = vpop.f32.mrf.mxu1  ;;  %8321 = vmatprep.mubr.msk.bf16.mxu0 %vm500_vm0, %v3103_v55 }
 0x15a   : > { %v1260_v12 = vpop.f32.mrf.mxu0 }
 0x15b   : > { %v1319_v35 = vadd.f32 %v1260_v12, %v9504_v56  ;;  %v9692_v17 = vadd.f32 %v8121_v26, %v1321_v49  ;;  %v1606_v44 = vpop.f32.mrf.mxu1  ;;  %v3083_v49 = vld [vmem:[%s8853_s30 + $0xf6] sm:$0xff]  ;;  %v3084_v26 = vld [vmem:[%s8853_s30 + $0xfe] sm:$0xff]  ;;  %v3086_v12 = vld [vmem:[%s8853_s30 + $0x10e] sm:$0xff] }
 0x15c   : > { %v8080_v27 = vpop.f32.mrf.mxu0 }
 0x15d   : > { %v1322_v52 = vadd.f32 %v8080_v27, %v9506_v62  ;;  %v9695_v25 = vadd.f32 %v1606_v44, %v1319_v35  ;;  %v8122_v43 = vpop.f32.mrf.mxu1  ;;  %v3106_v44 = vpack.c.bf16 %v3084_v26, %v3083_v49  ;;  %v3089_v26 = vld [vmem:[%s8853_s30 + $0x126] sm:$0xff] }
 0x15e   : > { %v1263_v46 = vpop.f32.mrf.mxu0 }
 0x15f   : > { %v9698_v47 = vadd.f32 %v1263_v46, %v9508_v8  ;;  %v9700_v56 = vadd.f32 %v8122_v43, %v1322_v52  ;;  %v9702_v55 = vpop.f32.mrf.mxu1  ;;  %v3107_v52 = vpack.c.bf16 %v3086_v12, %v3085_v2 }
 0x160   : > { %11525 = vst [vmem:[#allocation3_spill] sm:$0xff] %v9702_v55  ;;  %v8083_v59 = vpop.f32.mrf.mxu0  ;;  %8322 = vmatmul.mubr.msk.bf16.gmra.mxu0 %vm500_vm0, %v3104_v19 }
 0x161   : > { %v1325_v15 = vadd.f32 %v8083_v59, %v9515_v13  ;;  %v8125_v62 = vpop.f32.mrf.mxu1  ;;  %8325 = vmatprep.mubr.msk.bf16.mxu0 %vm500_vm0, %v3105_v24 }
 0x162   : > { %v1276_v54 = vpop.f32.mrf.mxu0 }
 0x163   : > { %v1323_v8 = vadd.f32 %v1276_v54, %v9522_v28  ;;  %v9712_v11 = vadd.f32 %v8125_v62, %v1325_v15  ;;  %v1622_v5 = vpop.f32.mrf.mxu1  ;;  %v3088_v62 = vld [vmem:[%s8853_s30 + $0x11e] sm:$0xff]  ;;  %v3090_v54 = vld [vmem:[%s8853_s30 + $0x12e] sm:$0xff] }
 0x164   : > { %v8084_v35 = vpop.f32.mrf.mxu0 }
 0x165   : > { %v1326_v13 = vadd.f32 %v8084_v35, %v9524_v36  ;;  %v9715_v27 = vadd.f32 %v1622_v5, %v1323_v8  ;;  %v8126_v19 = vpop.f32.mrf.mxu1  ;;  %v3087_v36 = vld [vmem:[%s8853_s30 + $0x116] sm:$0xff] }
 0x166   : > { %v9717_v43 = vpop.f32.mrf.mxu0  ;;  %v3108_v35 = vpack.c.bf16 %v3088_v62, %v3087_v36  ;;  %v3091_v36 = vld [vmem:[%s8853_s30 + $0x136] sm:$0xff] }
 0x167   : > { %v9719_v24 = vadd.f32 %v8126_v19, %v1326_v13  ;;  %v9721_v28 = vpop.f32.mrf.mxu1  ;;  %v3109_v19 = vpack.c.bf16 %v3090_v54, %v3089_v26  ;;  %v8739_v62 = vld [vmem:[%s11518_s6 + $0x10] sm:$0xff]  }
 0x168   : > { %11526 = vst [vmem:[#allocation4_spill] sm:$0xff] %v9721_v28  ;;  %v8135_v46 = vpop.f32.mrf.mxu0  ;;  %8326 = vmatmul.mubr.msk.bf16.gmra.mxu0 %vm500_vm0, %v3106_v44  ;;  %8339 = vmatprep.subr.bf16.mxu1 %v8739_v62 }
 0x169   : > { %v1985_v59 = vadd.f32 %v8135_v46, %v9540_v60  ;;  %v8177_v15 = vpop.f32.mrf.mxu1  ;;  %8329 = vmatprep.mubr.msk.bf16.mxu0 %vm500_vm0, %v3107_v52  ;;  %8340 = vmatpush3.bf16.msra.mxu1 %v8739_v62 }
 0x16a   : > { %v1840_v49 = vpop.f32.mrf.mxu0 }
 0x16b   : > { %v1983_v2 = vadd.f32 %v1840_v49, %v9545_v51  ;;  %v9731_v12 = vadd.f32 %v8177_v15, %v1985_v59  ;;  %v2186_v8 = vpop.f32.mrf.mxu1 }
 0x16c   : > { %v8136_v5 = vpop.f32.mrf.mxu0 }
 0x16d   : > { %v1986_v44 = vadd.f32 %v8136_v5, %v9550_v22  ;;  %v9734_v60 = vadd.f32 %v2186_v8, %v1983_v2  ;;  %v8178_v13 = vpop.f32.mrf.mxu1  ;;  %v3092_v22 = vld [vmem:[%s8853_s30 + $0x13e] sm:$0xff] }
 0x16e   : > { %v9736_v52 = vpop.f32.mrf.mxu0  ;;  %v3110_v5 = vpack.c.bf16 %v3092_v22, %v3091_v36 }
 0x16f   : > { %v9738_v46 = vadd.f32 %v8178_v13, %v1986_v44  ;;  %v9740_v28 = vpop.f32.mrf.mxu1 }
 0x170   : > { %11527 = vst [vmem:[#allocation5_spill] sm:$0xff] %v9740_v28  ;;  %v8139_v51 = vpop.f32.mrf.mxu0  ;;  %8330 = vmatmul.mubr.msk.bf16.gmra.mxu0 %vm500_vm0, %v3108_v35 }
 0x171   : > { %v1989_v59 = vadd.f32 %v8139_v51, %v9568_v7  ;;  %v8181_v15 = vpop.f32.mrf.mxu1  ;;  %8333 = vmatprep.mubr.msk.bf16.mxu0 %vm500_vm0, %v3109_v19 }
 0x172   : > { %v1856_v49 = vpop.f32.mrf.mxu0 }
 0x173   : > { %v1987_v26 = vadd.f32 %v1856_v49, %v9571_v33  ;;  %v9751_v54 = vadd.f32 %v8181_v15, %v1989_v59  ;;  %v2202_v2 = vpop.f32.mrf.mxu1 }
 0x174   : > { %v8140_v8 = vpop.f32.mrf.mxu0 }
 0x175   : > { %v1990_v7 = vadd.f32 %v8140_v8, %v9576_v29  ;;  %v9754_v35 = vadd.f32 %v2202_v2, %v1987_v26  ;;  %v8182_v44 = vpop.f32.mrf.mxu1 }
 0x176   : > { %v9756_v13 = vpop.f32.mrf.mxu0 }
 0x177   : > { %v9758_v19 = vadd.f32 %v8182_v44, %v1990_v7  ;;  %v9760_v51 = vpop.f32.mrf.mxu1 }
 0x178   : > { %11528 = vst [vmem:[#allocation6_spill] sm:$0xff] %v9760_v51  ;;  %v8143_v28 = vpop.f32.mrf.mxu0  ;;  %8334 = vmatmul.mubr.msk.bf16.gmra.mxu0 %vm500_vm0, %v3110_v5 }
 0x179   : > { %v1993_v33 = vadd.f32 %v8143_v28, %v9589_v21  ;;  %v8185_v59 = vpop.f32.mrf.mxu1 }
 0x17a   : > { %v1872_v15 = vpop.f32.mrf.mxu0 }
 0x17b   : > { %v1991_v36 = vadd.f32 %v1872_v15, %v9592_v41  ;;  %v9765_v22 = vadd.f32 %v8185_v59, %v1993_v33  ;;  %v2218_v29 = vpop.f32.mrf.mxu1 }
 0x17c   : > { %v8144_v62 = vpop.f32.mrf.mxu0 }
 0x17d   : > { %v1994_v49 = vadd.f32 %v8144_v62, %v9597_v9  ;;  %v9768_v26 = vadd.f32 %v2218_v29, %v1991_v36  ;;  %v8186_v2 = vpop.f32.mrf.mxu1  ;;  %v8765_v36 = vmov 0.0  }
 0x17e   : > { %v9770_v8 = vpop.f32.mrf.mxu0  ;;  %3827 = vst.msk [vmem:[#allocation2 + $0x30] sm:$0xff] %vm3820_vm1, %v8765_v36  ;;  %3822 = vst.msk [vmem:[#allocation2 + $0x8] sm:$0xff] %vm3820_vm1, %v8765_v36 }
 0x17f   : > { %11529 = vst [vmem:[#allocation7_spill] sm:$0xff] %v9770_v8  ;;  %v9772_v7 = vadd.f32 %v8186_v2, %v1994_v49  ;;  %v9774_v5 = vpop.f32.mrf.mxu1  ;;  %3823 = vst.msk [vmem:[#allocation2 + $0x10] sm:$0xff] %vm3820_vm1, %v8765_v36 }
 0x180   : > { %11530 = vst [vmem:[#allocation8_spill] sm:$0xff] %v9774_v5  ;;  %v8147_v21 = vpop.f32.mrf.mxu0  ;;  %3824 = vst.msk [vmem:[#allocation2 + $0x18] sm:$0xff] %vm3820_vm1, %v8765_v36 }
 0x181   : > { %v1997_v28 = vadd.f32 %v8147_v21, %v9609_v38  ;;  %v8189_v44 = vpop.f32.mrf.mxu1  ;;  %3825 = vst.msk [vmem:[#allocation2 + $0x20] sm:$0xff] %vm3820_vm1, %v8765_v36  ;;  %3826 = vst.msk [vmem:[#allocation2 + $0x28] sm:$0xff] %vm3820_vm1, %v8765_v36 }
 0x182   : > { %v1888_v41 = vpop.f32.mrf.mxu0  ;;  %3828 = vst.msk [vmem:[#allocation2 + $0x38] sm:$0xff] %vm3820_vm1, %v8765_v36  ;;  %3829 = vst.msk [vmem:[#allocation2 + $0x40] sm:$0xff] %vm3820_vm1, %v8765_v36 }
 0x183   : > { %v1995_v33 = vadd.f32 %v1888_v41, %v9612_v16  ;;  %v9778_v59 = vadd.f32 %v8189_v44, %v1997_v28  ;;  %v2234_v15 = vpop.f32.mrf.mxu1  ;;  %3830 = vst.msk [vmem:[#allocation2 + $0x48] sm:$0xff] %vm3820_vm1, %v8765_v36  ;;  %3831 = vst.msk [vmem:[#allocation2 + $0x50] sm:$0xff] %vm3820_vm1, %v8765_v36 }
 0x184   : > { %v8148_v9 = vpop.f32.mrf.mxu0  ;;  %3832 = vst.msk [vmem:[#allocation2 + $0x58] sm:$0xff] %vm3820_vm1, %v8765_v36  ;;  %3833 = vst.msk [vmem:[#allocation2 + $0x60] sm:$0xff] %vm3820_vm1, %v8765_v36 }
 0x185   : > { %3834 = vst.msk [vmem:[#allocation2 + $0x68] sm:$0xff] %vm3820_vm1, %v8765_v36  ;;  %3835 = vst.msk [vmem:[#allocation2 + $0x70] sm:$0xff] %vm3820_vm1, %v8765_v36  ;;  %v1998_v38 = vadd.f32 %v8148_v9, %v9617_v32  ;;  %v9823_v16 = vadd.f32 %v2234_v15, %v1995_v33  ;;  %v8190_v29 = vpop.f32.mrf.mxu1  ;;  %v8740_v33 = vld [vmem:[%s11518_s6 + $0x8] sm:$0xff]  }
 0x186   : > { %3836 = vst.msk [vmem:[#allocation2 + $0x78] sm:$0xff] %vm3820_vm1, %v8765_v36  ;;  %3837 = vst.msk [vmem:[#allocation2 + $0x80] sm:$0xff] %vm3820_vm1, %v8765_v36  ;;  %v9825_v62 = vpop.f32.mrf.mxu0  ;;  %8377 = vmatprep.subr.bf16.mxu0 %v8740_v33 }
 0x187   : > { %3838 = vst.msk [vmem:[#allocation2 + $0x88] sm:$0xff] %vm3820_vm1, %v8765_v36  ;;  %3839 = vst.msk [vmem:[#allocation2 + $0x90] sm:$0xff] %vm3820_vm1, %v8765_v36  ;;  %v9827_v49 = vadd.f32 %v8190_v29, %v1998_v38  ;;  %v9829_v2 = vpop.f32.mrf.mxu1  ;;  %8378 = vmatpush3.bf16.msra.mxu0 %v8740_v33 }
 0x188   : > { %3840 = vst.msk [vmem:[#allocation2 + $0x98] sm:$0xff] %vm3820_vm1, %v8765_v36  ;;  %3841 = vst.msk [vmem:[#allocation2 + $0xa0] sm:$0xff] %vm3820_vm1, %v8765_v36  ;;  %v8151_v21 = vpop.f32.mrf.mxu0 }
 0x189   : > { %3842 = vst.msk [vmem:[#allocation2 + $0xa8] sm:$0xff] %vm3820_vm1, %v8765_v36  ;;  %3843 = vst.msk [vmem:[#allocation2 + $0xb0] sm:$0xff] %vm3820_vm1, %v8765_v36  ;;  %v2001_v28 = vadd.f32 %v8151_v21, %v9629_v6  ;;  %v8193_v44 = vpop.f32.mrf.mxu1 }
 0x18a   : > { %3844 = vst.msk [vmem:[#allocation2 + $0xb8] sm:$0xff] %vm3820_vm1, %v8765_v36  ;;  %3845 = vst.msk [vmem:[#allocation2 + $0xc0] sm:$0xff] %vm3820_vm1, %v8765_v36  ;;  %v1904_v41 = vpop.f32.mrf.mxu0 }
 0x18b   : > { %3846 = vst.msk [vmem:[#allocation2 + $0xc8] sm:$0xff] %vm3820_vm1, %v8765_v36  ;;  %3847 = vst.msk [vmem:[#allocation2 + $0xd0] sm:$0xff] %vm3820_vm1, %v8765_v36  ;;  %v1999_v5 = vadd.f32 %v1904_v41, %v9632_v57  ;;  %v9833_v51 = vadd.f32 %v8193_v44, %v2001_v28  ;;  %v8741_v28 = vld [vmem:[%s11518_s6] sm:$0xff]  }
 0x18c   : > { %3848 = vst.msk [vmem:[#allocation2 + $0xd8] sm:$0xff] %vm3820_vm1, %v8765_v36  ;;  %3849 = vst.msk [vmem:[#allocation2 + $0xe0] sm:$0xff] %vm3820_vm1, %v8765_v36  ;;  %v8152_v32 = vpop.f32.mrf.mxu0  ;;  %8379 = vmatprep.subr.bf16.mxu0 %v8741_v28 }
 0x18d   : > { %3850 = vst.msk [vmem:[#allocation2 + $0xe8] sm:$0xff] %vm3820_vm1, %v8765_v36  ;;  %3851 = vst.msk [vmem:[#allocation2 + $0xf0] sm:$0xff] %vm3820_vm1, %v8765_v36  ;;  %v2002_v15 = vadd.f32 %v8152_v32, %v9637_v37  ;;  %v3901_v32 = vld [vmem:[#allocation2 + $0xd] sm:$0xff]  ;;  %8380 = vmatpush3.bf16.msra.mxu0 %v8741_v28 }
 0x18e   : > { %3852 = vst.msk [vmem:[#allocation2 + $0xf8] sm:$0xff] %vm3820_vm1, %v8765_v36  ;;  %3853 = vst.msk [vmem:[#allocation2 + $0x100] sm:$0xff] %vm3820_vm1, %v8765_v36  ;;  %v9841_v29 = vpop.f32.mrf.mxu0 }
 0x18f   : > { %3854 = vst.msk [vmem:[#allocation2 + $0x108] sm:$0xff] %vm3820_vm1, %v8765_v36  ;;  %3855 = vst.msk [vmem:[#allocation2 + $0x110] sm:$0xff] %vm3820_vm1, %v8765_v36 }
 0x190   : > { %3856 = vst.msk [vmem:[#allocation2 + $0x118] sm:$0xff] %vm3820_vm1, %v8765_v36  ;;  %3857 = vst.msk [vmem:[#allocation2 + $0x120] sm:$0xff] %vm3820_vm1, %v8765_v36  ;;  %v8155_v57 = vpop.f32.mrf.mxu0 }
 0x191   : > { %3858 = vst.msk [vmem:[#allocation2 + $0x128] sm:$0xff] %vm3820_vm1, %v8765_v36  ;;  %3859 = vst.msk [vmem:[#allocation2 + $0x130] sm:$0xff] %vm3820_vm1, %v8765_v36  ;;  %v2005_v44 = vadd.f32 %v8155_v57, %v9649_v45 }
 0x192   : > { %3860 = vst.msk [vmem:[#allocation2 + $0x138] sm:$0xff] %vm3820_vm1, %v8765_v36  ;;  %3861 = vst.msk [vmem:[#allocation2 + $0x140] sm:$0xff] %vm3820_vm1, %v8765_v36  ;;  %v1920_v37 = vpop.f32.mrf.mxu0 }
 0x193   : > { %3862 = vst.msk [vmem:[#allocation2 + $0x148] sm:$0xff] %vm3820_vm1, %v8765_v36  ;;  %3863 = vst.msk [vmem:[#allocation2 + $0x150] sm:$0xff] %vm3820_vm1, %v8765_v36  ;;  %v2250_v36 = vpop.f32.mrf.mxu1 }
 0x194   : > { %11531 = vst [vmem:[#allocation9_spill] sm:$0xff] %v9825_v62  ;;  %11532 = vst [vmem:[#allocation10_spill] sm:$0xff] %v9829_v2  ;;  %v9839_v9 = vadd.f32 %v2250_v36, %v1999_v5  ;;  %v3959_v5 = vld [vmem:[#allocation2 + $0xe] sm:$0xff]  ;;  %v3960_v36 = vld [vmem:[#allocation2 + $0x16] sm:$0xff]  ;;  %v2003_v2 = vadd.f32 %v1920_v37, %v9652_v50 }
 0x195   : > { %v8194_v38 = vpop.f32.mrf.mxu1  ;;  %11533 = vst [vmem:[#allocation11_spill] sm:$0xff] %v9841_v29  ;;  %v3995_v33 = vpack.c.bf16 %v3960_v36, %v3959_v5  ;;  %v8156_v29 = vpop.f32.mrf.mxu0 }
 0x196   : > { %v9843_v6 = vadd.f32 %v8194_v38, %v2002_v15  ;;  %v2006_v8 = vadd.f32 %v8156_v29, %v9660_v40 }
 0x197   : > { %v9845_v21 = vpop.f32.mrf.mxu1  ;;  %8341 = vmatprep.mubr.msk.bf16.mxu1 %vm3820_vm1, %v3995_v33  ;;  %v9858_v57 = vpop.f32.mrf.mxu0 }
 0x198   : > { %11534 = vst [vmem:[#allocation12_spill] sm:$0xff] %v9845_v21  ;;  %v3902_v21 = vld [vmem:[#allocation2 + $0x15] sm:$0xff] }
 0x199   : > { %v8197_v41 = vpop.f32.mrf.mxu1  ;;  %v3937_v62 = vpack.c.bf16 %v3902_v21, %v3901_v32  ;;  %v8159_v28 = vpop.f32.mrf.mxu0 }
 0x19a   : > { %v9852_v15 = vadd.f32 %v8197_v41, %v2005_v44  ;;  %v2009_v41 = vadd.f32 %v8159_v28, %v9672_v39 }
 0x19b   : > { %v2266_v38 = vpop.f32.mrf.mxu1  ;;  %8381 = vmatprep.mubr.msk.bf16.mxu0 %vm3820_vm1, %v3937_v62  ;;  %v1936_v21 = vpop.f32.mrf.mxu0 }
 0x19c   : > { %v9855_v55 = vadd.f32 %v2266_v38, %v2003_v2  ;;  %v2007_v40 = vadd.f32 %v1936_v21, %v9675_v4  ;;  %v9882_v4 = vld [vmem:[%s11518_s6 + $0x28] sm:$0xff]  }
 0x19d   : > { %v8198_v45 = vpop.f32.mrf.mxu1  ;;  %v8160_v5 = vpop.f32.mrf.mxu0  ;;  %11537 = vst [vmem:[#allocation15_spill] sm:$0xff] %v9882_v4  ;;  %8417 = vmatprep.subr.bf16.mxu1 %v9882_v4 }
 0x19e   : > { %v9861_v50 = vadd.f32 %v8198_v45, %v2006_v8  ;;  %v2010_v36 = vadd.f32 %v8160_v5, %v9680_v61 }
 0x19f   : > { %v9863_v44 = vpop.f32.mrf.mxu1  ;;  %v9872_v8 = vpop.f32.mrf.mxu0 }
 0x1a0   : > { %11535 = vst [vmem:[#allocation13_spill] sm:$0xff] %v9863_v44 }
 0x1a1   : > { %v8201_v37 = vpop.f32.mrf.mxu1  ;;  %v8163_v39 = vpop.f32.mrf.mxu0 }
 0x1a2   : > { %v9867_v2 = vadd.f32 %v8201_v37, %v2009_v41  ;;  %v2013_v45 = vadd.f32 %v8163_v39, %v9692_v17 }
 0x1a3   : > { %v2282_v29 = vpop.f32.mrf.mxu1  ;;  %v1952_v41 = vpop.f32.mrf.mxu0 }
 0x1a4   : > { %v9870_v32 = vadd.f32 %v2282_v29, %v2007_v40  ;;  %v2011_v61 = vadd.f32 %v1952_v41, %v9695_v25 }
 0x1a5   : > { %v8202_v62 = vpop.f32.mrf.mxu1  ;;  %v8164_v40 = vpop.f32.mrf.mxu0 }
 0x1a6   : > { %v9874_v38 = vadd.f32 %v8202_v62, %v2010_v36  ;;  %v2014_v29 = vadd.f32 %v8164_v40, %v9700_v56 }
 0x1a7   : > { %v9876_v33 = vpop.f32.mrf.mxu1  ;;  %v9891_v36 = vpop.f32.mrf.mxu0 }
 0x1a8   : > { %11536 = vst [vmem:[#allocation14_spill] sm:$0xff] %v9876_v33 }
 0x1a9   : > { %v8205_v28 = vpop.f32.mrf.mxu1  ;;  %v8167_v33 = vpop.f32.mrf.mxu0 }
 0x1aa   : > { %v9885_v37 = vadd.f32 %v8205_v28, %v2013_v45  ;;  %v2017_v25 = vadd.f32 %v8167_v33, %v9712_v11 }
 0x1ab   : > { %v2298_v21 = vpop.f32.mrf.mxu1  ;;  %v1968_v28 = vpop.f32.mrf.mxu0 }
 0x1ac   : > { %v9889_v5 = vadd.f32 %v2298_v21, %v2011_v61  ;;  %v2015_v41 = vadd.f32 %v1968_v28, %v9715_v27 }
 0x1ad   : > { %v8206_v17 = vpop.f32.mrf.mxu1  ;;  %v8168_v56 = vpop.f32.mrf.mxu0 }
 0x1ae   : > { %v9893_v62 = vadd.f32 %v8206_v17, %v2014_v29  ;;  %v2018_v61 = vadd.f32 %v8168_v56, %v9719_v24 }
 0x1af   : > { %v9895_v39 = vpop.f32.mrf.mxu1  ;;  %v9904_v29 = vpop.f32.mrf.mxu0 }
 0x1b0   : > { %11538 = vst [vmem:[#allocation16_spill] sm:$0xff] %v9895_v39 }
 0x1b1   : > { %v8209_v45 = vpop.f32.mrf.mxu1  ;;  %v8219_v11 = vpop.f32.mrf.mxu0 }
 0x1b2   : > { %v9899_v4 = vadd.f32 %v8209_v45, %v2017_v25  ;;  %v9911_v33 = vadd.f32 %v8219_v11, %v9731_v12 }
 0x1b3   : > { %v2314_v44 = vpop.f32.mrf.mxu1  ;;  %v2532_v25 = vpop.f32.mrf.mxu0 }
 0x1b4   : > { %v9902_v21 = vadd.f32 %v2314_v44, %v2015_v41  ;;  %v9916_v45 = vadd.f32 %v2532_v25, %v9734_v60 }
 0x1b5   : > { %v8210_v40 = vpop.f32.mrf.mxu1  ;;  %v8220_v44 = vpop.f32.mrf.mxu0 }
 0x1b6   : > { %v9906_v17 = vadd.f32 %v8210_v40, %v2018_v61  ;;  %v9921_v28 = vadd.f32 %v8220_v44, %v9738_v46 }
 0x1b7   : > { %v9908_v39 = vpop.f32.mrf.mxu1  ;;  %v9925_v56 = vpop.f32.mrf.mxu0 }
 0x1b8   : > { %11539 = vst [vmem:[#allocation17_spill] sm:$0xff] %v9908_v39  ;;  %11540 = vst [vmem:[#allocation18_spill] sm:$0xff] %v9921_v28 }
 0x1b9   : > { %v9913_v27 = vpop.f32.mrf.mxu1  ;;  %v8223_v12 = vpop.f32.mrf.mxu0 }
 0x1ba   : > { %v9930_v40 = vadd.f32 %v8223_v12, %v9751_v54 }
 0x1bb   : > { %v9918_v24 = vpop.f32.mrf.mxu1  ;;  %v2548_v11 = vpop.f32.mrf.mxu0 }
 0x1bc   : > { %v9933_v60 = vadd.f32 %v2548_v11, %v9754_v35 }
 0x1bd   : > { %v9923_v41 = vpop.f32.mrf.mxu1  ;;  %v8224_v39 = vpop.f32.mrf.mxu0 }
 0x1be   : > { %11541 = vst [vmem:[#allocation19_spill] sm:$0xff] %v9923_v41  ;;  %11543 = vst [vmem:[#allocation21_spill] sm:$0xff] %v9933_v60  ;;  %v9938_v46 = vadd.f32 %v8224_v39, %v9758_v19 }
 0x1bf   : > { %v9927_v61 = vpop.f32.mrf.mxu1  ;;  %v9940_v44 = vpop.f32.mrf.mxu0 }
 0x1c0   : > { %11542 = vst [vmem:[#allocation20_spill] sm:$0xff] %v9927_v61  ;;  %11544 = vst [vmem:[#allocation22_spill] sm:$0xff] %v9938_v46 }
 0x1c1   : > { %v9935_v25 = vpop.f32.mrf.mxu1  ;;  %v8227_v28 = vpop.f32.mrf.mxu0 }
 0x1c2   : > { %v9945_v61 = vadd.f32 %v8227_v28, %v9765_v22 }
 0x1c3   : > { %v9942_v41 = vpop.f32.mrf.mxu1  ;;  %v2564_v54 = vpop.f32.mrf.mxu0 }
 0x1c4   : > { %11545 = vst [vmem:[#allocation23_spill] sm:$0xff] %v9942_v41  ;;  %11546 = vst [vmem:[#allocation24_spill] sm:$0xff] %v9945_v61  ;;  %v9950_v35 = vadd.f32 %v2564_v54, %v9768_v26 }
 0x1c5   : > { %v9947_v12 = vpop.f32.mrf.mxu1  ;;  %v8228_v11 = vpop.f32.mrf.mxu0 }
 0x1c6   : > { %11547 = vst [vmem:[#allocation25_spill] sm:$0xff] %v9950_v35  ;;  %v9953_v60 = vadd.f32 %v8228_v11, %v9772_v7 }
 0x1c7   : > { %v9955_v19 = vpop.f32.mrf.mxu0  ;;  %v9957_v39 = vpop.f32.mrf.mxu1 }
 0x1c8   : > { %11548 = vst [vmem:[#allocation26_spill] sm:$0xff] %v9953_v60 }
 0x1c9   : > { %v8231_v46 = vpop.f32.mrf.mxu0  ;;  %v9962_v28 = vpop.f32.mrf.mxu1 }
 0x1ca   : > { %v9960_v41 = vadd.f32 %v8231_v46, %v9778_v59 }
 0x1cb   : > { %v2580_v22 = vpop.f32.mrf.mxu0  ;;  %v9972_v11 = vpop.f32.mrf.mxu1 }
 0x1cc   : > { %11549 = vst [vmem:[#allocation27_spill] sm:$0xff] %v9960_v41  ;;  %v9965_v61 = vadd.f32 %v2580_v22, %v9823_v16 }
 0x1cd   : > { %v8232_v26 = vpop.f32.mrf.mxu0  ;;  %v9977_v46 = vpop.f32.mrf.mxu1 }
 0x1ce   : > { %11550 = vst [vmem:[#allocation28_spill] sm:$0xff] %v9965_v61  ;;  %v9968_v54 = vadd.f32 %v8232_v26, %v9827_v49  ;;  %v9990_v26 = vld [vmem:[%s11518_s6 + $0x38] sm:$0xff]   ;;  %v10012_v61 = vpop.permute.xlu1 %3616 }
 0x1cf   : > { %v9970_v7 = vpop.f32.mrf.mxu0  ;;  %11556 = vst [vmem:[#allocation34_spill] sm:$0xff] %v9990_v26  ;;  %8457 = vmatprep.subr.bf16.mxu0 %v9990_v26 }
 0x1d0   : > { %11551 = vst [vmem:[#allocation29_spill] sm:$0xff] %v9968_v54  ;;  %v9992_v54 = vpop.f32.mrf.mxu1 }
 0x1d1   : > { %v8235_v60 = vpop.f32.mrf.mxu0 }
 0x1d2   : > { %v9975_v35 = vadd.f32 %v8235_v60, %v9833_v51 }
 0x1d3   : > { %v2596_v59 = vpop.f32.mrf.mxu0 }
 0x1d4   : > { %11552 = vst [vmem:[#allocation30_spill] sm:$0xff] %v9975_v35  ;;  %v9980_v41 = vadd.f32 %v2596_v59, %v9839_v9  ;;  %v9998_v59 = vpop.f32.mrf.mxu1 }
 0x1d5   : > { %v8236_v16 = vpop.f32.mrf.mxu0 }
 0x1d6   : > { %11553 = vst [vmem:[#allocation31_spill] sm:$0xff] %v9980_v41  ;;  %v9983_v22 = vadd.f32 %v8236_v16, %v9843_v6  ;;  %v10003_v16 = vpop.permute.xlu0 %3606  ;;  %v10010_v35 = vpop.f32.mrf.mxu1 }
 0x1d7   : > { %v9985_v49 = vpop.f32.mrf.mxu0 }
 0x1d8   : > { %11554 = vst [vmem:[#allocation32_spill] sm:$0xff] %v9983_v22  ;;  %11555 = vst [vmem:[#allocation33_spill] sm:$0xff] %v9985_v49 }
 0x1d9   : > { %v8239_v51 = vpop.f32.mrf.mxu0 }
 0x1da   : > { %v9996_v60 = vadd.f32 %v8239_v51, %v9852_v15  ;;  %v10017_v51 = vpop.permute.xlu0 %3611 }
 0x1db   : > { %v2612_v9 = vpop.f32.mrf.mxu0  ;;  %11562 = vst [vmem:[#allocation40_spill] sm:$0xff] %v10017_v51 }
 0x1dc   : > { %11557 = vst [vmem:[#allocation35_spill] sm:$0xff] %v9996_v60  ;;  %v10001_v6 = vadd.f32 %v2612_v9, %v9855_v55  ;;  %v10019_v9 = vpop.f32.mrf.mxu1  ;;  %v10029_v60 = vpop.permute.xlu1 %3621 }
 0x1dd   : > { %v8240_v22 = vpop.f32.mrf.mxu0  ;;  %11563 = vst [vmem:[#allocation41_spill] sm:$0xff] %v10019_v9 }
 0x1de   : > { %11558 = vst [vmem:[#allocation36_spill] sm:$0xff] %v10001_v6  ;;  %v10006_v41 = vadd.f32 %v8240_v22, %v9861_v50 }
 0x1df   : > { %v10008_v49 = vpop.f32.mrf.mxu0 }
 0x1e0   : > { %11559 = vst [vmem:[#allocation37_spill] sm:$0xff] %v10006_v41  ;;  %11560 = vst [vmem:[#allocation38_spill] sm:$0xff] %v10008_v49  ;;  %v10031_v49 = vpop.f32.mrf.mxu1 }
 0x1e1   : > { %v8243_v26 = vpop.f32.mrf.mxu0 }
 0x1e2   : > { %v10015_v15 = vadd.f32 %v8243_v26, %v9867_v2  ;;  %v10033_v2 = vpop.permute.xlu0 %3626  ;;  %v10038_v9 = vpop.f32.mrf.mxu1 }
 0x1e3   : > { %v2628_v55 = vpop.f32.mrf.mxu0 }
 0x1e4   : > { %11561 = vst [vmem:[#allocation39_spill] sm:$0xff] %v10015_v15  ;;  %v10022_v6 = vadd.f32 %v2628_v55, %v9870_v32  ;;  %v10043_v55 = vpop.permute.xlu1 %3631 }
 0x1e5   : > { %v8244_v50 = vpop.f32.mrf.mxu0 }
 0x1e6   : > { %11564 = vst [vmem:[#allocation42_spill] sm:$0xff] %v10022_v6  ;;  %v10025_v22 = vadd.f32 %v8244_v50, %v9874_v38 }
 0x1e7   : > { %v10027_v41 = vpop.f32.mrf.mxu0 }
 0x1e8   : > { %11565 = vst [vmem:[#allocation43_spill] sm:$0xff] %v10025_v22  ;;  %11566 = vst [vmem:[#allocation44_spill] sm:$0xff] %v10027_v41  ;;  %v10048_v22 = vpop.permute.xlu0 %3636  ;;  %v10052_v41 = vpop.f32.mrf.mxu1 }
 0x1e9   : > { %v8247_v26 = vpop.f32.mrf.mxu0 }
 0x1ea   : > { %v10036_v15 = vadd.f32 %v8247_v26, %v9885_v37  ;;  %v1638_v26 = vadd.f32 %v9552_v23, %v9548_v58 }
 0x1eb   : > { %v2644_v51 = vpop.f32.mrf.mxu0 }
 0x1ec   : > { %11567 = vst [vmem:[#allocation45_spill] sm:$0xff] %v10036_v15  ;;  %v10041_v32 = vadd.f32 %v2644_v51, %v9889_v5  ;;  %v970_v5 = vadd.f32 %v9528_v42, %v9526_v34  ;;  %v10072_v23 = vpop.permute.xlu0 %3646  ;;  %v1646_v34 = vadd.f32 %v9599_v53, %v9595_v20  ;;  %v1650_v42 = vadd.f32 %v9619_v31, %v9615_v10  ;;  %v11571_v20 = vld [vmem:[#allocation3_spill] sm:$0xff]  ;;  %v11572_v10 = vld [vmem:[#allocation5_spill] sm:$0xff] }
 0x1ed   : > { %v8248_v38 = vpop.f32.mrf.mxu0  ;;  %v1666_v53 = vadd.f32 %v11571_v20, %v9698_v47  ;;  %v10105_v47 = vld [vmem:[%s11515_s3] ss:$0 sm:$0xff] }
 0x1ee   : > { %11568 = vst [vmem:[#allocation46_spill] sm:$0xff] %v10041_v32  ;;  %v10046_v50 = vadd.f32 %v8248_v38, %v9893_v62  ;;  %v1984_v62 = vadd.f32 %v9736_v52, %v1638_v26  ;;  %v10062_v38 = vpop.permute.xlu1 %3641  ;;  %v1642_v32 = vadd.f32 %v9578_v48, %v9574_v3  ;;  %v1324_v58 = vadd.f32 %v9717_v43, %v970_v5  ;;  %v11575_v5 = vld [vmem:[#allocation9_spill] sm:$0xff] }
 0x1ef   : > { %v10050_v6 = vpop.f32.mrf.mxu0  ;;  %v1658_v3 = vadd.f32 %v9662_v63, %v9658_v0  ;;  %v1662_v48 = vadd.f32 %v9682_v1, %v9678_v30  ;;  %v11574_v0 = vld [vmem:[#allocation4_spill] sm:$0xff]  ;;  %v1996_v30 = vadd.f32 %v11575_v5, %v1650_v42  ;;  %v11576_v1 = vld [vmem:[#allocation11_spill] sm:$0xff] }
 0x1f0   : > { %11569 = vst [vmem:[#allocation47_spill] sm:$0xff] %v10046_v50  ;;  %11570 = vst [vmem:[#allocation48_spill] sm:$0xff] %v10050_v6  ;;  %v10064_v50 = vpop.f32.mrf.mxu1  ;;  %v1988_v43 = vadd.f32 %v9756_v13, %v1642_v32  ;;  %v2330_v31 = vadd.f32 %v11572_v10, %v1984_v62  ;;  %v1670_v63 = vadd.f32 %v11574_v0, %v1324_v58  ;;  %v11578_v10 = vld [vmem:[#allocation8_spill] sm:$0xff]  ;;  %v11579_v0 = vld [vmem:[#allocation18_spill] sm:$0xff] }
 0x1f1   : > { %v8251_v37 = vpop.f32.mrf.mxu0  ;;  %v2004_v32 = vadd.f32 %v9858_v57, %v1658_v3  ;;  %v3021_v62 = vadd.f32 %v9918_v24, %v9916_v45  ;;  %v2008_v42 = vadd.f32 %v9872_v8, %v1662_v48  ;;  %v2012_v57 = vadd.f32 %v9891_v36, %v1666_v53  ;;  %v10116_v3 = vpop.permute.xlu0 %3656  ;;  %v11580_v45 = vld [vmem:[#allocation19_spill] sm:$0xff]  ;;  %v11582_v8 = vld [vmem:[#allocation12_spill] sm:$0xff]  ;;  %v11583_v36 = vld [vmem:[#allocation13_spill] sm:$0xff] }
 0x1f2   : > { %v10057_v15 = vadd.f32 %v8251_v37, %v9899_v4  ;;  %v3024_v24 = vadd.f32 %v11580_v45, %v11579_v0 }
 0x1f3   : > { %v2660_v51 = vpop.f32.mrf.mxu0 }
 0x1f4   : > { %v10067_v6 = vadd.f32 %v2660_v51, %v9902_v21  ;;  %v1654_v21 = vadd.f32 %v9639_v18, %v9635_v14  ;;  %v3023_v14 = vadd.f32 %v9913_v27, %v9911_v33  ;;  %v10096_v18 = vpop.f32.mrf.mxu1  ;;  %v2676_v33 = vadd.f32 %v9925_v56, %v2330_v31  ;;  %v10110_v27 = vpop.permute.xlu1 %3651 }
 0x1f5   : > { %v8252_v4 = vpop.f32.mrf.mxu0 }
 0x1f6   : > { %v10079_v52 = vadd.f32 %v8252_v4, %v9906_v17  ;;  %v11573_v17 = vld [vmem:[#allocation7_spill] sm:$0xff]  ;;  %v2000_v13 = vadd.f32 %v11576_v1, %v1654_v21  ;;  %v11577_v4 = vld [vmem:[#allocation6_spill] sm:$0xff]  ;;  %v2016_v21 = vadd.f32 %v9904_v29, %v1670_v63  ;;  %v10121_v56 = vpop.f32.mrf.mxu1  ;;  %v10129_v29 = vadd.f32 %v11583_v36, %v2004_v32  ;;  %v11584_v1 = vld [vmem:[#allocation20_spill] sm:$0xff] }
 0x1f7   : > { %v10088_v37 = vpop.f32.mrf.mxu0  ;;  %v1992_v26 = vadd.f32 %v11573_v17, %v1646_v34  ;;  %v2334_v34 = vadd.f32 %v11577_v4, %v1988_v43  ;;  %v11581_v43 = vld [vmem:[#allocation10_spill] sm:$0xff] }
 0x1f8   : > { %v2342_v5 = vadd.f32 %v11581_v43, %v1996_v30  ;;  %v10126_v48 = vadd.f32 %v11582_v8, %v2000_v13  ;;  %v11585_v4 = vld [vmem:[#allocation14_spill] sm:$0xff]  ;;  %v10155_v45 = vpop.permute.xlu1 %3661  ;;  %v11589_v43 = vld [vmem:[#allocation23_spill] sm:$0xff] }
 0x1f9   : > { %v8303_v51 = vpop.f32.mrf.mxu0  ;;  %v2338_v17 = vadd.f32 %v11578_v10, %v1992_v26  ;;  %v2680_v53 = vadd.f32 %v9940_v44, %v2334_v34  ;;  %v10135_v26 = vld [vmem:[%s11516_s4] ss:$0 sm:$0xff]  ;;  %v10140_v13 = vadd.f32 %v11585_v4, %v2008_v42  ;;  %v11587_v10 = vld [vmem:[#allocation17_spill] sm:$0xff]  ;;  %v3027_v34 = vadd.f32 %v9935_v25, %v9930_v40  ;;  %v11590_v40 = vld [vmem:[#allocation22_spill] sm:$0xff] }
 0x1fa   : > { %v3369_v58 = vadd.f32 %v8303_v51, %v3023_v14  ;;  %v3022_v51 = vadd.f32 %v11584_v1, %v2676_v33  ;;  %v10146_v44 = vadd.f32 %v11587_v10, %v2016_v21  ;;  %v10153_v33 = vld [vmem:[%s11517_s5] ss:$0 sm:$0xff]  ;;  %v3028_v25 = vadd.f32 %v9947_v12, %v11590_v40  ;;  %v10167_v1 = vpop.permute.xlu0 %3666 }
 0x1fb   : > { %v3224_v20 = vpop.f32.mrf.mxu0  ;;  %v3026_v36 = vadd.f32 %v9957_v39, %v2680_v53 }
 0x1fc   : > { %v3412_v31 = vadd.f32 %v10105_v47, %v3369_v58  ;;  %v3367_v14 = vadd.f32 %v3224_v20, %v3021_v62  ;;  %v11586_v20 = vld [vmem:[#allocation16_spill] sm:$0xff] }
 0x1fd   : > { %v8304_v63 = vpop.f32.mrf.mxu0  ;;  %v10143_v32 = vadd.f32 %v11586_v20, %v2012_v57 }
 0x1fe   : > { %v3448_v58 = vmax.f32 %v3412_v31, 0.0  ;;  %v3410_v62 = vadd.f32 %v10105_v47, %v3367_v14  ;;  %v3370_v30 = vadd.f32 %v8304_v63, %v3024_v24  ;;  %v10157_v24 = vpop.f32.mrf.mxu1  ;;  %v11588_v14 = vld [vmem:[#allocation21_spill] sm:$0xff]  ;;  %v2684_v63 = vadd.f32 %v9955_v19, %v2338_v17 }
 0x1ff   : > { %v3227_v0 = vpop.f32.mrf.mxu0  ;;  %v3025_v8 = vadd.f32 %v11589_v43, %v11588_v14  ;;  %v11593_v14 = vld [vmem:[#allocation26_spill] sm:$0xff] }
 0x200   : > { %v3491_v42 = vmul.f32 %v10135_v26, %v3448_v58  ;;  %v3446_v57 = vmax.f32 %v3410_v62, 0.0  ;;  %v3413_v31 = vadd.f32 %v10105_v47, %v3370_v30  ;;  %v3368_v21 = vadd.f32 %v3227_v0, %v3022_v51  ;;  %v11591_v30 = vld [vmem:[#allocation24_spill] sm:$0xff]  ;;  %v11592_v0 = vld [vmem:[#allocation25_spill] sm:$0xff]  ;;  %v10180_v53 = vpop.f32.mrf.mxu1 }
 0x201   : > { %v8307_v4 = vpop.f32.mrf.mxu0  ;;  %v3031_v10 = vadd.f32 %v9962_v28, %v11591_v30  ;;  %v3029_v12 = vadd.f32 %v9972_v11, %v11592_v0  ;;  %v10178_v39 = vadd.f32 %v9977_v46, %v11593_v14  ;;  %v10186_v28 = vadd.f32 %v9992_v54, %v2684_v63 }
 0x202   : > { %v3534_v20 = vadd.f32 %v10153_v33, %v3491_v42  ;;  %v3489_v58 = vmul.f32 %v10135_v26, %v3446_v57  ;;  %v3449_v62 = vmax.f32 %v3413_v31, 0.0  ;;  %v3411_v51 = vadd.f32 %v10105_v47, %v3368_v21 }
 0x203   : > { %v3373_v19 = vadd.f32 %v8307_v4, %v3027_v34  ;;  %v3240_v17 = vpop.f32.mrf.mxu0  ;;  %v2688_v11 = vadd.f32 %v9970_v7, %v2342_v5  ;;  %v10190_v34 = vpop.permute.xlu1 %3671  ;;  %v11595_v7 = vld [vmem:[#allocation28_spill] sm:$0xff] }
 0x204   : > { %v3786_v42 = vmul.f32 %v10012_v61, %v3534_v20  ;;  %v3532_v57 = vadd.f32 %v10153_v33, %v3489_v58  ;;  %v3492_v31 = vmul.f32 %v10135_v26, %v3449_v62  ;;  %v3447_v21 = vmax.f32 %v3411_v51, 0.0  ;;  %v11594_v62 = vld [vmem:[#allocation27_spill] sm:$0xff] }
 0x205   : > { %v3416_v43 = vadd.f32 %v10105_v47, %v3373_v19  ;;  %v3371_v46 = vadd.f32 %v3240_v17, %v3025_v8  ;;  %v8308_v40 = vpop.f32.mrf.mxu0  ;;  %v10198_v54 = vadd.f32 %v9998_v59, %v11594_v62  ;;  %v10202_v5 = vadd.f32 %v10010_v35, %v11595_v7  ;;  %v10204_v8 = vpop.permute.xlu0 %3676  ;;  %v11596_v19 = vld [vmem:[#allocation29_spill] sm:$0xff] }
 0x206   : > { %3867 = vst.msk [vmem:[#allocation2 + $0x30] sm:$0xff] %vm3820_vm1, %v3786_v42  ;;  %v3784_v61 = vmul.f32 %v10003_v16, %v3532_v57  ;;  %v3535_v4 = vadd.f32 %v10153_v33, %v3492_v31  ;;  %v3490_v20 = vmul.f32 %v10135_v26, %v3447_v21  ;;  %v3374_v58 = vadd.f32 %v8308_v40, %v3028_v25  ;;  %v2961_v16 = vpop.f32.mrf.mxu1  ;;  %v11597_v17 = vld [vmem:[#allocation41_spill] sm:$0xff] }
 0x207   : > { %v3452_v63 = vmax.f32 %v3416_v43, 0.0  ;;  %v3414_v51 = vadd.f32 %v10105_v47, %v3371_v46  ;;  %v3243_v30 = vpop.f32.mrf.mxu0  ;;  %v10213_v35 = vadd.f32 %v11597_v17, %v11596_v19  ;;  %v10216_v42 = vadd.f32 %v10031_v49, %v2688_v11  ;;  %v11598_v43 = vld [vmem:[#allocation40_spill] sm:$0xff]  ;;  %v10230_v7 = vpop.permute.xlu1 %3681 }
 0x208   : > { %3865 = vst.msk [vmem:[#allocation2 + $0x20] sm:$0xff] %vm3820_vm1, %v3784_v61  ;;  %v3787_v0 = vmul.f32 %v10029_v60, %v3535_v4  ;;  %v3533_v25 = vadd.f32 %v10153_v33, %v3490_v20  ;;  %v3417_v59 = vadd.f32 %v10105_v47, %v3374_v58  ;;  %v3372_v14 = vadd.f32 %v3243_v30, %v3026_v36  ;;  %v11599_v36 = vld [vmem:[#allocation30_spill] sm:$0xff]  ;;  %v11600_v20 = vld [vmem:[#allocation33_spill] sm:$0xff] }
 0x209   : > { %v3495_v57 = vmul.f32 %v10135_v26, %v3452_v63  ;;  %v3450_v31 = vmax.f32 %v3414_v51, 0.0  ;;  %v8311_v21 = vpop.f32.mrf.mxu0  ;;  %v10224_v4 = vadd.f32 %v10038_v9, %v11599_v36  ;;  %v2692_v49 = vadd.f32 %v11600_v20, %v10126_v48  ;;  %v10232_v63 = vpop.f32.mrf.mxu1 }
 0x20a   : > { %3868 = vst.msk [vmem:[#allocation2 + $0x38] sm:$0xff] %vm3820_vm1, %v3787_v0  ;;  %v3785_v60 = vmul.f32 %v11598_v43, %v3533_v25  ;;  %v3453_v46 = vmax.f32 %v3417_v59, 0.0  ;;  %v3415_v40 = vadd.f32 %v10105_v47, %v3372_v14  ;;  %v3377_v61 = vadd.f32 %v8311_v21, %v3031_v10  ;;  %v11601_v0 = vld [vmem:[#allocation31_spill] sm:$0xff]  ;;  %v11602_v25 = vld [vmem:[#allocation32_spill] sm:$0xff]  ;;  %v10245_v14 = vpop.permute.xlu0 %3686 }
 0x20b   : > { %v3538_v11 = vadd.f32 %v10153_v33, %v3495_v57  ;;  %v3493_v58 = vmul.f32 %v10135_v26, %v3450_v31  ;;  %v3256_v62 = vpop.f32.mrf.mxu0  ;;  %v10239_v48 = vadd.f32 %v10052_v41, %v11601_v0  ;;  %v10243_v59 = vadd.f32 %v10064_v50, %v11602_v25  ;;  %v11603_v50 = vld [vmem:[#allocation38_spill] sm:$0xff] }
 0x20c   : > { %3866 = vst.msk [vmem:[#allocation2 + $0x28] sm:$0xff] %vm3820_vm1, %v3785_v60  ;;  %v3496_v10 = vmul.f32 %v10135_v26, %v3453_v46  ;;  %v3451_v51 = vmax.f32 %v3415_v40, 0.0  ;;  %v3420_v9 = vadd.f32 %v10105_v47, %v3377_v61  ;;  %v3375_v30 = vadd.f32 %v3256_v62, %v3029_v12  ;;  %v10260_v61 = vpop.f32.mrf.mxu1 }
 0x20d   : > { %v3790_v19 = vmul.f32 %v10048_v22, %v3538_v11  ;;  %v3536_v17 = vadd.f32 %v10153_v33, %v3493_v58  ;;  %v8312_v57 = vpop.f32.mrf.mxu0  ;;  %v10253_v41 = vadd.f32 %v10096_v18, %v2692_v49  ;;  %v2696_v60 = vadd.f32 %v11603_v50, %v10129_v29  ;;  %v11604_v49 = vld [vmem:[#allocation35_spill] sm:$0xff]  ;;  %v11605_v29 = vld [vmem:[#allocation36_spill] sm:$0xff] }
 0x20e   : > { %v3539_v31 = vadd.f32 %v10153_v33, %v3496_v10  ;;  %v3494_v21 = vmul.f32 %v10135_v26, %v3451_v51  ;;  %v3456_v12 = vmax.f32 %v3420_v9, 0.0  ;;  %v3418_v43 = vadd.f32 %v10105_v47, %v3375_v30  ;;  %v10276_v10 = vpop.permute.xlu1 %3691  ;;  %v11606_v30 = vld [vmem:[#allocation37_spill] sm:$0xff] }
 0x20f   : > { %3871 = vst.msk [vmem:[#allocation2 + $0x50] sm:$0xff] %vm3820_vm1, %v3790_v19  ;;  %v3788_v22 = vmul.f32 %v10033_v2, %v3536_v17  ;;  %v3378_v46 = vadd.f32 %v8312_v57, %v10178_v39  ;;  %v3259_v40 = vpop.f32.mrf.mxu0  ;;  %v10267_v58 = vadd.f32 %v10121_v56, %v11604_v49  ;;  %v10271_v62 = vadd.f32 %v10157_v24, %v11605_v29  ;;  %v3903_v50 = vld [vmem:[#allocation2 + $0x1d] sm:$0xff] }
 0x210   : > { %v3791_v36 = vmul.f32 %v10062_v38, %v3539_v31  ;;  %v3537_v20 = vadd.f32 %v10153_v33, %v3494_v21  ;;  %v3499_v11 = vmul.f32 %v10135_v26, %v3456_v12  ;;  %v3454_v18 = vmax.f32 %v3418_v43, 0.0  ;;  %v10292_v21 = vpop.f32.mrf.mxu1  ;;  %v3961_v43 = vld [vmem:[#allocation2 + $0x1e] sm:$0xff] }
 0x211   : > { %3869 = vst.msk [vmem:[#allocation2 + $0x40] sm:$0xff] %vm3820_vm1, %v3788_v22  ;;  %v3421_v2 = vadd.f32 %v10105_v47, %v3378_v46  ;;  %v3376_v39 = vadd.f32 %v3259_v40, %v10186_v28  ;;  %v8315_v38 = vpop.f32.mrf.mxu0  ;;  %v10285_v0 = vadd.f32 %v10180_v53, %v11606_v30  ;;  %v10287_v25 = vadd.f32 %v2961_v16, %v2696_v60  ;;  %v10289_v28 = vpop.permute.xlu0 %3696  ;;  %v3964_v29 = vld [vmem:[#allocation2 + $0x36] sm:$0xff] }
 0x212   : > { %3872 = vst.msk [vmem:[#allocation2 + $0x58] sm:$0xff] %vm3820_vm1, %v3791_v36  ;;  %v3789_v51 = vmul.f32 %v10043_v55, %v3537_v20  ;;  %v3542_v56 = vadd.f32 %v10153_v33, %v3499_v11  ;;  %v3497_v9 = vmul.f32 %v10135_v26, %v3454_v18  ;;  %v3381_v24 = vadd.f32 %v8315_v38, %v10198_v54  ;;  %v8743_v11 = vld [vmem:[%s11518_s6 + $0x20] sm:$0xff]  }
 0x213   : > { %v3457_v19 = vmax.f32 %v3421_v2, 0.0  ;;  %v3419_v17 = vadd.f32 %v10105_v47, %v3376_v39  ;;  %v3272_v57 = vpop.f32.mrf.mxu0  ;;  %v3962_v31 = vld [vmem:[#allocation2 + $0x26] sm:$0xff]  ;;  %v3963_v60 = vld [vmem:[#allocation2 + $0x2e] sm:$0xff] }
 0x214   : > { %v3904_v55 = vld [vmem:[#allocation2 + $0x25] sm:$0xff]  ;;  %3870 = vst.msk [vmem:[#allocation2 + $0x48] sm:$0xff] %vm3820_vm1, %v3789_v51  ;;  %v3794_v54 = vmul.f32 %v10116_v3, %v3542_v56  ;;  %v3540_v12 = vadd.f32 %v10153_v33, %v3497_v9  ;;  %v3424_v53 = vadd.f32 %v10105_v47, %v3381_v24  ;;  %v3379_v16 = vadd.f32 %v3272_v57, %v10202_v5  ;;  %v3905_v2 = vld [vmem:[#allocation2 + $0x2d] sm:$0xff]  ;;  %v10314_v9 = vpop.f32.mrf.mxu1  ;;  %v10316_v24 = vpop.permute.xlu1 %3701  ;;  %v3906_v57 = vld [vmem:[#allocation2 + $0x35] sm:$0xff] }
 0x215   : > { %v3500_v22 = vmul.f32 %v10135_v26, %v3457_v19  ;;  %v3455_v46 = vmax.f32 %v3419_v17, 0.0  ;;  %v8316_v40 = vpop.f32.mrf.mxu0  ;;  %v3996_v36 = vpack.c.bf16 %v3962_v31, %v3961_v43  ;;  %v3938_v20 = vpack.c.bf16 %v3904_v55, %v3903_v50  ;;  %v8745_v39 = vld [vmem:[%s11518_s6 + $0x30] sm:$0xff]   ;;  %v11607_v31 = vld [vmem:[#allocation15_spill] sm:$0xff]  ;;  %v11608_v55 = vld [vmem:[#allocation34_spill] sm:$0xff] }
 0x216   : > { %3875 = vst.msk [vmem:[#allocation2 + $0x70] sm:$0xff] %vm3820_vm1, %v3794_v54  ;;  %v3792_v3 = vmul.f32 %v10072_v23, %v3540_v12  ;;  %v3460_v18 = vmax.f32 %v3424_v53, 0.0  ;;  %v3422_v5 = vadd.f32 %v10105_v47, %v3379_v16  ;;  %v3382_v49 = vadd.f32 %v8316_v40, %v10213_v35  ;;  %v10324_v54 = vpop.permute.xlu0 %3706 }
 0x217   : > { %v3543_v38 = vadd.f32 %v10153_v33, %v3500_v22  ;;  %v3498_v51 = vmul.f32 %v10135_v26, %v3455_v46  ;;  %8342 = vmatmul.mubr.msk.bf16.vlgmr.msra.gmra.mxu1 %vm3820_vm1, %v3996_v36  ;;  %8382 = vmatmul.mubr.msk.bf16.vlgmr.msra.gmra.mxu0 %vm3820_vm1, %v3938_v20  ;;  %v3275_v23 = vpop.f32.mrf.mxu0  ;;  %v3997_v56 = vpack.c.bf16 %v3964_v29, %v3963_v60  ;;  %v11610_v36 = vld [vmem:[#allocation44_spill] sm:$0xff] }
 0x218   : > { %3873 = vst.msk [vmem:[#allocation2 + $0x60] sm:$0xff] %vm3820_vm1, %v3792_v3  ;;  %v3503_v35 = vmul.f32 %v10135_v26, %v3460_v18  ;;  %v3458_v30 = vmax.f32 %v3422_v5, 0.0  ;;  %v3425_v19 = vadd.f32 %v10105_v47, %v3382_v49  ;;  %v3380_v17 = vadd.f32 %v3275_v23, %v10216_v42  ;;  %8418 = vmatpush3.bf16.msra.mxu1 %v11607_v31  ;;  %v10332_v42 = vld [vmem:[%s11518_s6 + $0x48] sm:$0xff]   ;;  %v3965_v49 = vld [vmem:[#allocation2 + $0x3e] sm:$0xff] }
 0x219   : > { %8458 = vmatpush3.bf16.msra.mxu0 %v11608_v55  ;;  %v3795_v12 = vmul.f32 %v10155_v45, %v3543_v38  ;;  %v3541_v53 = vadd.f32 %v10153_v33, %v3498_v51  ;;  %8345 = vmatprep.mubr.msk.bf16.mxu1 %vm3820_vm1, %v3997_v56  ;;  %v3939_v16 = vpack.c.bf16 %v3906_v57, %v3905_v2  ;;  %v8319_v43 = vpop.f32.mrf.mxu0  ;;  %v11609_v45 = vld [vmem:[#allocation39_spill] sm:$0xff]  ;;  %v8289_v38 = vpop.f32.mrf.mxu1 }
 0x21a   : > { %8419 = vmatprep.subr.bf16.mxu1 %v8743_v11  ;;  %v3546_v50 = vadd.f32 %v10153_v33, %v3503_v35  ;;  %v3501_v60 = vmul.f32 %v10135_v26, %v3458_v30  ;;  %v3461_v22 = vmax.f32 %v3425_v19, 0.0  ;;  %v3423_v46 = vadd.f32 %v10105_v47, %v3380_v17  ;;  %8459 = vmatprep.subr.bf16.mxu0 %v8745_v39  ;;  %v3907_v56 = vld [vmem:[#allocation2 + $0x3d] sm:$0xff] }
 0x21b   : > { %v10339_v40 = vadd.f32 %v10232_v63, %v11609_v45  ;;  %v2700_v20 = vadd.f32 %v11610_v36, %v10140_v13  ;;  %3876 = vst.msk [vmem:[#allocation2 + $0x78] sm:$0xff] %vm3820_vm1, %v3795_v12  ;;  %v3793_v3 = vmul.f32 %v10110_v27, %v3541_v53  ;;  %8385 = vmatprep.mubr.msk.bf16.mxu0 %vm3820_vm1, %v3939_v16  ;;  %v3288_v5 = vpop.f32.mrf.mxu0  ;;  %v3966_v29 = vld [vmem:[#allocation2 + $0x46] sm:$0xff]  ;;  %v3967_v35 = vld [vmem:[#allocation2 + $0x4e] sm:$0xff]  ;;  %v3968_v12 = vld [vmem:[#allocation2 + $0x56] sm:$0xff] }
 0x21c   : > { %v3385_v18 = vadd.f32 %v8319_v43, %v10224_v4  ;;  %v3908_v2 = vld [vmem:[#allocation2 + $0x45] sm:$0xff]  ;;  %v3798_v51 = vmul.f32 %v10204_v8, %v3546_v50  ;;  %v3544_v63 = vadd.f32 %v10153_v33, %v3501_v60  ;;  %v3504_v23 = vmul.f32 %v10135_v26, %v3461_v22  ;;  %v3909_v30 = vld [vmem:[#allocation2 + $0x4d] sm:$0xff]  ;;  %8420 = vmatpush3.bf16.msra.mxu1 %v8743_v11  ;;  %v10354_v8 = vpop.permute.xlu1 %3711  ;;  %v3910_v53 = vld [vmem:[#allocation2 + $0x55] sm:$0xff]  ;;  %v2990_v22 = vpop.f32.mrf.mxu1 }
 0x21d   : > { %v3459_v13 = vmax.f32 %v3423_v46, 0.0  ;;  %8460 = vmatpush3.bf16.msra.mxu0 %v8745_v39  ;;  %3874 = vst.msk [vmem:[#allocation2 + $0x68] sm:$0xff] %vm3820_vm1, %v3793_v3  ;;  %v3383_v4 = vadd.f32 %v3288_v5, %v10239_v48  ;;  %v8320_v19 = vpop.f32.mrf.mxu0  ;;  %v3998_v17 = vpack.c.bf16 %v3966_v29, %v3965_v49  ;;  %v3940_v57 = vpack.c.bf16 %v3908_v2, %v3907_v56  ;;  %v10361_v48 = vpop.permute.xlu0 %3716  ;;  %v10374_v3 = vld [vmem:[%s11518_s6 + $0x58] sm:$0xff]   ;;  %v11612_v49 = vld [vmem:[#allocation43_spill] sm:$0xff] }
 0x21e   : > { %v3428_v27 = vadd.f32 %v10105_v47, %v3385_v18  ;;  %8497 = vmatprep.subr.bf16.mxu1 %v10332_v42  ;;  %3879 = vst.msk [vmem:[#allocation2 + $0x90] sm:$0xff] %vm3820_vm1, %v3798_v51  ;;  %v3796_v31 = vmul.f32 %v10167_v1, %v3544_v63  ;;  %v3547_v11 = vadd.f32 %v10153_v33, %v3504_v23  ;;  %v11611_v18 = vld [vmem:[#allocation42_spill] sm:$0xff] }
 0x21f   : > { %v3502_v39 = vmul.f32 %v10135_v26, %v3459_v13  ;;  %v3386_v55 = vadd.f32 %v8320_v19, %v10243_v59  ;;  %v3426_v43 = vadd.f32 %v10105_v47, %v3383_v4  ;;  %8346 = vmatmul.mubr.msk.bf16.gmra.mxu1 %vm3820_vm1, %v3998_v17  ;;  %8386 = vmatmul.mubr.msk.bf16.gmra.mxu0 %vm3820_vm1, %v3940_v57  ;;  %v3291_v50 = vpop.f32.mrf.mxu0  ;;  %v11613_v13 = vld [vmem:[#allocation45_spill] sm:$0xff]  ;;  %v3969_v4 = vld [vmem:[#allocation2 + $0x5e] sm:$0xff]  ;;  %v8290_v19 = vpop.f32.mrf.mxu1 }
 0x220   : > { %v3464_v16 = vmax.f32 %v3428_v27, 0.0  ;;  %v3999_v60 = vpack.c.bf16 %v3968_v12, %v3967_v35  ;;  %v3941_v1 = vpack.c.bf16 %v3910_v53, %v3909_v30  ;;  %3877 = vst.msk [vmem:[#allocation2 + $0x80] sm:$0xff] %vm3820_vm1, %v3796_v31  ;;  %v3799_v46 = vmul.f32 %v10230_v7, %v3547_v11  ;;  %8537 = vmatprep.subr.bf16.mxu0 %v10374_v3  ;;  %v10400_v17 = vpop.permute.xlu1 %3721 }
 0x221   : > { %v3545_v59 = vadd.f32 %v10153_v33, %v3502_v39  ;;  %v3429_v45 = vadd.f32 %v10105_v47, %v3386_v55  ;;  %v3384_v36 = vadd.f32 %v3291_v50, %v10253_v41  ;;  %v10378_v5 = vadd.f32 %v10260_v61, %v11611_v18  ;;  %v8323_v41 = vpop.f32.mrf.mxu0  ;;  %v10406_v39 = vpop.permute.xlu0 %3726 }
 0x222   : > { %v10382_v29 = vadd.f32 %v10292_v21, %v11612_v49  ;;  %v3507_v7 = vmul.f32 %v10135_v26, %v3464_v16  ;;  %v3462_v2 = vmax.f32 %v3426_v43, 0.0  ;;  %8349 = vmatprep.mubr.msk.bf16.mxu1 %vm3820_vm1, %v3999_v60  ;;  %8389 = vmatprep.mubr.msk.bf16.mxu0 %vm3820_vm1, %v3941_v1  ;;  %3880 = vst.msk [vmem:[#allocation2 + $0x98] sm:$0xff] %vm3820_vm1, %v3799_v46  ;;  %v10418_v49 = vpop.f32.mrf.mxu1 }
 0x223   : > { %v3797_v51 = vmul.f32 %v10190_v34, %v3545_v59  ;;  %v3465_v63 = vmax.f32 %v3429_v45, 0.0  ;;  %v3427_v61 = vadd.f32 %v10105_v47, %v3384_v36  ;;  %v3389_v23 = vadd.f32 %v8323_v41, %v10267_v58  ;;  %v3304_v27 = vpop.f32.mrf.mxu0  ;;  %v3911_v34 = vld [vmem:[#allocation2 + $0x5d] sm:$0xff] }
 0x224   : > { %v10393_v21 = vadd.f32 %v10314_v9, %v2700_v20  ;;  %v10396_v56 = vadd.f32 %v8289_v38, %v11613_v13  ;;  %v3550_v35 = vadd.f32 %v10153_v33, %v3507_v7  ;;  %v3505_v30 = vmul.f32 %v10135_v26, %v3462_v2  ;;  %v3970_v38 = vld [vmem:[#allocation2 + $0x66] sm:$0xff]  ;;  %v3971_v11 = vld [vmem:[#allocation2 + $0x6e] sm:$0xff] }
 0x225   : > { %3878 = vst.msk [vmem:[#allocation2 + $0x88] sm:$0xff] %vm3820_vm1, %v3797_v51  ;;  %v3508_v58 = vmul.f32 %v10135_v26, %v3465_v63  ;;  %v3463_v57 = vmax.f32 %v3427_v61, 0.0  ;;  %v3432_v9 = vadd.f32 %v10105_v47, %v3389_v23  ;;  %v3387_v20 = vadd.f32 %v3304_v27, %v10271_v62  ;;  %v3912_v31 = vld [vmem:[#allocation2 + $0x65] sm:$0xff]  ;;  %v8324_v53 = vpop.f32.mrf.mxu0  ;;  %v3972_v62 = vld [vmem:[#allocation2 + $0x76] sm:$0xff]  ;;  %v3913_v59 = vld [vmem:[#allocation2 + $0x6d] sm:$0xff] }
 0x226   : > { %v3802_v55 = vmul.f32 %v10289_v28, %v3550_v35  ;;  %v3548_v12 = vadd.f32 %v10153_v33, %v3505_v30  ;;  %v4000_v16 = vpack.c.bf16 %v3970_v38, %v3969_v4  ;;  %v3942_v43 = vpack.c.bf16 %v3912_v31, %v3911_v34  ;;  %v3914_v63 = vld [vmem:[#allocation2 + $0x75] sm:$0xff]  ;;  %v11615_v34 = vld [vmem:[#allocation48_spill] sm:$0xff] }
 0x227   : > { %v3551_v50 = vadd.f32 %v10153_v33, %v3508_v58  ;;  %v3506_v60 = vmul.f32 %v10135_v26, %v3463_v57  ;;  %v3468_v1 = vmax.f32 %v3432_v9, 0.0  ;;  %v3430_v46 = vadd.f32 %v10105_v47, %v3387_v20  ;;  %v3307_v36 = vpop.f32.mrf.mxu0  ;;  %v11614_v61 = vld [vmem:[#allocation46_spill] sm:$0xff]  ;;  %v10442_v9 = vpop.permute.xlu0 %3736 }
 0x228   : > { %3883 = vst.msk [vmem:[#allocation2 + $0xb0] sm:$0xff] %vm3820_vm1, %v3802_v55  ;;  %v3800_v45 = vmul.f32 %v10245_v14, %v3548_v12  ;;  %v3390_v28 = vadd.f32 %v8324_v53, %v10285_v0  ;;  %8350 = vmatmul.mubr.msk.bf16.gmra.mxu1 %vm3820_vm1, %v4000_v16  ;;  %8390 = vmatmul.mubr.msk.bf16.gmra.mxu0 %vm3820_vm1, %v3942_v43  ;;  %v8293_v55 = vpop.f32.mrf.mxu1  ;;  %v3973_v53 = vld [vmem:[#allocation2 + $0x7e] sm:$0xff] }
 0x229   : > { %v4001_v18 = vpack.c.bf16 %v3972_v62, %v3971_v11  ;;  %v3803_v7 = vmul.f32 %v10316_v24, %v3551_v50  ;;  %v3549_v2 = vadd.f32 %v10153_v33, %v3506_v60  ;;  %v3511_v41 = vmul.f32 %v10135_v26, %v3468_v1  ;;  %v8327_v35 = vpop.f32.mrf.mxu0  ;;  %v10430_v24 = vpop.permute.xlu1 %3731  ;;  %v3915_v16 = vld [vmem:[#allocation2 + $0x7d] sm:$0xff] }
 0x22a   : > { %v3466_v51 = vmax.f32 %v3430_v46, 0.0  ;;  %v10424_v14 = vadd.f32 %v2990_v22, %v11614_v61  ;;  %3881 = vst.msk [vmem:[#allocation2 + $0xa0] sm:$0xff] %vm3820_vm1, %v3800_v45  ;;  %v3433_v0 = vadd.f32 %v10105_v47, %v3390_v28  ;;  %v3388_v23 = vadd.f32 %v3307_v36, %v10287_v25  ;;  %v11616_v25 = vld [vmem:[#allocation47_spill] sm:$0xff]  ;;  %v3976_v36 = vld [vmem:[#allocation2 + $0x96] sm:$0xff] }
 0x22b   : > { %8353 = vmatprep.mubr.msk.bf16.mxu1 %vm3820_vm1, %v4001_v18  ;;  %v3943_v13 = vpack.c.bf16 %v3914_v63, %v3913_v59  ;;  %3884 = vst.msk [vmem:[#allocation2 + $0xb8] sm:$0xff] %vm3820_vm1, %v3803_v7  ;;  %v3801_v30 = vmul.f32 %v10276_v10, %v3549_v2  ;;  %v3554_v27 = vadd.f32 %v10153_v33, %v3511_v41  ;;  %v3320_v10 = vpop.f32.mrf.mxu0 }
 0x22c   : > { %v3509_v22 = vmul.f32 %v10135_v26, %v3466_v51  ;;  %v3393_v4 = vadd.f32 %v8327_v35, %v10339_v40  ;;  %v2704_v58 = vadd.f32 %v11615_v34, %v10143_v32  ;;  %v10440_v57 = vadd.f32 %v8290_v19, %v11616_v25  ;;  %v3974_v31 = vld [vmem:[#allocation2 + $0x86] sm:$0xff]  ;;  %v3975_v43 = vld [vmem:[#allocation2 + $0x8e] sm:$0xff]  ;;  %v10460_v51 = vpop.f32.mrf.mxu1  ;;  %v10467_v35 = vpop.permute.xlu0 %3746 }
 0x22d   : > { %v3469_v20 = vmax.f32 %v3433_v0, 0.0  ;;  %v3431_v38 = vadd.f32 %v10105_v47, %v3388_v23  ;;  %8393 = vmatprep.mubr.msk.bf16.mxu0 %vm3820_vm1, %v3943_v13  ;;  %v3916_v11 = vld [vmem:[#allocation2 + $0x85] sm:$0xff]  ;;  %3882 = vst.msk [vmem:[#allocation2 + $0xa8] sm:$0xff] %vm3820_vm1, %v3801_v30  ;;  %v3806_v40 = vmul.f32 %v10361_v48, %v3554_v27  ;;  %v3391_v12 = vadd.f32 %v3320_v10, %v10378_v5  ;;  %v8328_v1 = vpop.f32.mrf.mxu0  ;;  %v3917_v5 = vld [vmem:[#allocation2 + $0x8d] sm:$0xff]  ;;  %v3918_v23 = vld [vmem:[#allocation2 + $0x95] sm:$0xff] }
 0x22e   : > { %v3552_v32 = vadd.f32 %v10153_v33, %v3509_v22  ;;  %v3436_v19 = vadd.f32 %v10105_v47, %v3393_v4  ;;  %v4002_v46 = vpack.c.bf16 %v3974_v31, %v3973_v53  ;;  %v3944_v62 = vpack.c.bf16 %v3916_v11, %v3915_v16 }
 0x22f   : > { %v3512_v50 = vmul.f32 %v10135_v26, %v3469_v20  ;;  %v3467_v60 = vmax.f32 %v3431_v38, 0.0  ;;  %3887 = vst.msk [vmem:[#allocation2 + $0xd0] sm:$0xff] %vm3820_vm1, %v3806_v40  ;;  %v3434_v45 = vadd.f32 %v10105_v47, %v3391_v12  ;;  %v3394_v28 = vadd.f32 %v8328_v1, %v10382_v29  ;;  %v3323_v2 = vpop.f32.mrf.mxu0 }
 0x230   : > { %v3804_v59 = vmul.f32 %v10324_v54, %v3552_v32  ;;  %v3472_v48 = vmax.f32 %v3436_v19, 0.0  ;;  %8354 = vmatmul.mubr.msk.bf16.gmra.mxu1 %vm3820_vm1, %v4002_v46  ;;  %8394 = vmatmul.mubr.msk.bf16.gmra.mxu0 %vm3820_vm1, %v3944_v62  ;;  %v4003_v41 = vpack.c.bf16 %v3976_v36, %v3975_v43  ;;  %v3742_v54 = vpop.permute.xlu1 %3741  ;;  %v3392_v0 = vadd.f32 %v3323_v2, %v10393_v21  ;;  %v8294_v32 = vpop.f32.mrf.mxu1 }
 0x231   : > { %v3555_v18 = vadd.f32 %v10153_v33, %v3512_v50  ;;  %v3510_v7 = vmul.f32 %v10135_v26, %v3467_v60  ;;  %v3470_v29 = vmax.f32 %v3434_v45, 0.0  ;;  %v3437_v61 = vadd.f32 %v10105_v47, %v3394_v28  ;;  %v8331_v4 = vpop.f32.mrf.mxu0  ;;  %v3977_v31 = vld [vmem:[#allocation2 + $0x9e] sm:$0xff]  ;;  %v3757_v45 = vpop.permute.xlu0 %3756 }
 0x232   : > { %3885 = vst.msk [vmem:[#allocation2 + $0xc0] sm:$0xff] %vm3820_vm1, %v3804_v59  ;;  %v3515_v63 = vmul.f32 %v10135_v26, %v3472_v48  ;;  %v3050_v13 = vadd.f32 %v10418_v49, %v2704_v58  ;;  %8357 = vmatprep.mubr.msk.bf16.mxu1 %vm3820_vm1, %v4003_v41  ;;  %v3945_v22 = vpack.c.bf16 %v3918_v23, %v3917_v5  ;;  %v3980_v59 = vld [vmem:[#allocation2 + $0xb6] sm:$0xff] }
 0x233   : > { %v3807_v30 = vmul.f32 %v10400_v17, %v3555_v18  ;;  %v3553_v27 = vadd.f32 %v10153_v33, %v3510_v7  ;;  %v3513_v25 = vmul.f32 %v10135_v26, %v3470_v29  ;;  %v3473_v20 = vmax.f32 %v3437_v61, 0.0  ;;  %v3336_v10 = vpop.f32.mrf.mxu0  ;;  %v3922_v48 = vld [vmem:[#allocation2 + $0xb5] sm:$0xff] }
 0x234   : > { %v3558_v34 = vadd.f32 %v10153_v33, %v3515_v63  ;;  %v3435_v21 = vadd.f32 %v10105_v47, %v3392_v0  ;;  %v3055_v38 = vadd.f32 %v8293_v55, %v10057_v15  ;;  %v2708_v49 = vadd.f32 %v10088_v37, %v10146_v44  ;;  %8397 = vmatprep.mubr.msk.bf16.mxu0 %vm3820_vm1, %v3945_v22  ;;  %v3978_v11 = vld [vmem:[#allocation2 + $0xa6] sm:$0xff]  ;;  %v3919_v44 = vld [vmem:[#allocation2 + $0x9d] sm:$0xff]  ;;  %v3979_v12 = vld [vmem:[#allocation2 + $0xae] sm:$0xff]  ;;  %v10488_v60 = vpop.permute.xlu1 %3751 }
 0x235   : > { %3888 = vst.msk [vmem:[#allocation2 + $0xd8] sm:$0xff] %vm3820_vm1, %v3807_v30  ;;  %v3805_v17 = vmul.f32 %v10354_v8, %v3553_v27  ;;  %v3397_v58 = vadd.f32 %v8331_v4, %v10396_v56  ;;  %v3920_v40 = vld [vmem:[#allocation2 + $0xa5] sm:$0xff]  ;;  %v3556_v15 = vadd.f32 %v10153_v33, %v3513_v25  ;;  %v3516_v55 = vmul.f32 %v10135_v26, %v3473_v20  ;;  %v3921_v53 = vld [vmem:[#allocation2 + $0xad] sm:$0xff]  ;;  %v8332_v16 = vpop.f32.mrf.mxu0 }
 0x236   : > { %v3810_v19 = vmul.f32 %v10442_v9, %v3558_v34  ;;  %v3471_v37 = vmax.f32 %v3435_v21, 0.0  ;;  %v3395_v56 = vadd.f32 %v3336_v10, %v10424_v14  ;;  %v4004_v43 = vpack.c.bf16 %v3978_v11, %v3977_v31 }
 0x237   : > { %3886 = vst.msk [vmem:[#allocation2 + $0xc8] sm:$0xff] %vm3820_vm1, %v3805_v17  ;;  %v3440_v8 = vadd.f32 %v10105_v47, %v3397_v58  ;;  %v3946_v50 = vpack.c.bf16 %v3920_v40, %v3919_v44  ;;  %v3808_v9 = vmul.f32 %v10406_v39, %v3556_v15  ;;  %v3559_v1 = vadd.f32 %v10153_v33, %v3516_v55  ;;  %v3339_v36 = vpop.f32.mrf.mxu0  ;;  %v3009_v39 = vpop.f32.mrf.mxu1 }
 0x238   : > { %3891 = vst.msk [vmem:[#allocation2 + $0xf0] sm:$0xff] %vm3820_vm1, %v3810_v19  ;;  %v3514_v46 = vmul.f32 %v10135_v26, %v3471_v37  ;;  %v3398_v62 = vadd.f32 %v8332_v16, %v10440_v57  ;;  %v3438_v14 = vadd.f32 %v10105_v47, %v3395_v56  ;;  %8358 = vmatmul.mubr.msk.bf16.gmra.mxu1 %vm3820_vm1, %v4004_v43  ;;  %v3762_v20 = vpop.permute.xlu1 %3761 }
 0x239   : > { %v3476_v28 = vmax.f32 %v3440_v8, 0.0  ;;  %8398 = vmatmul.mubr.msk.bf16.gmra.mxu0 %vm3820_vm1, %v3946_v50  ;;  %v4005_v5 = vpack.c.bf16 %v3980_v59, %v3979_v12  ;;  %v3947_v18 = vpack.c.bf16 %v3922_v48, %v3921_v53  ;;  %3889 = vst.msk [vmem:[#allocation2 + $0xe0] sm:$0xff] %vm3820_vm1, %v3808_v9  ;;  %v3811_v7 = vmul.f32 %v3742_v54, %v3559_v1  ;;  %v8335_v0 = vpop.f32.mrf.mxu0  ;;  %v3981_v34 = vld [vmem:[#allocation2 + $0xbe] sm:$0xff] }
 0x23a   : > { %v3557_v2 = vadd.f32 %v10153_v33, %v3514_v46  ;;  %v3441_v57 = vadd.f32 %v10105_v47, %v3398_v62  ;;  %v3396_v41 = vadd.f32 %v3339_v36, %v3050_v13  ;;  %v3053_v63 = vadd.f32 %v10460_v51, %v10067_v6  ;;  %v3923_v25 = vld [vmem:[#allocation2 + $0xbd] sm:$0xff] }
 0x23b   : > { %v3519_v29 = vmul.f32 %v10135_v26, %v3476_v28  ;;  %v3474_v61 = vmax.f32 %v3438_v14, 0.0  ;;  %8361 = vmatprep.mubr.msk.bf16.mxu1 %vm3820_vm1, %v4005_v5  ;;  %8401 = vmatprep.mubr.msk.bf16.mxu0 %vm3820_vm1, %v3947_v18  ;;  %3892 = vst.msk [vmem:[#allocation2 + $0xf8] sm:$0xff] %vm3820_vm1, %v3811_v7  ;;  %v3401_v27 = vadd.f32 %v8335_v0, %v3055_v38  ;;  %v3352_v4 = vpop.f32.mrf.mxu0 }
 0x23c   : > { %v3809_v54 = vmul.f32 %v10430_v24, %v3557_v2  ;;  %v3477_v23 = vmax.f32 %v3441_v57, 0.0  ;;  %v3439_v30 = vadd.f32 %v10105_v47, %v3396_v41  ;;  %v3056_v13 = vadd.f32 %v8294_v32, %v10079_v52  ;;  %v3984_v12 = vld [vmem:[#allocation2 + $0xd6] sm:$0xff] }
 0x23d   : > { %v3054_v22 = vadd.f32 %v3009_v39, %v2708_v49  ;;  %v3562_v6 = vadd.f32 %v10153_v33, %v3519_v29  ;;  %v3517_v51 = vmul.f32 %v10135_v26, %v3474_v61  ;;  %v3444_v17 = vadd.f32 %v10105_v47, %v3401_v27  ;;  %v3767_v49 = vpop.permute.xlu0 %3766  ;;  %v8336_v40 = vpop.f32.mrf.mxu0  ;;  %v3926_v62 = vld [vmem:[#allocation2 + $0xd5] sm:$0xff] }
 0x23e   : > { %3890 = vst.msk [vmem:[#allocation2 + $0xe8] sm:$0xff] %vm3820_vm1, %v3809_v54  ;;  %v3520_v21 = vmul.f32 %v10135_v26, %v3477_v23  ;;  %v3475_v24 = vmax.f32 %v3439_v30, 0.0  ;;  %v3399_v58 = vadd.f32 %v3352_v4, %v3053_v63  ;;  %v3982_v38 = vld [vmem:[#allocation2 + $0xc6] sm:$0xff]  ;;  %v3983_v52 = vld [vmem:[#allocation2 + $0xce] sm:$0xff]  ;;  %v3402_v56 = vadd.f32 %v8336_v40, %v3056_v13 }
 0x23f   : > { %v3924_v10 = vld [vmem:[#allocation2 + $0xc5] sm:$0xff]  ;;  %v3814_v31 = vmul.f32 %v3757_v45, %v3562_v6  ;;  %v3560_v11 = vadd.f32 %v10153_v33, %v3517_v51  ;;  %v4006_v32 = vpack.c.bf16 %v3982_v38, %v3981_v34  ;;  %v3480_v37 = vmax.f32 %v3444_v17, 0.0  ;;  %v3925_v53 = vld [vmem:[#allocation2 + $0xcd] sm:$0xff]  ;;  %v3355_v16 = vpop.f32.mrf.mxu0  ;;  %v3772_v45 = vpop.permute.xlu1 %3771 }
 0x240   : > { %v3948_v19 = vpack.c.bf16 %v3924_v10, %v3923_v25  ;;  %v3563_v15 = vadd.f32 %v10153_v33, %v3520_v21  ;;  %v3518_v55 = vmul.f32 %v10135_v26, %v3475_v24  ;;  %v3442_v44 = vadd.f32 %v10105_v47, %v3399_v58  ;;  %v3985_v5 = vld [vmem:[#allocation2 + $0xde] sm:$0xff] }
 0x241   : > { %3895 = vst.msk [vmem:[#allocation2 + $0x110] sm:$0xff] %vm3820_vm1, %v3814_v31  ;;  %v3812_v8 = vmul.f32 %v10467_v35, %v3560_v11  ;;  %8362 = vmatmul.mubr.msk.bf16.gmra.mxu1 %vm3820_vm1, %v4006_v32  ;;  %v4007_v43 = vpack.c.bf16 %v3984_v12, %v3983_v52  ;;  %v3523_v1 = vmul.f32 %v10135_v26, %v3480_v37  ;;  %v3927_v18 = vld [vmem:[#allocation2 + $0xdd] sm:$0xff]  ;;  %v3777_v39 = vpop.permute.xlu0 %3776 }
 0x242   : > { %8402 = vmatmul.mubr.msk.bf16.gmra.mxu0 %vm3820_vm1, %v3948_v19  ;;  %v3815_v50 = vmul.f32 %v3762_v20, %v3563_v15  ;;  %v3561_v9 = vadd.f32 %v10153_v33, %v3518_v55  ;;  %v3478_v46 = vmax.f32 %v3442_v44, 0.0  ;;  %v3445_v59 = vadd.f32 %v10105_v47, %v3402_v56  ;;  %v3988_v54 = vld [vmem:[#allocation2 + $0xf6] sm:$0xff]  ;;  %v4843_v55 = vld [vmem:[#allocation2 + $0x27] sm:$0xff] }
 0x243   : > { %3893 = vst.msk [vmem:[#allocation2 + $0x100] sm:$0xff] %vm3820_vm1, %v3812_v8  ;;  %v3400_v48 = vadd.f32 %v3355_v16, %v3054_v22  ;;  %8365 = vmatprep.mubr.msk.bf16.mxu1 %vm3820_vm1, %v4007_v43  ;;  %v3949_v35 = vpack.c.bf16 %v3926_v62, %v3925_v53  ;;  %v3566_v14 = vadd.f32 %v10153_v33, %v3523_v1  ;;  %v3930_v30 = vld [vmem:[#allocation2 + $0xf5] sm:$0xff]  ;;  %v3782_v34 = vpop.permute.xlu1 %3781  ;;  %v4842_v16 = vld [vmem:[#allocation2 + $0x1f] sm:$0xff] }
 0x244   : > { %3896 = vst.msk [vmem:[#allocation2 + $0x118] sm:$0xff] %vm3820_vm1, %v3815_v50  ;;  %v3813_v28 = vmul.f32 %v10488_v60, %v3561_v9  ;;  %v3521_v36 = vmul.f32 %v10135_v26, %v3478_v46  ;;  %v3481_v7 = vmax.f32 %v3445_v59, 0.0  ;;  %v4505_v19 = vld [vmem:[#allocation2 + $0x17] sm:$0xff]  ;;  %v4878_v43 = vpack.c.bf16 %v4843_v55, %v4842_v16  ;;  %v4844_v50 = vld [vmem:[#allocation2 + $0x2f] sm:$0xff]  ;;  %v4847_v9 = vld [vmem:[#allocation2 + $0x47] sm:$0xff] }
 0x245   : > { %v3443_v2 = vadd.f32 %v10105_v47, %v3400_v48  ;;  %8405 = vmatprep.mubr.msk.bf16.mxu0 %vm3820_vm1, %v3949_v35  ;;  %v3986_v57 = vld [vmem:[#allocation2 + $0xe6] sm:$0xff]  ;;  %v3987_v63 = vld [vmem:[#allocation2 + $0xee] sm:$0xff]  ;;  %v3818_v29 = vmul.f32 %v3777_v39, %v3566_v14  ;;  %v4845_v1 = vld [vmem:[#allocation2 + $0x37] sm:$0xff] }
 0x246   : > { %v3928_v41 = vld [vmem:[#allocation2 + $0xe5] sm:$0xff]  ;;  %3894 = vst.msk [vmem:[#allocation2 + $0x108] sm:$0xff] %vm3820_vm1, %v3813_v28  ;;  %v3564_v60 = vadd.f32 %v10153_v33, %v3521_v36  ;;  %v4008_v61 = vpack.c.bf16 %v3986_v57, %v3985_v5  ;;  %v3929_v23 = vld [vmem:[#allocation2 + $0xed] sm:$0xff]  ;;  %v3524_v27 = vmul.f32 %v10135_v26, %v3481_v7  ;;  %v4009_v22 = vpack.c.bf16 %v3988_v54, %v3987_v63  ;;  %v4849_v36 = vld [vmem:[#allocation2 + $0x57] sm:$0xff] }
 0x247   : > { %v3950_v0 = vpack.c.bf16 %v3928_v41, %v3927_v18  ;;  %v3479_v13 = vmax.f32 %v3443_v2, 0.0  ;;  %v3951_v47 = vpack.c.bf16 %v3930_v30, %v3929_v23  ;;  %3899 = vst.msk [vmem:[#allocation2 + $0x130] sm:$0xff] %vm3820_vm1, %v3818_v29  ;;  %v4879_v46 = vpack.c.bf16 %v4845_v1, %v4844_v50  ;;  %v4846_v62 = vld [vmem:[#allocation2 + $0x3f] sm:$0xff]  ;;  %v8749_v35 = vld [vmem:[%s11518_s6 + $0x50] sm:$0xff]   ;;  %v10571_v28 = vld [vmem:[%s11518_s6 + $0x68] sm:$0xff]  }
 0x248   : > { %v3816_v6 = vmul.f32 %v3767_v49, %v3564_v60  ;;  %v3567_v51 = vadd.f32 %v10153_v33, %v3524_v27  ;;  %v4880_v59 = vpack.c.bf16 %v4847_v9, %v4846_v62  ;;  %v8747_v48 = vld [vmem:[%s11518_s6 + $0x40] sm:$0xff]   ;;  %v4853_v2 = vld [vmem:[#allocation2 + $0x77] sm:$0xff]  ;;  %v4856_v29 = vld [vmem:[#allocation2 + $0x8f] sm:$0xff] }
 0x249   : > { %v3522_v4 = vmul.f32 %v10135_v26, %v3479_v13  ;;  %8366 = vmatmul.mubr.msk.bf16.gmra.mxu1 %vm3820_vm1, %v4008_v61  ;;  %v4851_v14 = vld [vmem:[#allocation2 + $0x67] sm:$0xff]  ;;  %v4850_v18 = vld [vmem:[#allocation2 + $0x5f] sm:$0xff]  ;;  %v4857_v61 = vld [vmem:[#allocation2 + $0x97] sm:$0xff] }
 0x24a   : > { %8406 = vmatmul.mubr.msk.bf16.gmra.mxu0 %vm3820_vm1, %v3950_v0  ;;  %3897 = vst.msk [vmem:[#allocation2 + $0x120] sm:$0xff] %vm3820_vm1, %v3816_v6  ;;  %8369 = vmatprep.mubr.msk.bf16.mxu1 %vm3820_vm1, %v4009_v22  ;;  %v3819_v25 = vmul.f32 %v3782_v34, %v3567_v51  ;;  %v3989_v21 = vld [vmem:[#allocation2 + $0xfe] sm:$0xff]  ;;  %v4882_v39 = vpack.c.bf16 %v4851_v14, %v4850_v18  ;;  %v4855_v7 = vld [vmem:[#allocation2 + $0x87] sm:$0xff]  ;;  %v4860_v30 = vld [vmem:[#allocation2 + $0xaf] sm:$0xff] }
 0x24b   : > { %8409 = vmatprep.mubr.msk.bf16.mxu0 %vm3820_vm1, %v3951_v47  ;;  %v3565_v20 = vadd.f32 %v10153_v33, %v3522_v4  ;;  %v3931_v24 = vld [vmem:[#allocation2 + $0xfd] sm:$0xff]  ;;  %v3934_v40 = vld [vmem:[#allocation2 + $0x115] sm:$0xff]  ;;  %v4859_v60 = vld [vmem:[#allocation2 + $0xa7] sm:$0xff]  ;;  %v4885_v0 = vpack.c.bf16 %v4857_v61, %v4856_v29 }
 0x24c   : > { %v3992_v17 = vld [vmem:[#allocation2 + $0x116] sm:$0xff]  ;;  %3900 = vst.msk [vmem:[#allocation2 + $0x138] sm:$0xff] %vm3820_vm1, %v3819_v25  ;;  %v4854_v41 = vld [vmem:[#allocation2 + $0x7f] sm:$0xff]  ;;  %v4863_v27 = vld [vmem:[#allocation2 + $0xc7] sm:$0xff] }
 0x24d   : > { %v3817_v26 = vmul.f32 %v3772_v45, %v3565_v20  ;;  %v3990_v58 = vld [vmem:[#allocation2 + $0x106] sm:$0xff]  ;;  %v3991_v10 = vld [vmem:[#allocation2 + $0x10e] sm:$0xff]  ;;  %v4884_v63 = vpack.c.bf16 %v4855_v7, %v4854_v41  ;;  %v4861_v13 = vld [vmem:[#allocation2 + $0xb7] sm:$0xff] }
 0x24e   : > { %v3932_v38 = vld [vmem:[#allocation2 + $0x105] sm:$0xff]  ;;  %v4010_v52 = vpack.c.bf16 %v3990_v58, %v3989_v21  ;;  %v4011_v31 = vpack.c.bf16 %v3992_v17, %v3991_v10  ;;  %v3933_v11 = vld [vmem:[#allocation2 + $0x10d] sm:$0xff]  ;;  %v4887_v22 = vpack.c.bf16 %v4861_v13, %v4860_v30  ;;  %v4865_v34 = vld [vmem:[#allocation2 + $0xd7] sm:$0xff] }
 0x24f   : > { %v3952_v49 = vpack.c.bf16 %v3932_v38, %v3931_v24  ;;  %3898 = vst.msk [vmem:[#allocation2 + $0x128] sm:$0xff] %vm3820_vm1, %v3817_v26  ;;  %v3953_v32 = vpack.c.bf16 %v3934_v40, %v3933_v11  ;;  %v4504_v33 = vld [vmem:[#allocation2 + $0xf] sm:$0xff]  ;;  %v4858_v54 = vld [vmem:[#allocation2 + $0x9f] sm:$0xff]  ;;  %v4867_v4 = vld [vmem:[#allocation2 + $0xe7] sm:$0xff] }
 0x250   : > { %v4540_v53 = vpack.c.bf16 %v4505_v19, %v4504_v33  ;;  %v4848_v45 = vld [vmem:[#allocation2 + $0x4f] sm:$0xff]  ;;  %v4886_v23 = vpack.c.bf16 %v4859_v60, %v4858_v54  ;;  %v4862_v47 = vld [vmem:[#allocation2 + $0xbf] sm:$0xff]  ;;  %v4871_v17 = vld [vmem:[#allocation2 + $0x107] sm:$0xff] }
 0x251   : > { %8370 = vmatmul.mubr.msk.bf16.gmra.mxu1 %vm3820_vm1, %v4010_v52  ;;  %v3993_v15 = vld [vmem:[#allocation2 + $0x11e] sm:$0xff]  ;;  %v4881_v5 = vpack.c.bf16 %v4849_v36, %v4848_v45  ;;  %v4888_v6 = vpack.c.bf16 %v4863_v27, %v4862_v47  ;;  %v4864_v51 = vld [vmem:[#allocation2 + $0xcf] sm:$0xff] }
 0x252   : > { %8410 = vmatmul.mubr.msk.bf16.gmra.mxu0 %vm3820_vm1, %v3952_v49  ;;  %8373 = vmatprep.mubr.msk.bf16.mxu1 %vm3820_vm1, %v4011_v31  ;;  %v3935_v44 = vld [vmem:[#allocation2 + $0x11d] sm:$0xff]  ;;  %v4889_v25 = vpack.c.bf16 %v4865_v34, %v4864_v51  ;;  %v4868_v24 = vld [vmem:[#allocation2 + $0xef] sm:$0xff] }
 0x253   : > { %8413 = vmatprep.mubr.msk.bf16.mxu0 %vm3820_vm1, %v3953_v32  ;;  %v4866_v20 = vld [vmem:[#allocation2 + $0xdf] sm:$0xff]  ;;  %v4869_v26 = vld [vmem:[#allocation2 + $0xf7] sm:$0xff]  ;;  %v4872_v52 = vld [vmem:[#allocation2 + $0x10f] sm:$0xff] }
 0x254   : > { %v4890_v21 = vpack.c.bf16 %v4867_v4, %v4866_v20  ;;  %v4891_v58 = vpack.c.bf16 %v4869_v26, %v4868_v24  ;;  %v4870_v38 = vld [vmem:[#allocation2 + $0xff] sm:$0xff]  ;;  %v4873_v31 = vld [vmem:[#allocation2 + $0x117] sm:$0xff]  ;;  %v5181_v19 = vld [vmem:[#allocation2 + $0x28] sm:$0xff] }
 0x255   : > { %v4892_v10 = vpack.c.bf16 %v4871_v17, %v4870_v38  ;;  %v4893_v11 = vpack.c.bf16 %v4873_v31, %v4872_v52  ;;  %v4874_v40 = vld [vmem:[#allocation2 + $0x11f] sm:$0xff]  ;;  %v5519_v55 = vld [vmem:[#allocation2 + $0x29] sm:$0xff]  ;;  %v5524_v41 = vld [vmem:[#allocation2 + $0x51] sm:$0xff] }
 0x256   : > { %v3994_v37 = vld [vmem:[#allocation2 + $0x126] sm:$0xff]  ;;  %v4876_v33 = vld [vmem:[#allocation2 + $0x12f] sm:$0xff]  ;;  %v5521_v16 = vld [vmem:[#allocation2 + $0x39] sm:$0xff] }
 0x257   : > { %v3936_v12 = vld [vmem:[#allocation2 + $0x125] sm:$0xff]  ;;  %v4012_v8 = vpack.c.bf16 %v3994_v37, %v3993_v15  ;;  %v4877_v37 = vld [vmem:[#allocation2 + $0x137] sm:$0xff] }
 0x258   : > { %v3954_v56 = vpack.c.bf16 %v3936_v12, %v3935_v44  ;;  %v4875_v49 = vld [vmem:[#allocation2 + $0x127] sm:$0xff]  ;;  %v4895_v44 = vpack.c.bf16 %v4877_v37, %v4876_v33  ;;  %v5182_v1 = vld [vmem:[#allocation2 + $0x30] sm:$0xff]  ;;  %v5525_v18 = vld [vmem:[#allocation2 + $0x59] sm:$0xff] }
 0x259   : > { %8374 = vmatmul.mubr.msk.bf16.gmra.mxu1 %vm3820_vm1, %v4012_v8  ;;  %v4894_v32 = vpack.c.bf16 %v4875_v49, %v4874_v40  ;;  %v5518_v15 = vld [vmem:[#allocation2 + $0x21] sm:$0xff]  ;;  %v5523_v9 = vld [vmem:[#allocation2 + $0x49] sm:$0xff]  ;;  %v10635_v29 = vpack.c.bf16 %v5525_v18, %v5524_v41  ;;  %v5191_v61 = vld [vmem:[#allocation2 + $0x78] sm:$0xff] }
 0x25a   : > { %8414 = vmatmul.mubr.msk.bf16.gmra.mxu0 %vm3820_vm1, %v3954_v56  ;;  %8421 = vmatprep.mubr.msk.bf16.mxu1 %vm3820_vm1, %v4540_v53  ;;  %v5180_v12 = vld [vmem:[#allocation2 + $0x20] sm:$0xff]  ;;  %v5554_v8 = vpack.c.bf16 %v5519_v55, %v5518_v15  ;;  %v5183_v56 = vld [vmem:[#allocation2 + $0x38] sm:$0xff]  ;;  %v8753_v36 = vld [vmem:[%s11518_s6 + $0x70] sm:$0xff]  }
 0x25b   : > { %8461 = vmatprep.mubr.msk.bf16.mxu0 %vm3820_vm1, %v4878_v43  ;;  %v5216_v53 = vpack.c.bf16 %v5181_v19, %v5180_v12  ;;  %v5522_v50 = vld [vmem:[#allocation2 + $0x41] sm:$0xff]  ;;  %v5217_v62 = vpack.c.bf16 %v5183_v56, %v5182_v1  ;;  %v5531_v30 = vld [vmem:[#allocation2 + $0x89] sm:$0xff]  ;;  %v5528_v13 = vld [vmem:[#allocation2 + $0x71] sm:$0xff] }
 0x25c   : > { %v10614_v45 = vpack.c.bf16 %v5523_v9, %v5522_v50  ;;  %v8751_v14 = vld [vmem:[%s11518_s6 + $0x60] sm:$0xff]   ;;  %v5193_v54 = vld [vmem:[#allocation2 + $0x88] sm:$0xff]  ;;  %v5190_v27 = vld [vmem:[#allocation2 + $0x70] sm:$0xff] }
 0x25d   : > { %v5526_v7 = vld [vmem:[#allocation2 + $0x61] sm:$0xff]  ;;  %v5195_v34 = vld [vmem:[#allocation2 + $0x98] sm:$0xff]  ;;  %v5535_v24 = vld [vmem:[#allocation2 + $0xa9] sm:$0xff] }
 0x25e   : > { %v5197_v20 = vld [vmem:[#allocation2 + $0xa8] sm:$0xff]  ;;  %v5194_v17 = vld [vmem:[#allocation2 + $0x90] sm:$0xff]  ;;  %v5199_v31 = vld [vmem:[#allocation2 + $0xb8] sm:$0xff] }
 0x25f   : > { %v5532_v26 = vld [vmem:[#allocation2 + $0x91] sm:$0xff]  ;;  %v5201_v40 = vld [vmem:[#allocation2 + $0xc8] sm:$0xff]  ;;  %v5541_v56 = vld [vmem:[#allocation2 + $0xd9] sm:$0xff] }
 0x260   : > { %v5539_v33 = vld [vmem:[#allocation2 + $0xc9] sm:$0xff]  ;;  %v5536_v15 = vld [vmem:[#allocation2 + $0xb1] sm:$0xff] }
 0x261   : > { %8422 = vmatmul.mubr.msk.bf16.vlgmr.msra.gmra.mxu1 %vm3820_vm1, %v4878_v43  ;;  %v5185_v43 = vld [vmem:[#allocation2 + $0x48] sm:$0xff]  ;;  %v5198_v19 = vld [vmem:[#allocation2 + $0xb0] sm:$0xff] }
 0x262   : > { %8462 = vmatmul.mubr.msk.bf16.vlgmr.msra.gmra.mxu0 %vm3820_vm1, %v4879_v46  ;;  %8425 = vmatprep.mubr.msk.bf16.mxu1 %vm3820_vm1, %v4879_v46  ;;  %v5520_v46 = vld [vmem:[#allocation2 + $0x31] sm:$0xff]  ;;  %v5225_v55 = vpack.c.bf16 %v5199_v31, %v5198_v19  ;;  %v5543_v50 = vld [vmem:[#allocation2 + $0xe9] sm:$0xff] }
 0x263   : > { %8465 = vmatprep.mubr.msk.bf16.mxu0 %vm3820_vm1, %v4880_v59  ;;  %8498 = vmatpush3.bf16.msra.mxu1 %v10332_v42  ;;  %v10581_v42 = vld [vmem:[%s11518_s6 + $0x78] sm:$0xff]   ;;  %v5202_v9 = vld [vmem:[#allocation2 + $0xd0] sm:$0xff]  ;;  %v5209_v18 = vld [vmem:[#allocation2 + $0x108] sm:$0xff] }
 0x264   : > { %8538 = vmatpush3.bf16.msra.mxu0 %v10374_v3  ;;  %8499 = vmatprep.subr.bf16.mxu1 %v8747_v48  ;;  %v4852_v3 = vld [vmem:[#allocation2 + $0x6f] sm:$0xff] }
 0x265   : > { %8539 = vmatprep.subr.bf16.mxu0 %v8749_v35  ;;  %v4883_v57 = vpack.c.bf16 %v4853_v2, %v4852_v3  ;;  %v5189_v3 = vld [vmem:[#allocation2 + $0x68] sm:$0xff]  ;;  %v5540_v1 = vld [vmem:[#allocation2 + $0xd1] sm:$0xff] }
 0x266   : > { %v5527_v2 = vld [vmem:[#allocation2 + $0x69] sm:$0xff] }
 0x267   : > { %8500 = vmatpush3.bf16.msra.mxu1 %v8747_v48  ;;  %v5184_v48 = vld [vmem:[#allocation2 + $0x40] sm:$0xff]  ;;  %v10637_v60 = vpack.c.bf16 %v5527_v2, %v5526_v7  ;;  %v5547_v7 = vld [vmem:[#allocation2 + $0x109] sm:$0xff] }
 0x268   : > { %8540 = vmatpush3.bf16.msra.mxu0 %v8749_v35  ;;  %8577 = vmatprep.subr.bf16.mxu1 %v10571_v28  ;;  %v5218_v35 = vpack.c.bf16 %v5185_v43, %v5184_v48  ;;  %v5542_v43 = vld [vmem:[#allocation2 + $0xe1] sm:$0xff]  ;;  %v5206_v2 = vld [vmem:[#allocation2 + $0xf0] sm:$0xff] }
 0x269   : > { %8426 = vmatmul.mubr.msk.bf16.gmra.mxu1 %vm3820_vm1, %v4880_v59  ;;  %8617 = vmatprep.subr.bf16.mxu0 %v10581_v42  ;;  %v10612_v59 = vpack.c.bf16 %v5521_v16, %v5520_v46  ;;  %v5205_v16 = vld [vmem:[#allocation2 + $0xe8] sm:$0xff]  ;;  %v5204_v48 = vld [vmem:[#allocation2 + $0xe0] sm:$0xff] }
 0x26a   : > { %8466 = vmatmul.mubr.msk.bf16.gmra.mxu0 %vm3820_vm1, %v4881_v5  ;;  %8429 = vmatprep.mubr.msk.bf16.mxu1 %vm3820_vm1, %v4881_v5  ;;  %v5187_v5 = vld [vmem:[#allocation2 + $0x58] sm:$0xff] }
 0x26b   : > { %8469 = vmatprep.mubr.msk.bf16.mxu0 %vm3820_vm1, %v4882_v39 }
 0x271   : > { %8430 = vmatmul.mubr.msk.bf16.gmra.mxu1 %vm3820_vm1, %v4882_v39  ;;  %v10633_v39 = vld [vmem:[%s11518_s6 + $0x88] sm:$0xff]  }
 0x272   : > { %8470 = vmatmul.mubr.msk.bf16.gmra.mxu0 %vm3820_vm1, %v4883_v57  ;;  %8433 = vmatprep.mubr.msk.bf16.mxu1 %vm3820_vm1, %v4883_v57  ;;  %v5186_v57 = vld [vmem:[#allocation2 + $0x50] sm:$0xff] }
 0x273   : > { %8473 = vmatprep.mubr.msk.bf16.mxu0 %vm3820_vm1, %v4884_v63 }
 0x279   : > { %8434 = vmatmul.mubr.msk.bf16.gmra.mxu1 %vm3820_vm1, %v4884_v63  ;;  %v5219_v63 = vpack.c.bf16 %v5187_v5, %v5186_v57  ;;  %v5545_v5 = vld [vmem:[#allocation2 + $0xf9] sm:$0xff]  ;;  %v5544_v57 = vld [vmem:[#allocation2 + $0xf1] sm:$0xff] }
 0x27a   : > { %8474 = vmatmul.mubr.msk.bf16.gmra.mxu0 %vm3820_vm1, %v4885_v0  ;;  %8437 = vmatprep.mubr.msk.bf16.mxu1 %vm3820_vm1, %v4885_v0  ;;  %v5529_v0 = vld [vmem:[#allocation2 + $0x79] sm:$0xff] }
 0x27b   : > { %8477 = vmatprep.mubr.msk.bf16.mxu0 %vm3820_vm1, %v4886_v23  ;;  %v10646_v47 = vpack.c.bf16 %v5529_v0, %v5528_v13 }
 0x281   : > { %8438 = vmatmul.mubr.msk.bf16.gmra.mxu1 %vm3820_vm1, %v4886_v23  ;;  %v5530_v23 = vld [vmem:[#allocation2 + $0x81] sm:$0xff] }
 0x282   : > { %8478 = vmatmul.mubr.msk.bf16.gmra.mxu0 %vm3820_vm1, %v4887_v22  ;;  %8441 = vmatprep.mubr.msk.bf16.mxu1 %vm3820_vm1, %v4887_v22  ;;  %v5221_v22 = vpack.c.bf16 %v5191_v61, %v5190_v27  ;;  %v10648_v4 = vpack.c.bf16 %v5531_v30, %v5530_v23 }
 0x283   : > { %8481 = vmatprep.mubr.msk.bf16.mxu0 %vm3820_vm1, %v4888_v6 }
 0x289   : > { %8442 = vmatmul.mubr.msk.bf16.gmra.mxu1 %vm3820_vm1, %v4888_v6  ;;  %v5192_v6 = vld [vmem:[#allocation2 + $0x80] sm:$0xff] }
 0x28a   : > { %8482 = vmatmul.mubr.msk.bf16.gmra.mxu0 %vm3820_vm1, %v4889_v25  ;;  %8445 = vmatprep.mubr.msk.bf16.mxu1 %vm3820_vm1, %v4889_v25  ;;  %v5222_v51 = vpack.c.bf16 %v5193_v54, %v5192_v6  ;;  %v5533_v25 = vld [vmem:[#allocation2 + $0x99] sm:$0xff] }
 0x28b   : > { %8485 = vmatprep.mubr.msk.bf16.mxu0 %vm3820_vm1, %v4890_v21  ;;  %v10656_v38 = vpack.c.bf16 %v5533_v25, %v5532_v26  ;;  %v5549_v6 = vld [vmem:[#allocation2 + $0x119] sm:$0xff]  ;;  %v5213_v25 = vld [vmem:[#allocation2 + $0x128] sm:$0xff]  ;;  %v5548_v26 = vld [vmem:[#allocation2 + $0x111] sm:$0xff] }
 0x28c   : > { %v10702_v31 = vpack.c.bf16 %v5549_v6, %v5548_v26 }
 0x291   : > { %8446 = vmatmul.mubr.msk.bf16.gmra.mxu1 %vm3820_vm1, %v4890_v21  ;;  %v5534_v21 = vld [vmem:[#allocation2 + $0xa1] sm:$0xff] }
 0x292   : > { %8486 = vmatmul.mubr.msk.bf16.gmra.mxu0 %vm3820_vm1, %v4891_v58  ;;  %8449 = vmatprep.mubr.msk.bf16.mxu1 %vm3820_vm1, %v4891_v58  ;;  %v5223_v58 = vpack.c.bf16 %v5195_v34, %v5194_v17  ;;  %v10658_v49 = vpack.c.bf16 %v5535_v24, %v5534_v21  ;;  %v5551_v21 = vld [vmem:[#allocation2 + $0x129] sm:$0xff] }
 0x293   : > { %8489 = vmatprep.mubr.msk.bf16.mxu0 %vm3820_vm1, %v4892_v10  ;;  %v5210_v17 = vld [vmem:[#allocation2 + $0x110] sm:$0xff] }
 0x299   : > { %8450 = vmatmul.mubr.msk.bf16.gmra.mxu1 %vm3820_vm1, %v4892_v10  ;;  %v5196_v10 = vld [vmem:[#allocation2 + $0xa0] sm:$0xff] }
 0x29a   : > { %8490 = vmatmul.mubr.msk.bf16.gmra.mxu0 %vm3820_vm1, %v4893_v11  ;;  %8453 = vmatprep.mubr.msk.bf16.mxu1 %vm3820_vm1, %v4893_v11  ;;  %v5224_v52 = vpack.c.bf16 %v5197_v20, %v5196_v10  ;;  %v5537_v11 = vld [vmem:[#allocation2 + $0xb9] sm:$0xff]  ;;  %v5550_v20 = vld [vmem:[#allocation2 + $0x121] sm:$0xff] }
 0x29b   : > { %8493 = vmatprep.mubr.msk.bf16.mxu0 %vm3820_vm1, %v4894_v32  ;;  %v10666_v37 = vpack.c.bf16 %v5537_v11, %v5536_v15  ;;  %v5212_v11 = vld [vmem:[#allocation2 + $0x120] sm:$0xff] }
 0x2a1   : > { %8454 = vmatmul.mubr.msk.bf16.gmra.mxu1 %vm3820_vm1, %v4894_v32  ;;  %v5538_v32 = vld [vmem:[#allocation2 + $0xc1] sm:$0xff] }
 0x2a2   : > { %8494 = vmatmul.mubr.msk.bf16.gmra.mxu0 %vm3820_vm1, %v4895_v44  ;;  %8501 = vmatprep.mubr.msk.bf16.mxu1 %vm3820_vm1, %v5216_v53  ;;  %v5200_v44 = vld [vmem:[#allocation2 + $0xc0] sm:$0xff]  ;;  %v10668_v53 = vpack.c.bf16 %v5539_v33, %v5538_v32  ;;  %v5232_v32 = vpack.c.bf16 %v5213_v25, %v5212_v11  ;;  %v10706_v33 = vpack.c.bf16 %v5551_v21, %v5550_v20 }
 0x2a3   : > { %8541 = vmatprep.mubr.msk.bf16.mxu0 %vm3820_vm1, %v5554_v8  ;;  %v5226_v12 = vpack.c.bf16 %v5201_v40, %v5200_v44  ;;  %v5203_v8 = vld [vmem:[#allocation2 + $0xd8] sm:$0xff] }
 0x2a4   : > { %v5227_v46 = vpack.c.bf16 %v5203_v8, %v5202_v9 }
 0x2a9   : > { %8502 = vmatmul.mubr.msk.bf16.vlgmr.msra.gmra.mxu1 %vm3820_vm1, %v5217_v62  ;;  %v10676_v62 = vpack.c.bf16 %v5541_v56, %v5540_v1  ;;  %v5215_v56 = vld [vmem:[#allocation2 + $0x138] sm:$0xff] }
 0x2aa   : > { %8542 = vmatmul.mubr.msk.bf16.vlgmr.msra.gmra.mxu0 %vm3820_vm1, %v10612_v59  ;;  %8505 = vmatprep.mubr.msk.bf16.mxu1 %vm3820_vm1, %v5218_v35  ;;  %v5228_v35 = vpack.c.bf16 %v5205_v16, %v5204_v48  ;;  %v5552_v16 = vld [vmem:[#allocation2 + $0x131] sm:$0xff]  ;;  %v6195_v1 = vld [vmem:[#allocation2 + $0x3a] sm:$0xff] }
 0x2ab   : > { %8545 = vmatprep.mubr.msk.bf16.mxu0 %vm3820_vm1, %v10614_v45  ;;  %8578 = vmatpush3.bf16.msra.mxu1 %v10571_v28  ;;  %v5188_v28 = vld [vmem:[#allocation2 + $0x60] sm:$0xff]  ;;  %v5214_v48 = vld [vmem:[#allocation2 + $0x130] sm:$0xff] }
 0x2ac   : > { %8618 = vmatpush3.bf16.msra.mxu0 %v10581_v42  ;;  %8579 = vmatprep.subr.bf16.mxu1 %v8751_v14  ;;  %v5220_v42 = vpack.c.bf16 %v5189_v3, %v5188_v28  ;;  %v5546_v3 = vld [vmem:[#allocation2 + $0x101] sm:$0xff] }
 0x2ad   : > { %8619 = vmatprep.subr.bf16.mxu0 %v8753_v36  ;;  %v5208_v28 = vld [vmem:[#allocation2 + $0x100] sm:$0xff]  ;;  %v10688_v61 = vpack.c.bf16 %v5547_v7, %v5546_v3  ;;  %v6194_v3 = vld [vmem:[#allocation2 + $0x32] sm:$0xff] }
 0x2af   : > { %8580 = vmatpush3.bf16.msra.mxu1 %v8751_v14  ;;  %v10678_v14 = vpack.c.bf16 %v5543_v50, %v5542_v43  ;;  %v5553_v43 = vld [vmem:[#allocation2 + $0x139] sm:$0xff] }
 0x2b0   : > { %8620 = vmatpush3.bf16.msra.mxu0 %v8753_v36  ;;  %8657 = vmatprep.subr.bf16.mxu1 %v10633_v39  ;;  %v5207_v36 = vld [vmem:[#allocation2 + $0xf8] sm:$0xff] }
 0x2b1   : > { %8506 = vmatmul.mubr.msk.bf16.gmra.mxu1 %vm3820_vm1, %v5219_v63  ;;  %v5229_v41 = vpack.c.bf16 %v5207_v36, %v5206_v2  ;;  %v10686_v63 = vpack.c.bf16 %v5545_v5, %v5544_v57  ;;  %v5233_v5 = vpack.c.bf16 %v5215_v56, %v5214_v48  ;;  %v6230_v2 = vpack.c.bf16 %v6195_v1, %v6194_v3 }
 0x2b2   : > { %8546 = vmatmul.mubr.msk.bf16.gmra.mxu0 %vm3820_vm1, %v10635_v29  ;;  %8509 = vmatprep.mubr.msk.bf16.mxu1 %vm3820_vm1, %v5220_v42  ;;  %v5230_v42 = vpack.c.bf16 %v5209_v18, %v5208_v28  ;;  %v10720_v18 = vpack.c.bf16 %v5553_v43, %v5552_v16  ;;  %v6203_v16 = vld [vmem:[#allocation2 + $0x7a] sm:$0xff] }
 0x2b3   : > { %8549 = vmatprep.mubr.msk.bf16.mxu0 %vm3820_vm1, %v10637_v60 }
 0x2b9   : > { %8510 = vmatmul.mubr.msk.bf16.gmra.mxu1 %vm3820_vm1, %v5221_v22  ;;  %v5211_v22 = vld [vmem:[#allocation2 + $0x118] sm:$0xff] }
 0x2ba   : > { %8550 = vmatmul.mubr.msk.bf16.gmra.mxu0 %vm3820_vm1, %v10646_v47  ;;  %8513 = vmatprep.mubr.msk.bf16.mxu1 %vm3820_vm1, %v5222_v51 }
 0x2bb   : > { %8553 = vmatprep.mubr.msk.bf16.mxu0 %vm3820_vm1, %v10648_v4 }
 0x2c1   : > { %8514 = vmatmul.mubr.msk.bf16.gmra.mxu1 %vm3820_vm1, %v5223_v58 }
 0x2c2   : > { %8554 = vmatmul.mubr.msk.bf16.gmra.mxu0 %vm3820_vm1, %v10656_v38  ;;  %8517 = vmatprep.mubr.msk.bf16.mxu1 %vm3820_vm1, %v5224_v52  ;;  %v5231_v52 = vpack.c.bf16 %v5211_v22, %v5210_v17  ;;  %v6198_v17 = vld [vmem:[#allocation2 + $0x52] sm:$0xff] }
 0x2c3   : > { %8557 = vmatprep.mubr.msk.bf16.mxu0 %vm3820_vm1, %v10658_v49 }
 0x2c9   : > { %8518 = vmatmul.mubr.msk.bf16.gmra.mxu1 %vm3820_vm1, %v5225_v55 }
 0x2ca   : > { %8558 = vmatmul.mubr.msk.bf16.gmra.mxu0 %vm3820_vm1, %v10666_v37  ;;  %8521 = vmatprep.mubr.msk.bf16.mxu1 %vm3820_vm1, %v5226_v12 }
 0x2cb   : > { %8561 = vmatprep.mubr.msk.bf16.mxu0 %vm3820_vm1, %v10668_v53 }
 0x2d1   : > { %8522 = vmatmul.mubr.msk.bf16.gmra.mxu1 %vm3820_vm1, %v5227_v46 }
 0x2d2   : > { %8562 = vmatmul.mubr.msk.bf16.gmra.mxu0 %vm3820_vm1, %v10676_v62  ;;  %8525 = vmatprep.mubr.msk.bf16.mxu1 %vm3820_vm1, %v5228_v35 }
 0x2d3   : > { %8565 = vmatprep.mubr.msk.bf16.mxu0 %vm3820_vm1, %v10678_v14 }
 0x2d7   : > { %v8343_v0 = vpop.f32.mrf.mxu1  ;;  %v8383_v54 = vpop.f32.mrf.mxu0 }
 0x2d8   : > { %v10693_v23 = vadd.f32 %v8383_v54, %v8343_v0 }
 0x2d9   : > { %8526 = vmatmul.mubr.msk.bf16.gmra.mxu1 %vm3820_vm1, %v5229_v41  ;;  %v4118_v30 = vpop.f32.mrf.mxu1  ;;  %v4361_v27 = vpop.f32.mrf.mxu0 }
 0x2da   : > { %8566 = vmatmul.mubr.msk.bf16.gmra.mxu0 %vm3820_vm1, %v10686_v63  ;;  %8529 = vmatprep.mubr.msk.bf16.mxu1 %vm3820_vm1, %v5230_v42  ;;  %v10698_v13 = vadd.f32 %v4361_v27, %v4118_v30  ;;  %v6196_v30 = vld [vmem:[#allocation2 + $0x42] sm:$0xff]  ;;  %v6197_v27 = vld [vmem:[#allocation2 + $0x4a] sm:$0xff] }
 0x2db   : > { %8569 = vmatprep.mubr.msk.bf16.mxu0 %vm3820_vm1, %v10688_v61  ;;  %v8344_v51 = vpop.f32.mrf.mxu1  ;;  %v8384_v34 = vpop.f32.mrf.mxu0  ;;  %v6231_v21 = vpack.c.bf16 %v6197_v27, %v6196_v30  ;;  %v6207_v27 = vld [vmem:[#allocation2 + $0x9a] sm:$0xff] }
 0x2dc   : > { %v10700_v24 = vadd.f32 %v8384_v34, %v8344_v51  ;;  %v6199_v51 = vld [vmem:[#allocation2 + $0x5a] sm:$0xff] }
 0x2dd   : > { %v4121_v58 = vpop.f32.mrf.mxu1  ;;  %v4364_v10 = vpop.f32.mrf.mxu0 }
 0x2de   : > { %v10704_v40 = vadd.f32 %v4364_v10, %v4121_v58  ;;  %v8755_v58 = vld [vmem:[%s11518_s6 + $0x80] sm:$0xff]  }
 0x2df   : > { %v8347_v19 = vpop.f32.mrf.mxu1  ;;  %v8387_v15 = vpop.f32.mrf.mxu0 }
 0x2e0   : > { %v10711_v55 = vadd.f32 %v8387_v15, %v8347_v19 }
 0x2e1   : > { %8530 = vmatmul.mubr.msk.bf16.gmra.mxu1 %vm3820_vm1, %v5231_v52  ;;  %v4134_v44 = vpop.f32.mrf.mxu1  ;;  %v4377_v12 = vpop.f32.mrf.mxu0 }
 0x2e2   : > { %8570 = vmatmul.mubr.msk.bf16.gmra.mxu0 %vm3820_vm1, %v10702_v31  ;;  %8533 = vmatprep.mubr.msk.bf16.mxu1 %vm3820_vm1, %v5232_v32  ;;  %v10716_v8 = vadd.f32 %v4377_v12, %v4134_v44  ;;  %v6200_v44 = vld [vmem:[#allocation2 + $0x62] sm:$0xff]  ;;  %v6201_v12 = vld [vmem:[#allocation2 + $0x6a] sm:$0xff] }
 0x2e3   : > { %8573 = vmatprep.mubr.msk.bf16.mxu0 %vm3820_vm1, %v10706_v33  ;;  %v8348_v50 = vpop.f32.mrf.mxu1  ;;  %v8388_v9 = vpop.f32.mrf.mxu0  ;;  %v6233_v1 = vpack.c.bf16 %v6201_v12, %v6200_v44 }
 0x2e4   : > { %v10718_v46 = vadd.f32 %v8388_v9, %v8348_v50 }
 0x2e5   : > { %v4137_v35 = vpop.f32.mrf.mxu1  ;;  %v4380_v36 = vpop.f32.mrf.mxu0 }
 0x2e6   : > { %v10722_v7 = vadd.f32 %v4380_v36, %v4137_v35 }
 0x2e8   : > { %v8351_v57 = vpop.f32.mrf.mxu1  ;;  %v8391_v41 = vpop.f32.mrf.mxu0 }
 0x2e9   : > { %8534 = vmatmul.mubr.msk.bf16.gmra.mxu1 %vm3820_vm1, %v5233_v5  ;;  %v10727_v28 = vadd.f32 %v8391_v41, %v8351_v57  ;;  %v6204_v41 = vld [vmem:[#allocation2 + $0x82] sm:$0xff] }
 0x2ea   : > { %8574 = vmatmul.mubr.msk.bf16.gmra.mxu0 %vm3820_vm1, %v10720_v18  ;;  %8581 = vmatprep.mubr.msk.bf16.mxu1 %vm3820_vm1, %v10612_v59  ;;  %v4150_v42 = vpop.f32.mrf.mxu1  ;;  %v4393_v0 = vpop.f32.mrf.mxu0  ;;  %v6232_v59 = vpack.c.bf16 %v6199_v51, %v6198_v17 }
 0x2eb   : > { %8621 = vmatprep.mubr.msk.bf16.mxu0 %vm3820_vm1, %v6230_v2  ;;  %v10732_v54 = vadd.f32 %v4393_v0, %v4150_v42  ;;  %v6205_v42 = vld [vmem:[#allocation2 + $0x8a] sm:$0xff] }
 0x2ec   : > { %v8352_v22 = vpop.f32.mrf.mxu1  ;;  %v8392_v6 = vpop.f32.mrf.mxu0  ;;  %v6235_v51 = vpack.c.bf16 %v6205_v42, %v6204_v41  ;;  %v6212_v41 = vld [vmem:[#allocation2 + $0xc2] sm:$0xff]  ;;  %v6213_v42 = vld [vmem:[#allocation2 + $0xca] sm:$0xff] }
 0x2ed   : > { %v10734_v34 = vadd.f32 %v8392_v6, %v8352_v22 }
 0x2ee   : > { %v4153_v25 = vpop.f32.mrf.mxu1  ;;  %v4396_v20 = vpop.f32.mrf.mxu0 }
 0x2ef   : > { %v10736_v26 = vadd.f32 %v4396_v20, %v4153_v25  ;;  %v6206_v25 = vld [vmem:[#allocation2 + $0x92] sm:$0xff] }
 0x2f0   : > { %v8355_v10 = vpop.f32.mrf.mxu1  ;;  %v8395_v52 = vpop.f32.mrf.mxu0 }
 0x2f1   : > { %8582 = vmatmul.mubr.msk.bf16.vlgmr.msra.gmra.mxu1 %vm3820_vm1, %v10614_v45  ;;  %v10744_v11 = vadd.f32 %v8395_v52, %v8355_v10 }
 0x2f2   : > { %8622 = vmatmul.mubr.msk.bf16.vlgmr.msra.gmra.mxu0 %vm3820_vm1, %v6231_v21  ;;  %8585 = vmatprep.mubr.msk.bf16.mxu1 %vm3820_vm1, %v10635_v29  ;;  %v4166_v32 = vpop.f32.mrf.mxu1  ;;  %v4409_v19 = vpop.f32.mrf.mxu0  ;;  %v6202_v29 = vld [vmem:[#allocation2 + $0x72] sm:$0xff] }
 0x2f3   : > { %8625 = vmatprep.mubr.msk.bf16.mxu0 %vm3820_vm1, %v6232_v59  ;;  %8658 = vmatpush3.bf16.msra.mxu1 %v10633_v39  ;;  %v10750_v15 = vadd.f32 %v4409_v19, %v4166_v32  ;;  %v6234_v39 = vpack.c.bf16 %v6203_v16, %v6202_v29  ;;  %v6208_v32 = vld [vmem:[#allocation2 + $0xa2] sm:$0xff]  ;;  %v6209_v19 = vld [vmem:[#allocation2 + $0xaa] sm:$0xff] }
 0x2f4   : > { %8659 = vmatprep.subr.bf16.mxu1 %v8755_v58  ;;  %v8356_v56 = vpop.f32.mrf.mxu1  ;;  %v8396_v45 = vpop.f32.mrf.mxu0 }
 0x2f5   : > { %v10752_v43 = vadd.f32 %v8396_v45, %v8356_v56  ;;  %v6211_v56 = vld [vmem:[#allocation2 + $0xba] sm:$0xff] }
 0x2f6   : > { %v4169_v50 = vpop.f32.mrf.mxu1  ;;  %v4412_v9 = vpop.f32.mrf.mxu0 }
 0x2f7   : > { %8660 = vmatpush3.bf16.msra.mxu1 %v8755_v58  ;;  %v10754_v48 = vadd.f32 %v4412_v9, %v4169_v50  ;;  %v6237_v50 = vpack.c.bf16 %v6209_v19, %v6208_v32  ;;  %v6210_v9 = vld [vmem:[#allocation2 + $0xb2] sm:$0xff] }
 0x2f8   : > { %v8359_v35 = vpop.f32.mrf.mxu1 }
 0x2f9   : > { %v8399_v36 = vpop.f32.mrf.mxu0  ;;  %8586 = vmatmul.mubr.msk.bf16.gmra.mxu1 %vm3820_vm1, %v10637_v60 }
 0x2fa   : > { %8626 = vmatmul.mubr.msk.bf16.gmra.mxu0 %vm3820_vm1, %v6233_v1  ;;  %v10759_v5 = vadd.f32 %v8399_v36, %v8359_v35  ;;  %8589 = vmatprep.mubr.msk.bf16.mxu1 %vm3820_vm1, %v10646_v47  ;;  %v4182_v3 = vpop.f32.mrf.mxu1  ;;  %v6236_v47 = vpack.c.bf16 %v6207_v27, %v6206_v25  ;;  %v6215_v27 = vld [vmem:[#allocation2 + $0xda] sm:$0xff]  ;;  %v6214_v25 = vld [vmem:[#allocation2 + $0xd2] sm:$0xff] }
 0x2fb   : > { %8629 = vmatprep.mubr.msk.bf16.mxu0 %vm3820_vm1, %v6234_v39  ;;  %v4425_v2 = vpop.f32.mrf.mxu0 }
 0x2fc   : > { %v10764_v57 = vadd.f32 %v4425_v2, %v4182_v3  ;;  %v8360_v0 = vpop.f32.mrf.mxu1 }
 0x2fd   : > { %v8400_v30 = vpop.f32.mrf.mxu0 }
 0x2fe   : > { %v10766_v22 = vadd.f32 %v8400_v30, %v8360_v0  ;;  %v4185_v60 = vpop.f32.mrf.mxu1 }
 0x2ff   : > { %v4428_v6 = vpop.f32.mrf.mxu0 }
 0x300   : > { %v10768_v20 = vadd.f32 %v4428_v6, %v4185_v60 }
 0x301   : > { %v8363_v21 = vpop.f32.mrf.mxu1  ;;  %8590 = vmatmul.mubr.msk.bf16.gmra.mxu1 %vm3820_vm1, %v10648_v4 }
 0x302   : > { %v8403_v17 = vpop.f32.mrf.mxu0  ;;  %8630 = vmatmul.mubr.msk.bf16.gmra.mxu0 %vm3820_vm1, %v6235_v51  ;;  %8593 = vmatprep.mubr.msk.bf16.mxu1 %vm3820_vm1, %v10656_v38  ;;  %v6238_v38 = vpack.c.bf16 %v6211_v56, %v6210_v9  ;;  %v6239_v51 = vpack.c.bf16 %v6213_v42, %v6212_v41 }
 0x303   : > { %v10773_v59 = vadd.f32 %v8403_v17, %v8363_v21  ;;  %8633 = vmatprep.mubr.msk.bf16.mxu0 %vm3820_vm1, %v6236_v47  ;;  %v4198_v58 = vpop.f32.mrf.mxu1 }
 0x304   : > { %v4441_v10 = vpop.f32.mrf.mxu0 }
 0x305   : > { %v10778_v52 = vadd.f32 %v4441_v10, %v4198_v58  ;;  %v8364_v44 = vpop.f32.mrf.mxu1 }
 0x306   : > { %v8404_v12 = vpop.f32.mrf.mxu0 }
 0x307   : > { %v10780_v45 = vadd.f32 %v8404_v12, %v8364_v44  ;;  %v4201_v4 = vpop.f32.mrf.mxu1  ;;  %v6216_v44 = vld [vmem:[#allocation2 + $0xe2] sm:$0xff]  ;;  %v6217_v12 = vld [vmem:[#allocation2 + $0xea] sm:$0xff] }
 0x308   : > { %v4444_v16 = vpop.f32.mrf.mxu0 }
 0x309   : > { %v10782_v1 = vadd.f32 %v4444_v16, %v4201_v4  ;;  %v8367_v29 = vpop.f32.mrf.mxu1  ;;  %8594 = vmatmul.mubr.msk.bf16.gmra.mxu1 %vm3820_vm1, %v10658_v49  ;;  %v6219_v16 = vld [vmem:[#allocation2 + $0xfa] sm:$0xff] }
 0x30a   : > { %v8407_v39 = vpop.f32.mrf.mxu0  ;;  %8634 = vmatmul.mubr.msk.bf16.gmra.mxu0 %vm3820_vm1, %v6237_v50  ;;  %8597 = vmatprep.mubr.msk.bf16.mxu1 %vm3820_vm1, %v10666_v37  ;;  %v6240_v37 = vpack.c.bf16 %v6215_v27, %v6214_v25  ;;  %v6220_v27 = vld [vmem:[#allocation2 + $0x102] sm:$0xff]  ;;  %v6223_v25 = vld [vmem:[#allocation2 + $0x11a] sm:$0xff] }
 0x30b   : > { %v10787_v35 = vadd.f32 %v8407_v39, %v8367_v29  ;;  %8637 = vmatprep.mubr.msk.bf16.mxu0 %vm3820_vm1, %v6238_v38  ;;  %v4214_v36 = vpop.f32.mrf.mxu1  ;;  %v6241_v38 = vpack.c.bf16 %v6217_v12, %v6216_v44  ;;  %v6218_v29 = vld [vmem:[#allocation2 + $0xf2] sm:$0xff] }
 0x30c   : > { %v4457_v3 = vpop.f32.mrf.mxu0 }
 0x30d   : > { %v10792_v2 = vadd.f32 %v4457_v3, %v4214_v36  ;;  %v8368_v0 = vpop.f32.mrf.mxu1 }
 0x30e   : > { %v8408_v30 = vpop.f32.mrf.mxu0 }
 0x30f   : > { %v10794_v60 = vadd.f32 %v8408_v30, %v8368_v0  ;;  %v4217_v49 = vpop.f32.mrf.mxu1 }
 0x310   : > { %v4460_v6 = vpop.f32.mrf.mxu0 }
 0x311   : > { %v10796_v47 = vadd.f32 %v4460_v6, %v4217_v49  ;;  %v8371_v21 = vpop.f32.mrf.mxu1  ;;  %8598 = vmatmul.mubr.msk.bf16.gmra.mxu1 %vm3820_vm1, %v10668_v53  ;;  %v6221_v49 = vld [vmem:[#allocation2 + $0x10a] sm:$0xff] }
 0x312   : > { %v8411_v17 = vpop.f32.mrf.mxu0  ;;  %8638 = vmatmul.mubr.msk.bf16.gmra.mxu0 %vm3820_vm1, %v6239_v51  ;;  %8601 = vmatprep.mubr.msk.bf16.mxu1 %vm3820_vm1, %v10676_v62  ;;  %v6242_v62 = vpack.c.bf16 %v6219_v16, %v6218_v29  ;;  %v6225_v29 = vld [vmem:[#allocation2 + $0x12a] sm:$0xff] }
 0x313   : > { %v10801_v58 = vadd.f32 %v8411_v17, %v8371_v21  ;;  %8641 = vmatprep.mubr.msk.bf16.mxu0 %vm3820_vm1, %v6240_v37  ;;  %v4230_v10 = vpop.f32.mrf.mxu1  ;;  %v6243_v17 = vpack.c.bf16 %v6221_v49, %v6220_v27 }
 0x314   : > { %v4473_v32 = vpop.f32.mrf.mxu0 }
 0x315   : > { %v10806_v19 = vadd.f32 %v4473_v32, %v4230_v10  ;;  %v8372_v56 = vpop.f32.mrf.mxu1  ;;  %v6222_v10 = vld [vmem:[#allocation2 + $0x112] sm:$0xff] }
 0x316   : > { %v8412_v4 = vpop.f32.mrf.mxu0 }
 0x317   : > { %v10808_v50 = vadd.f32 %v8412_v4, %v8372_v56  ;;  %v4233_v53 = vpop.f32.mrf.mxu1 }
 0x318   : > { %v4476_v9 = vpop.f32.mrf.mxu0 }
 0x319   : > { %v10810_v39 = vadd.f32 %v4476_v9, %v4233_v53  ;;  %v8375_v36 = vpop.f32.mrf.mxu1  ;;  %8602 = vmatmul.mubr.msk.bf16.gmra.mxu1 %vm3820_vm1, %v10678_v14 }
 0x31a   : > { %v8415_v3 = vpop.f32.mrf.mxu0  ;;  %8642 = vmatmul.mubr.msk.bf16.gmra.mxu0 %vm3820_vm1, %v6241_v38  ;;  %8605 = vmatprep.mubr.msk.bf16.mxu1 %vm3820_vm1, %v10686_v63  ;;  %v6244_v63 = vpack.c.bf16 %v6223_v25, %v6222_v10  ;;  %v6224_v38 = vld [vmem:[#allocation2 + $0x122] sm:$0xff]  ;;  %v6229_v10 = vld [vmem:[#allocation2 + $0x14a] sm:$0xff] }
 0x31b   : > { %v10815_v41 = vadd.f32 %v8415_v3, %v8375_v36  ;;  %8645 = vmatprep.mubr.msk.bf16.mxu0 %vm3820_vm1, %v6242_v62  ;;  %v4246_v42 = vpop.f32.mrf.mxu1  ;;  %v6227_v3 = vld [vmem:[#allocation2 + $0x13a] sm:$0xff]  ;;  %v6245_v27 = vpack.c.bf16 %v6225_v29, %v6224_v38 }
 0x31c   : > { %v4489_v0 = vpop.f32.mrf.mxu0 }
 0x31d   : > { %v10820_v30 = vadd.f32 %v4489_v0, %v4246_v42  ;;  %v8376_v6 = vpop.f32.mrf.mxu1 }
 0x31e   : > { %v8416_v51 = vpop.f32.mrf.mxu0 }
 0x31f   : > { %v10822_v37 = vadd.f32 %v8416_v51, %v8376_v6  ;;  %v4249_v14 = vpop.f32.mrf.mxu1 }
 0x320   : > { %v4492_v21 = vpop.f32.mrf.mxu0 }
 0x321   : > { %v10824_v32 = vadd.f32 %v4492_v21, %v4249_v14  ;;  %v8423_v44 = vpop.f32.mrf.mxu1  ;;  %8606 = vmatmul.mubr.msk.bf16.gmra.mxu1 %vm3820_vm1, %v10688_v61  ;;  %v6226_v61 = vld [vmem:[#allocation2 + $0x132] sm:$0xff]  ;;  %v5890_v14 = vld [vmem:[#allocation2 + $0x141] sm:$0xff] }
 0x322   : > { %v8463_v12 = vpop.f32.mrf.mxu0  ;;  %8646 = vmatmul.mubr.msk.bf16.gmra.mxu0 %vm3820_vm1, %v6243_v17  ;;  %v4808_v56 = vadd.f32 %v8423_v44, %v10693_v23  ;;  %8609 = vmatprep.mubr.msk.bf16.mxu1 %vm3820_vm1, %v10702_v31  ;;  %v6246_v51 = vpack.c.bf16 %v6227_v3, %v6226_v61  ;;  %v5891_v17 = vld [vmem:[#allocation2 + $0x149] sm:$0xff] }
 0x323   : > { %8649 = vmatprep.mubr.msk.bf16.mxu0 %vm3820_vm1, %v6244_v63  ;;  %v4663_v4 = vpop.f32.mrf.mxu1 }
 0x324   : > { %v5001_v16 = vpop.f32.mrf.mxu0  ;;  %v10833_v53 = vadd.f32 %v8463_v12, %v4808_v56  ;;  %v4806_v9 = vadd.f32 %v4663_v4, %v10698_v13 }
 0x325   : > { %v8424_v62 = vpop.f32.mrf.mxu1 }
 0x326   : > { %v8464_v36 = vpop.f32.mrf.mxu0  ;;  %v10836_v42 = vadd.f32 %v5001_v16, %v4806_v9  ;;  %v4809_v23 = vadd.f32 %v8424_v62, %v10700_v24  ;;  %v5909_v16 = vpack.c.bf16 %v5891_v17, %v5890_v14  ;;  %v6533_v9 = vld [vmem:[#allocation2 + $0x3b] sm:$0xff] }
 0x327   : > { %v4666_v0 = vpop.f32.mrf.mxu1  ;;  %v6537_v17 = vld [vmem:[#allocation2 + $0x5b] sm:$0xff] }
 0x328   : > { %v5004_v31 = vpop.f32.mrf.mxu0  ;;  %v10839_v49 = vadd.f32 %v8464_v36, %v4809_v23  ;;  %v4807_v6 = vadd.f32 %v4666_v0, %v10704_v40  ;;  %v6228_v40 = vld [vmem:[#allocation2 + $0x142] sm:$0xff]  ;;  %v6532_v36 = vld [vmem:[#allocation2 + $0x33] sm:$0xff] }
 0x329   : > { %v8427_v25 = vpop.f32.mrf.mxu1  ;;  %8610 = vmatmul.mubr.msk.bf16.gmra.mxu1 %vm3820_vm1, %v10706_v33  ;;  %v6247_v38 = vpack.c.bf16 %v6229_v10, %v6228_v40  ;;  %v6568_v23 = vpack.c.bf16 %v6533_v9, %v6532_v36 }
 0x32a   : > { %v8467_v13 = vpop.f32.mrf.mxu0  ;;  %8650 = vmatmul.mubr.msk.bf16.gmra.mxu0 %vm3820_vm1, %v6245_v27  ;;  %v10845_v21 = vadd.f32 %v5004_v31, %v4807_v6  ;;  %v4812_v24 = vadd.f32 %v8427_v25, %v10711_v55  ;;  %8613 = vmatprep.mubr.msk.bf16.mxu1 %vm3820_vm1, %v10720_v18 }
 0x32b   : > { %8653 = vmatprep.mubr.msk.bf16.mxu0 %vm3820_vm1, %v6246_v51  ;;  %v4679_v63 = vpop.f32.mrf.mxu1 }
 0x32c   : > { %v5017_v44 = vpop.f32.mrf.mxu0  ;;  %v10851_v12 = vadd.f32 %v8467_v13, %v4812_v24  ;;  %v4810_v33 = vadd.f32 %v4679_v63, %v10716_v8  ;;  %v6535_v13 = vld [vmem:[#allocation2 + $0x4b] sm:$0xff] }
 0x32d   : > { %v8428_v56 = vpop.f32.mrf.mxu1 }
 0x32e   : > { %v8468_v4 = vpop.f32.mrf.mxu0  ;;  %v10854_v55 = vadd.f32 %v5017_v44, %v4810_v33  ;;  %v4813_v18 = vadd.f32 %v8428_v56, %v10718_v46  ;;  %v6536_v33 = vld [vmem:[#allocation2 + $0x53] sm:$0xff] }
 0x32f   : > { %v4682_v29 = vpop.f32.mrf.mxu1 }
 0x330   : > { %v5020_v62 = vpop.f32.mrf.mxu0  ;;  %v10857_v61 = vadd.f32 %v8468_v4, %v4813_v18  ;;  %v4811_v3 = vadd.f32 %v4682_v29, %v10722_v7  ;;  %v6534_v7 = vld [vmem:[#allocation2 + $0x43] sm:$0xff] }
 0x331   : > { %v8431_v0 = vpop.f32.mrf.mxu1  ;;  %8614 = vmatmul.mubr.msk.bf16.gmra.mxu1 %vm3820_vm1, %v5909_v16  ;;  %v6570_v16 = vpack.c.bf16 %v6537_v17, %v6536_v33 }
 0x332   : > { %v8471_v31 = vpop.f32.mrf.mxu0  ;;  %8654 = vmatmul.mubr.msk.bf16.gmra.mxu0 %vm3820_vm1, %v6247_v38  ;;  %v10862_v8 = vadd.f32 %v5020_v62, %v4811_v3  ;;  %v4816_v27 = vadd.f32 %v8431_v0, %v10727_v28  ;;  %8661 = vmatprep.mubr.msk.bf16.mxu1 %vm3820_vm1, %v6568_v23  ;;  %v6569_v28 = vpack.c.bf16 %v6535_v13, %v6534_v7  ;;  %v6538_v3 = vld [vmem:[#allocation2 + $0x63] sm:$0xff]  ;;  %v6539_v23 = vld [vmem:[#allocation2 + $0x6b] sm:$0xff]  ;;  %v6540_v7 = vld [vmem:[#allocation2 + $0x73] sm:$0xff] }
 0x333   : > { %v4695_v46 = vpop.f32.mrf.mxu1 }
 0x334   : > { %v5033_v6 = vpop.f32.mrf.mxu0  ;;  %v10866_v51 = vadd.f32 %v8471_v31, %v4816_v27  ;;  %v4814_v25 = vadd.f32 %v4695_v46, %v10732_v54  ;;  %v6541_v31 = vld [vmem:[#allocation2 + $0x7b] sm:$0xff] }
 0x335   : > { %v8432_v14 = vpop.f32.mrf.mxu1 }
 0x336   : > { %v8472_v24 = vpop.f32.mrf.mxu0  ;;  %v10869_v40 = vadd.f32 %v5033_v6, %v4814_v25  ;;  %v4817_v10 = vadd.f32 %v8432_v14, %v10734_v34 }
 0x337   : > { %v4698_v63 = vpop.f32.mrf.mxu1 }
 0x338   : > { %v5036_v44 = vpop.f32.mrf.mxu0  ;;  %v10872_v56 = vadd.f32 %v8472_v24, %v4817_v10  ;;  %v4815_v4 = vadd.f32 %v4698_v63, %v10736_v26  ;;  %v6572_v24 = vpack.c.bf16 %v6541_v31, %v6540_v7 }
 0x339   : > { %v8435_v9 = vpop.f32.mrf.mxu1  ;;  %8662 = vmatmul.mubr.msk.bf16.vlgmr.msra.gmra.mxu1 %vm3820_vm1, %v6569_v28 }
 0x33a   : > { %v8475_v54 = vpop.f32.mrf.mxu0  ;;  %v10876_v38 = vadd.f32 %v5036_v44, %v4815_v4  ;;  %v4820_v18 = vadd.f32 %v8435_v9, %v10744_v11  ;;  %8665 = vmatprep.mubr.msk.bf16.mxu1 %vm3820_vm1, %v6570_v16  ;;  %v6571_v11 = vpack.c.bf16 %v6539_v23, %v6538_v3  ;;  %v6542_v4 = vld [vmem:[#allocation2 + $0x83] sm:$0xff]  ;;  %v6543_v16 = vld [vmem:[#allocation2 + $0x8b] sm:$0xff]  ;;  %v6544_v3 = vld [vmem:[#allocation2 + $0x93] sm:$0xff] }
 0x33b   : > { %v4711_v34 = vpop.f32.mrf.mxu1 }
 0x33c   : > { %v5049_v29 = vpop.f32.mrf.mxu0  ;;  %v10880_v62 = vadd.f32 %v8475_v54, %v4820_v18  ;;  %v4818_v36 = vadd.f32 %v4711_v34, %v10750_v15  ;;  %v6545_v54 = vld [vmem:[#allocation2 + $0x9b] sm:$0xff] }
 0x33d   : > { %v8436_v26 = vpop.f32.mrf.mxu1 }
 0x33e   : > { %v8476_v0 = vpop.f32.mrf.mxu0  ;;  %v10883_v27 = vadd.f32 %v5049_v29, %v4818_v36  ;;  %v4821_v46 = vadd.f32 %v8436_v26, %v10752_v43 }
 0x33f   : > { %v4714_v6 = vpop.f32.mrf.mxu1 }
 0x340   : > { %v5052_v25 = vpop.f32.mrf.mxu0  ;;  %v10886_v13 = vadd.f32 %v8476_v0, %v4821_v46  ;;  %v4819_v14 = vadd.f32 %v4714_v6, %v10754_v48  ;;  %v6574_v0 = vpack.c.bf16 %v6545_v54, %v6544_v3 }
 0x341   : > { %v8439_v17 = vpop.f32.mrf.mxu1  ;;  %8666 = vmatmul.mubr.msk.bf16.gmra.mxu1 %vm3820_vm1, %v6571_v11 }
 0x342   : > { %v8479_v15 = vpop.f32.mrf.mxu0  ;;  %v10890_v10 = vadd.f32 %v5052_v25, %v4819_v14  ;;  %v4824_v63 = vadd.f32 %v8439_v17, %v10759_v5  ;;  %8669 = vmatprep.mubr.msk.bf16.mxu1 %vm3820_vm1, %v6572_v24  ;;  %v6573_v5 = vpack.c.bf16 %v6543_v16, %v6542_v4  ;;  %v6546_v14 = vld [vmem:[#allocation2 + $0xa3] sm:$0xff]  ;;  %v6547_v24 = vld [vmem:[#allocation2 + $0xab] sm:$0xff]  ;;  %v6548_v4 = vld [vmem:[#allocation2 + $0xb3] sm:$0xff] }
 0x343   : > { %v4727_v43 = vpop.f32.mrf.mxu1 }
 0x344   : > { %v5065_v44 = vpop.f32.mrf.mxu0  ;;  %v10894_v28 = vadd.f32 %v8479_v15, %v4824_v63  ;;  %v4822_v33 = vadd.f32 %v4727_v43, %v10764_v57  ;;  %v6549_v15 = vld [vmem:[#allocation2 + $0xbb] sm:$0xff] }
 0x345   : > { %v8440_v48 = vpop.f32.mrf.mxu1 }
 0x346   : > { %v8480_v9 = vpop.f32.mrf.mxu0  ;;  %v10897_v18 = vadd.f32 %v5065_v44, %v4822_v33  ;;  %v4825_v34 = vadd.f32 %v8440_v48, %v10766_v22 }
 0x347   : > { %v4730_v29 = vpop.f32.mrf.mxu1 }
 0x348   : > { %v5068_v36 = vpop.f32.mrf.mxu0  ;;  %v10900_v23 = vadd.f32 %v8480_v9, %v4825_v34  ;;  %v4823_v26 = vadd.f32 %v4730_v29, %v10768_v20  ;;  %v6576_v9 = vpack.c.bf16 %v6549_v15, %v6548_v4 }
 0x349   : > { %v8443_v31 = vpop.f32.mrf.mxu1  ;;  %8670 = vmatmul.mubr.msk.bf16.gmra.mxu1 %vm3820_vm1, %v6573_v5 }
 0x34a   : > { %v8483_v57 = vpop.f32.mrf.mxu0  ;;  %v10904_v46 = vadd.f32 %v5068_v36, %v4823_v26  ;;  %v4828_v6 = vadd.f32 %v8443_v31, %v10773_v59  ;;  %8673 = vmatprep.mubr.msk.bf16.mxu1 %vm3820_vm1, %v6574_v0  ;;  %v6575_v59 = vpack.c.bf16 %v6547_v24, %v6546_v14  ;;  %v6550_v26 = vld [vmem:[#allocation2 + $0xc3] sm:$0xff]  ;;  %v6551_v0 = vld [vmem:[#allocation2 + $0xcb] sm:$0xff]  ;;  %v6552_v14 = vld [vmem:[#allocation2 + $0xd3] sm:$0xff] }
 0x34b   : > { %v4743_v22 = vpop.f32.mrf.mxu1 }
 0x34c   : > { %v5081_v25 = vpop.f32.mrf.mxu0  ;;  %v10908_v11 = vadd.f32 %v8483_v57, %v4828_v6  ;;  %v4826_v7 = vadd.f32 %v4743_v22, %v10778_v52  ;;  %v6553_v57 = vld [vmem:[#allocation2 + $0xdb] sm:$0xff] }
 0x34d   : > { %v8444_v20 = vpop.f32.mrf.mxu1 }
 0x34e   : > { %v8484_v17 = vpop.f32.mrf.mxu0  ;;  %v10911_v63 = vadd.f32 %v5081_v25, %v4826_v7  ;;  %v4829_v43 = vadd.f32 %v8444_v20, %v10780_v45 }
 0x34f   : > { %v4746_v44 = vpop.f32.mrf.mxu1 }
 0x350   : > { %v5084_v33 = vpop.f32.mrf.mxu0  ;;  %v10914_v16 = vadd.f32 %v8484_v17, %v4829_v43  ;;  %v4827_v48 = vadd.f32 %v4746_v44, %v10782_v1  ;;  %v6578_v17 = vpack.c.bf16 %v6553_v57, %v6552_v14 }
 0x351   : > { %v8447_v54 = vpop.f32.mrf.mxu1  ;;  %8674 = vmatmul.mubr.msk.bf16.gmra.mxu1 %vm3820_vm1, %v6575_v59 }
 0x352   : > { %v8487_v52 = vpop.f32.mrf.mxu0  ;;  %v10918_v34 = vadd.f32 %v5084_v33, %v4827_v48  ;;  %v4832_v29 = vadd.f32 %v8447_v54, %v10787_v35  ;;  %8677 = vmatprep.mubr.msk.bf16.mxu1 %vm3820_vm1, %v6576_v9  ;;  %v6577_v35 = vpack.c.bf16 %v6551_v0, %v6550_v26  ;;  %v6554_v48 = vld [vmem:[#allocation2 + $0xe3] sm:$0xff]  ;;  %v6555_v9 = vld [vmem:[#allocation2 + $0xeb] sm:$0xff]  ;;  %v6556_v26 = vld [vmem:[#allocation2 + $0xf3] sm:$0xff] }
 0x353   : > { %v4759_v45 = vpop.f32.mrf.mxu1 }
 0x354   : > { %v5097_v36 = vpop.f32.mrf.mxu0  ;;  %v10922_v5 = vadd.f32 %v8487_v52, %v4832_v29  ;;  %v4830_v3 = vadd.f32 %v4759_v45, %v10792_v2  ;;  %v6557_v52 = vld [vmem:[#allocation2 + $0xfb] sm:$0xff] }
 0x355   : > { %v8448_v1 = vpop.f32.mrf.mxu1 }
 0x356   : > { %v8488_v31 = vpop.f32.mrf.mxu0  ;;  %v10925_v6 = vadd.f32 %v5097_v36, %v4830_v3  ;;  %v4833_v22 = vadd.f32 %v8448_v1, %v10794_v60 }
 0x357   : > { %v4762_v25 = vpop.f32.mrf.mxu1 }
 0x358   : > { %v5100_v7 = vpop.f32.mrf.mxu0  ;;  %v10928_v24 = vadd.f32 %v8488_v31, %v4833_v22  ;;  %v4831_v20 = vadd.f32 %v4762_v25, %v10796_v47  ;;  %v6580_v31 = vpack.c.bf16 %v6557_v52, %v6556_v26 }
 0x359   : > { %v8451_v15 = vpop.f32.mrf.mxu1  ;;  %8678 = vmatmul.mubr.msk.bf16.gmra.mxu1 %vm3820_vm1, %v6577_v35 }
 0x35a   : > { %v8491_v2 = vpop.f32.mrf.mxu0  ;;  %v10932_v43 = vadd.f32 %v5100_v7, %v4831_v20  ;;  %v4836_v44 = vadd.f32 %v8451_v15, %v10801_v58  ;;  %8681 = vmatprep.mubr.msk.bf16.mxu1 %vm3820_vm1, %v6578_v17  ;;  %v6579_v58 = vpack.c.bf16 %v6555_v9, %v6554_v48  ;;  %v6558_v20 = vld [vmem:[#allocation2 + $0x103] sm:$0xff]  ;;  %v6559_v17 = vld [vmem:[#allocation2 + $0x10b] sm:$0xff]  ;;  %v6560_v48 = vld [vmem:[#allocation2 + $0x113] sm:$0xff] }
 0x35b   : > { %v4775_v60 = vpop.f32.mrf.mxu1 }
 0x35c   : > { %v5113_v33 = vpop.f32.mrf.mxu0  ;;  %v10936_v59 = vadd.f32 %v8491_v2, %v4836_v44  ;;  %v4834_v4 = vadd.f32 %v4775_v60, %v10806_v19  ;;  %v6561_v2 = vld [vmem:[#allocation2 + $0x11b] sm:$0xff] }
 0x35d   : > { %v8452_v47 = vpop.f32.mrf.mxu1 }
 0x35e   : > { %v8492_v54 = vpop.f32.mrf.mxu0  ;;  %v10939_v29 = vadd.f32 %v5113_v33, %v4834_v4  ;;  %v4837_v45 = vadd.f32 %v8452_v47, %v10808_v50 }
 0x35f   : > { %v4778_v36 = vpop.f32.mrf.mxu1 }
 0x360   : > { %v5116_v3 = vpop.f32.mrf.mxu0  ;;  %v10942_v0 = vadd.f32 %v8492_v54, %v4837_v45  ;;  %v4835_v1 = vadd.f32 %v4778_v36, %v10810_v39  ;;  %v6582_v54 = vpack.c.bf16 %v6561_v2, %v6560_v48 }
 0x361   : > { %v8455_v57 = vpop.f32.mrf.mxu1  ;;  %8682 = vmatmul.mubr.msk.bf16.gmra.mxu1 %vm3820_vm1, %v6579_v58 }
 0x362   : > { %v8495_v19 = vpop.f32.mrf.mxu0  ;;  %v10946_v22 = vadd.f32 %v5116_v3, %v4835_v1  ;;  %v4840_v25 = vadd.f32 %v8455_v57, %v10815_v41  ;;  %8685 = vmatprep.mubr.msk.bf16.mxu1 %vm3820_vm1, %v6580_v31  ;;  %v6581_v41 = vpack.c.bf16 %v6559_v17, %v6558_v20  ;;  %v6562_v1 = vld [vmem:[#allocation2 + $0x123] sm:$0xff]  ;;  %v6563_v31 = vld [vmem:[#allocation2 + $0x12b] sm:$0xff] }
 0x363   : > { %v4791_v50 = vpop.f32.mrf.mxu1  ;;  %v6583_v20 = vpack.c.bf16 %v6563_v31, %v6562_v1 }
 0x364   : > { %v5129_v7 = vpop.f32.mrf.mxu0  ;;  %v10950_v35 = vadd.f32 %v8495_v19, %v4840_v25  ;;  %v4838_v14 = vadd.f32 %v4791_v50, %v10820_v30  ;;  %v6564_v19 = vld [vmem:[#allocation2 + $0x133] sm:$0xff]  ;;  %v6565_v25 = vld [vmem:[#allocation2 + $0x13b] sm:$0xff] }
 0x365   : > { %v8456_v39 = vpop.f32.mrf.mxu1 }
 0x366   : > { %v8496_v15 = vpop.f32.mrf.mxu0  ;;  %v10953_v44 = vadd.f32 %v5129_v7, %v4838_v14  ;;  %v4841_v60 = vadd.f32 %v8456_v39, %v10822_v37 }
 0x367   : > { %v4794_v33 = vpop.f32.mrf.mxu1 }
 0x368   : > { %v5132_v4 = vpop.f32.mrf.mxu0  ;;  %v10956_v9 = vadd.f32 %v8496_v15, %v4841_v60  ;;  %v4839_v47 = vadd.f32 %v4794_v33, %v10824_v32  ;;  %v6584_v15 = vpack.c.bf16 %v6565_v25, %v6564_v19 }
 0x369   : > { %v8503_v52 = vpop.f32.mrf.mxu1  ;;  %8686 = vmatmul.mubr.msk.bf16.gmra.mxu1 %vm3820_vm1, %v6581_v41 }
 0x36a   : > { %v8543_v30 = vpop.f32.mrf.mxu0  ;;  %v10960_v45 = vadd.f32 %v5132_v4, %v4839_v47  ;;  %v5484_v36 = vadd.f32 %v8503_v52, %v10833_v53  ;;  %8689 = vmatprep.mubr.msk.bf16.mxu1 %vm3820_vm1, %v6582_v54  ;;  %v6566_v4 = vld [vmem:[#allocation2 + $0x143] sm:$0xff] }
 0x36b   : > { %v5339_v37 = vpop.f32.mrf.mxu1 }
 0x36c   : > { %v5677_v3 = vpop.f32.mrf.mxu0  ;;  %v10964_v58 = vadd.f32 %v8543_v30, %v5484_v36  ;;  %v5482_v26 = vadd.f32 %v5339_v37, %v10836_v42 }
 0x36d   : > { %v8504_v32 = vpop.f32.mrf.mxu1 }
 0x36e   : > { %v8544_v57 = vpop.f32.mrf.mxu0  ;;  %v10967_v50 = vadd.f32 %v5677_v3, %v5482_v26  ;;  %v5485_v7 = vadd.f32 %v8504_v32, %v10839_v49  ;;  %v6567_v49 = vld [vmem:[#allocation2 + $0x14b] sm:$0xff] }
 0x36f   : > { %v5342_v14 = vpop.f32.mrf.mxu1  ;;  %v6585_v30 = vpack.c.bf16 %v6567_v49, %v6566_v4 }
 0x370   : > { %v5680_v53 = vpop.f32.mrf.mxu0  ;;  %v10970_v17 = vadd.f32 %v8544_v57, %v5485_v7  ;;  %v5483_v39 = vadd.f32 %v5342_v14, %v10845_v21 }
 0x371   : > { %v8507_v2 = vpop.f32.mrf.mxu1  ;;  %8690 = vmatmul.mubr.msk.bf16.gmra.mxu1 %vm3820_vm1, %v6583_v20 }
 0x372   : > { %v8547_v42 = vpop.f32.mrf.mxu0  ;;  %v10974_v60 = vadd.f32 %v5680_v53, %v5483_v39  ;;  %v5488_v33 = vadd.f32 %v8507_v2, %v10851_v12  ;;  %8693 = vmatprep.mubr.msk.bf16.mxu1 %vm3820_vm1, %v6584_v15 }
 0x373   : > { %v5355_v41 = vpop.f32.mrf.mxu1 }
 0x374   : > { %v5693_v48 = vpop.f32.mrf.mxu0  ;;  %v10978_v47 = vadd.f32 %v8547_v42, %v5488_v33  ;;  %v5486_v54 = vadd.f32 %v5355_v41, %v10854_v55 }
 0x375   : > { %v8508_v21 = vpop.f32.mrf.mxu1 }
 0x376   : > { %v8548_v52 = vpop.f32.mrf.mxu0  ;;  %v10981_v36 = vadd.f32 %v5693_v48, %v5486_v54  ;;  %v5489_v37 = vadd.f32 %v8508_v21, %v10857_v61 }
 0x377   : > { %v5358_v3 = vpop.f32.mrf.mxu1 }
 0x378   : > { %v5696_v26 = vpop.f32.mrf.mxu0  ;;  %v10984_v12 = vadd.f32 %v8548_v52, %v5489_v37  ;;  %v5487_v1 = vadd.f32 %v5358_v3, %v10862_v8 }
 0x379   : > { %v8511_v31 = vpop.f32.mrf.mxu1  ;;  %8694 = vmatmul.mubr.msk.bf16.gmra.mxu1 %vm3820_vm1, %v6585_v30 }
 0x37a   : > { %v8551_v32 = vpop.f32.mrf.mxu0  ;;  %v10988_v57 = vadd.f32 %v5696_v26, %v5487_v1  ;;  %v5492_v55 = vadd.f32 %v8511_v31, %v10866_v51 }
 0x37b   : > { %v5371_v19 = vpop.f32.mrf.mxu1 }
 0x37c   : > { %v5709_v25 = vpop.f32.mrf.mxu0  ;;  %v10991_v7 = vadd.f32 %v8551_v32, %v5492_v55  ;;  %v5490_v61 = vadd.f32 %v5371_v19, %v10869_v40 }
 0x37d   : > { %v8512_v14 = vpop.f32.mrf.mxu1 }
 0x37e   : > { %v8552_v53 = vpop.f32.mrf.mxu0  ;;  %v10994_v20 = vadd.f32 %v5709_v25, %v5490_v61  ;;  %v5493_v8 = vadd.f32 %v8512_v14, %v10872_v56 }
 0x37f   : > { %v5374_v39 = vpop.f32.mrf.mxu1 }
 0x380   : > { %v5712_v15 = vpop.f32.mrf.mxu0  ;;  %v10997_v2 = vadd.f32 %v8552_v53, %v5493_v8  ;;  %v5491_v42 = vadd.f32 %v5374_v39, %v10876_v38 }
 0x381   : > { %v8515_v33 = vpop.f32.mrf.mxu1 }
 0x382   : > { %v8555_v51 = vpop.f32.mrf.mxu0  ;;  %v11000_v4 = vadd.f32 %v5712_v15, %v5491_v42  ;;  %v5496_v49 = vadd.f32 %v8515_v33, %v10880_v62 }
 0x383   : > { %v5387_v41 = vpop.f32.mrf.mxu1 }
 0x384   : > { %v5725_v40 = vpop.f32.mrf.mxu0  ;;  %v11003_v48 = vadd.f32 %v8555_v51, %v5496_v49  ;;  %v5494_v54 = vadd.f32 %v5387_v41, %v10883_v27 }
 0x385   : > { %v8516_v21 = vpop.f32.mrf.mxu1 }
 0x386   : > { %v8556_v56 = vpop.f32.mrf.mxu0  ;;  %v11006_v52 = vadd.f32 %v5725_v40, %v5494_v54  ;;  %v5497_v30 = vadd.f32 %v8516_v21, %v10886_v13 }
 0x387   : > { %v5390_v37 = vpop.f32.mrf.mxu1 }
 0x388   : > { %v5728_v38 = vpop.f32.mrf.mxu0  ;;  %v11009_v3 = vadd.f32 %v8556_v56, %v5497_v30  ;;  %v5495_v26 = vadd.f32 %v5390_v37, %v10890_v10 }
 0x389   : > { %v8519_v1 = vpop.f32.mrf.mxu1 }
 0x38a   : > { %v8559_v62 = vpop.f32.mrf.mxu0  ;;  %v11012_v31 = vadd.f32 %v5728_v38, %v5495_v26  ;;  %v5500_v32 = vadd.f32 %v8519_v1, %v10894_v28 }
 0x38b   : > { %v5403_v55 = vpop.f32.mrf.mxu1 }
 0x38c   : > { %v5741_v27 = vpop.f32.mrf.mxu0  ;;  %v11015_v19 = vadd.f32 %v8559_v62, %v5500_v32  ;;  %v5498_v25 = vadd.f32 %v5403_v55, %v10897_v18 }
 0x38d   : > { %v8520_v61 = vpop.f32.mrf.mxu1 }
 0x38e   : > { %v8560_v13 = vpop.f32.mrf.mxu0  ;;  %v11018_v14 = vadd.f32 %v5741_v27, %v5498_v25  ;;  %v5501_v53 = vadd.f32 %v8520_v61, %v10900_v23 }
 0x38f   : > { %v5406_v8 = vpop.f32.mrf.mxu1 }
 0x390   : > { %v5744_v10 = vpop.f32.mrf.mxu0  ;;  %v11021_v39 = vadd.f32 %v8560_v13, %v5501_v53  ;;  %v5499_v15 = vadd.f32 %v5406_v8, %v10904_v46 }
 0x391   : > { %v8523_v42 = vpop.f32.mrf.mxu1 }
 0x392   : > { %v8563_v28 = vpop.f32.mrf.mxu0  ;;  %v11024_v33 = vadd.f32 %v5744_v10, %v5499_v15  ;;  %v5504_v51 = vadd.f32 %v8523_v42, %v10908_v11 }
 0x393   : > { %v5419_v49 = vpop.f32.mrf.mxu1 }
 0x394   : > { %v5757_v18 = vpop.f32.mrf.mxu0  ;;  %v11027_v41 = vadd.f32 %v8563_v28, %v5504_v51  ;;  %v5502_v40 = vadd.f32 %v5419_v49, %v10911_v63 }
 0x395   : > { %v8524_v54 = vpop.f32.mrf.mxu1 }
 0x396   : > { %v8564_v23 = vpop.f32.mrf.mxu0  ;;  %v11030_v21 = vadd.f32 %v5757_v18, %v5502_v40  ;;  %v5505_v56 = vadd.f32 %v8524_v54, %v10914_v16 }
 0x397   : > { %v5422_v30 = vpop.f32.mrf.mxu1 }
 0x398   : > { %v5760_v46 = vpop.f32.mrf.mxu0  ;;  %v11033_v37 = vadd.f32 %v8564_v23, %v5505_v56  ;;  %v5503_v38 = vadd.f32 %v5422_v30, %v10918_v34 }
 0x399   : > { %v8527_v26 = vpop.f32.mrf.mxu1 }
 0x39a   : > { %v8567_v11 = vpop.f32.mrf.mxu0  ;;  %v11036_v1 = vadd.f32 %v5760_v46, %v5503_v38  ;;  %v5508_v62 = vadd.f32 %v8527_v26, %v10922_v5 }
 0x39b   : > { %v5435_v32 = vpop.f32.mrf.mxu1 }
 0x39c   : > { %v5773_v63 = vpop.f32.mrf.mxu0  ;;  %v11039_v55 = vadd.f32 %v8567_v11, %v5508_v62  ;;  %v5506_v27 = vadd.f32 %v5435_v32, %v10925_v6 }
 0x39d   : > { %v8528_v25 = vpop.f32.mrf.mxu1 }
 0x39e   : > { %v8568_v16 = vpop.f32.mrf.mxu0  ;;  %v11042_v61 = vadd.f32 %v5773_v63, %v5506_v27  ;;  %v5509_v13 = vadd.f32 %v8528_v25, %v10928_v24 }
 0x39f   : > { %v5438_v53 = vpop.f32.mrf.mxu1 }
 0x3a0   : > { %v5776_v34 = vpop.f32.mrf.mxu0  ;;  %v11045_v8 = vadd.f32 %v8568_v16, %v5509_v13  ;;  %v5507_v10 = vadd.f32 %v5438_v53, %v10932_v43 }
 0x3a1   : > { %v8531_v15 = vpop.f32.mrf.mxu1 }
 0x3a2   : > { %v8571_v5 = vpop.f32.mrf.mxu0  ;;  %v11048_v42 = vadd.f32 %v5776_v34, %v5507_v10  ;;  %v5512_v28 = vadd.f32 %v8531_v15, %v10936_v59 }
 0x3a3   : > { %v5451_v51 = vpop.f32.mrf.mxu1 }
 0x3a4   : > { %v5789_v6 = vpop.f32.mrf.mxu0  ;;  %v11051_v49 = vadd.f32 %v8571_v5, %v5512_v28  ;;  %v5510_v18 = vadd.f32 %v5451_v51, %v10939_v29 }
 0x3a5   : > { %v8532_v40 = vpop.f32.mrf.mxu1 }
 0x3a6   : > { %v8572_v24 = vpop.f32.mrf.mxu0  ;;  %v11054_v54 = vadd.f32 %v5789_v6, %v5510_v18  ;;  %v5513_v23 = vadd.f32 %v8532_v40, %v10942_v0 }
 0x3a7   : > { %v5454_v56 = vpop.f32.mrf.mxu1 }
 0x3a8   : > { %v5792_v43 = vpop.f32.mrf.mxu0  ;;  %v11057_v30 = vadd.f32 %v8572_v24, %v5513_v23  ;;  %v5511_v46 = vadd.f32 %v5454_v56, %v10946_v22 }
 0x3a9   : > { %v8535_v38 = vpop.f32.mrf.mxu1 }
 0x3aa   : > { %v8575_v59 = vpop.f32.mrf.mxu0  ;;  %v11060_v26 = vadd.f32 %v5792_v43, %v5511_v46  ;;  %v5516_v11 = vadd.f32 %v8535_v38, %v10950_v35 }
 0x3ab   : > { %v5467_v62 = vpop.f32.mrf.mxu1 }
 0x3ac   : > { %v5805_v29 = vpop.f32.mrf.mxu0  ;;  %v11063_v32 = vadd.f32 %v8575_v59, %v5516_v11  ;;  %v5514_v63 = vadd.f32 %v5467_v62, %v10953_v44 }
 0x3ad   : > { %v8536_v27 = vpop.f32.mrf.mxu1 }
 0x3ae   : > { %v8576_v0 = vpop.f32.mrf.mxu0  ;;  %v11066_v25 = vadd.f32 %v5805_v29, %v5514_v63  ;;  %v5517_v16 = vadd.f32 %v8536_v27, %v10956_v9 }
 0x3af   : > { %v5470_v13 = vpop.f32.mrf.mxu1 }
 0x3b0   : > { %v5808_v22 = vpop.f32.mrf.mxu0  ;;  %v11069_v53 = vadd.f32 %v8576_v0, %v5517_v16  ;;  %v5515_v34 = vadd.f32 %v5470_v13, %v10960_v45 }
 0x3b1   : > { %v8583_v10 = vpop.f32.mrf.mxu1 }
 0x3b2   : > { %v11072_v35 = vpop.f32.mrf.mxu0  ;;  %v11074_v15 = vadd.f32 %v5808_v22, %v5515_v34  ;;  %v11077_v5 = vadd.f32 %v8583_v10, %v10964_v58 }
 0x3b3   : > { %v6015_v44 = vpop.f32.mrf.mxu1 }
 0x3b4   : > { %v11080_v28 = vadd.f32 %v6015_v44, %v10967_v50  ;;  %v11082_v51 = vpop.f32.mrf.mxu0 }
 0x3b5   : > { %v8584_v9 = vpop.f32.mrf.mxu1 }
 0x3b6   : > { %v11085_v6 = vadd.f32 %v8584_v9, %v10970_v17  ;;  %v11087_v45 = vpop.f32.mrf.mxu0 }
 0x3b7   : > { %v6018_v18 = vpop.f32.mrf.mxu1 }
 0x3b8   : > { %v11090_v40 = vadd.f32 %v6018_v18, %v10974_v60  ;;  %v11095_v56 = vpop.f32.mrf.mxu0 }
 0x3b9   : > { %v8587_v24 = vpop.f32.mrf.mxu1 }
 0x3ba   : > { %v11093_v58 = vadd.f32 %v8587_v24, %v10978_v47  ;;  %v11103_v38 = vpop.f32.mrf.mxu0 }
 0x3bb   : > { %v6031_v23 = vpop.f32.mrf.mxu1 }
 0x3bc   : > { %v11098_v50 = vadd.f32 %v6031_v23, %v10981_v36  ;;  %v11111_v62 = vpop.f32.mrf.mxu0 }
 0x3bd   : > { %v8588_v43 = vpop.f32.mrf.mxu1 }
 0x3be   : > { %v11101_v17 = vadd.f32 %v8588_v43, %v10984_v12  ;;  %v11119_v27 = vpop.f32.mrf.mxu0 }
 0x3bf   : > { %v6034_v46 = vpop.f32.mrf.mxu1 }
 0x3c0   : > { %v11106_v60 = vadd.f32 %v6034_v46, %v10988_v57  ;;  %v11127_v13 = vpop.f32.mrf.mxu0 }
 0x3c1   : > { %v8591_v59 = vpop.f32.mrf.mxu1 }
 0x3c2   : > { %v11109_v47 = vadd.f32 %v8591_v59, %v10991_v7  ;;  %v11135_v10 = vpop.f32.mrf.mxu0 }
 0x3c3   : > { %v6047_v11 = vpop.f32.mrf.mxu1 }
 0x3c4   : > { %v11114_v36 = vadd.f32 %v6047_v11, %v10994_v20  ;;  %v11143_v18 = vpop.f32.mrf.mxu0 }
 0x3c5   : > { %v8592_v29 = vpop.f32.mrf.mxu1 }
 0x3c6   : > { %v11117_v12 = vadd.f32 %v8592_v29, %v10997_v2  ;;  %v11151_v43 = vpop.f32.mrf.mxu0 }
 0x3c7   : > { %v6050_v63 = vpop.f32.mrf.mxu1 }
 0x3c8   : > { %v11122_v57 = vadd.f32 %v6050_v63, %v11000_v4  ;;  %v11159_v11 = vpop.f32.mrf.mxu0 }
 0x3c9   : > { %v8595_v0 = vpop.f32.mrf.mxu1 }
 0x3ca   : > { %v11125_v7 = vadd.f32 %v8595_v0, %v11003_v48  ;;  %v11167_v0 = vpop.f32.mrf.mxu0 }
 0x3cb   : > { %v6063_v16 = vpop.f32.mrf.mxu1 }
 0x3cc   : > { %v11130_v20 = vadd.f32 %v6063_v16, %v11006_v52 }
 0x3cd   : > { %v8596_v22 = vpop.f32.mrf.mxu1 }
 0x3ce   : > { %v11133_v2 = vadd.f32 %v8596_v22, %v11009_v3 }
 0x3cf   : > { %v6066_v34 = vpop.f32.mrf.mxu1 }
 0x3d0   : > { %v11138_v4 = vadd.f32 %v6066_v34, %v11012_v31  ;;  %v11175_v34 = vpop.f32.mrf.mxu0 }
 0x3d1   : > { %v8599_v44 = vpop.f32.mrf.mxu1 }
 0x3d2   : > { %v11141_v48 = vadd.f32 %v8599_v44, %v11015_v19 }
 0x3d3   : > { %v6079_v9 = vpop.f32.mrf.mxu1 }
 0x3d4   : > { %v11146_v52 = vadd.f32 %v6079_v9, %v11018_v14 }
 0x3d5   : > { %v8600_v24 = vpop.f32.mrf.mxu1 }
 0x3d6   : > { %v11149_v3 = vadd.f32 %v8600_v24, %v11021_v39  ;;  %v11183_v24 = vpop.f32.mrf.mxu0 }
 0x3d7   : > { %v6082_v23 = vpop.f32.mrf.mxu1 }
 0x3d8   : > { %v11154_v31 = vadd.f32 %v6082_v23, %v11024_v33 }
 0x3d9   : > { %v8603_v46 = vpop.f32.mrf.mxu1 }
 0x3da   : > { %v11157_v19 = vadd.f32 %v8603_v46, %v11027_v41 }
 0x3db   : > { %v6095_v59 = vpop.f32.mrf.mxu1 }
 0x3dc   : > { %v11162_v14 = vadd.f32 %v6095_v59, %v11030_v21  ;;  %v11191_v59 = vpop.f32.mrf.mxu0 }
 0x3dd   : > { %v8604_v29 = vpop.f32.mrf.mxu1 }
 0x3de   : > { %v11165_v39 = vadd.f32 %v8604_v29, %v11033_v37 }
 0x3df   : > { %v6098_v63 = vpop.f32.mrf.mxu1 }
 0x3e0   : > { %v11170_v33 = vadd.f32 %v6098_v63, %v11036_v1 }
 0x3e1   : > { %v8607_v16 = vpop.f32.mrf.mxu1 }
 0x3e2   : > { %v11173_v41 = vadd.f32 %v8607_v16, %v11039_v55  ;;  %v11199_v16 = vpop.f32.mrf.mxu0 }
 0x3e3   : > { %v6111_v22 = vpop.f32.mrf.mxu1 }
 0x3e4   : > { %v11178_v21 = vadd.f32 %v6111_v22, %v11042_v61 }
 0x3e5   : > { %v8608_v44 = vpop.f32.mrf.mxu1 }
 0x3e6   : > { %v11181_v37 = vadd.f32 %v8608_v44, %v11045_v8 }
 0x3e7   : > { %v6114_v9 = vpop.f32.mrf.mxu1 }
 0x3e8   : > { %v11186_v1 = vadd.f32 %v6114_v9, %v11048_v42  ;;  %v11207_v9 = vpop.f32.mrf.mxu0 }
 0x3e9   : > { %v8611_v23 = vpop.f32.mrf.mxu1 }
 0x3ea   : > { %v11189_v55 = vadd.f32 %v8611_v23, %v11051_v49 }
 0x3eb   : > { %v6127_v46 = vpop.f32.mrf.mxu1 }
 0x3ec   : > { %v11194_v61 = vadd.f32 %v6127_v46, %v11054_v54 }
 0x3ed   : > { %v8612_v29 = vpop.f32.mrf.mxu1 }
 0x3ee   : > { %v11197_v8 = vadd.f32 %v8612_v29, %v11057_v30  ;;  %v11217_v29 = vpop.f32.mrf.mxu0 }
 0x3ef   : > { %v6130_v63 = vpop.f32.mrf.mxu1 }
 0x3f0   : > { %v11202_v42 = vadd.f32 %v6130_v63, %v11060_v26  ;;  %v6498_v26 = vadd.f32 %v11072_v35, %v11077_v5  ;;  %v11231_v35 = vpop.f32.mrf.mxu0 }
 0x3f1   : > { %v8615_v22 = vpop.f32.mrf.mxu1 }
 0x3f2   : > { %v11205_v49 = vadd.f32 %v8615_v22, %v11063_v32  ;;  %v6496_v22 = vadd.f32 %v11082_v51, %v11080_v28  ;;  %v6497_v28 = vadd.f32 %v11095_v56, %v11090_v40  ;;  %v6502_v40 = vadd.f32 %v11103_v38, %v11093_v58 }
 0x3f3   : > { %v6143_v44 = vpop.f32.mrf.mxu1  ;;  %v6500_v56 = vadd.f32 %v11111_v62, %v11098_v50  ;;  %v6503_v58 = vadd.f32 %v11119_v27, %v11101_v17 }
 0x3f4   : > { %v11210_v54 = vadd.f32 %v6143_v44, %v11066_v25  ;;  %v11225_v25 = vld [vmem:[%s11519_s7] ss:$0 sm:$0xff] }
 0x3f5   : > { %v8616_v23 = vpop.f32.mrf.mxu1 }
 0x3f6   : > { %11617 = vst [vmem:[#allocation3_spill] sm:$0xff] %v11210_v54  ;;  %v11213_v30 = vadd.f32 %v8616_v23, %v11069_v53  ;;  %v6499_v23 = vadd.f32 %v11087_v45, %v11085_v6  ;;  %v11246_v6 = vld [vmem:[%s11521_s9] ss:$0 sm:$0xff] }
 0x3f7   : > { %v6146_v46 = vpop.f32.mrf.mxu1 }
 0x3f8   : > { %11618 = vst [vmem:[#allocation5_spill] sm:$0xff] %v11213_v30  ;;  %v11220_v32 = vadd.f32 %v6146_v46, %v11074_v15  ;;  %v11238_v46 = vld [vmem:[%s11520_s8] ss:$0 sm:$0xff] }
 0x3f9   : > { %v8663_v63 = vpop.f32.mrf.mxu1 }
 0x3fa   : > { %11619 = vst [vmem:[#allocation7_spill] sm:$0xff] %v11220_v32  ;;  %v6836_v53 = vadd.f32 %v8663_v63, %v6498_v26 }
 0x3fb   : > { %v6691_v44 = vpop.f32.mrf.mxu1 }
 0x3fc   : > { %v6879_v5 = vadd.f32 %v11225_v25, %v6836_v53  ;;  %v6834_v15 = vadd.f32 %v6691_v44, %v6496_v22  ;;  %v11248_v22 = vpop.f32.mrf.mxu0 }
 0x3fd   : > { %v8664_v32 = vpop.f32.mrf.mxu1 }
 0x3fe   : > { %v6915_v51 = vmax.f32 %v6879_v5, 0.0  ;;  %v6877_v26 = vadd.f32 %v11225_v25, %v6834_v15  ;;  %v6837_v63 = vadd.f32 %v8664_v32, %v6499_v23  ;;  %v11266_v62 = vpop.f32.mrf.mxu0 }
 0x3ff   : > { %v6694_v45 = vpop.f32.mrf.mxu1 }
 0x400   : > { %v6958_v53 = vmul.f32 %v11238_v46, %v6915_v51  ;;  %v6913_v44 = vmax.f32 %v6877_v26, 0.0  ;;  %v6880_v30 = vadd.f32 %v11225_v25, %v6837_v63  ;;  %v6835_v54 = vadd.f32 %v6694_v45, %v6497_v28 }
 0x401   : > { %v8667_v32 = vpop.f32.mrf.mxu1 }
 0x402   : > { %v7001_v23 = vadd.f32 %v11246_v6, %v6958_v53  ;;  %v6956_v5 = vmul.f32 %v11238_v46, %v6913_v44  ;;  %v6916_v15 = vmax.f32 %v6880_v30, 0.0  ;;  %v6878_v28 = vadd.f32 %v11225_v25, %v6835_v54 }
 0x403   : > { %v6840_v38 = vadd.f32 %v8667_v32, %v6502_v40  ;;  %v6707_v50 = vpop.f32.mrf.mxu1  ;;  %v6501_v30 = vadd.f32 %v11127_v13, %v11106_v60  ;;  %v6506_v32 = vadd.f32 %v11135_v10, %v11109_v47 }
 0x404   : > { %7037 = vst.msk [vmem:[%s11259_s21 + $0x10] sm:$0xff] %vm3820_vm1, %v7001_v23  ;;  %v6999_v51 = vadd.f32 %v11246_v6, %v6956_v5  ;;  %v6959_v26 = vmul.f32 %v11238_v46, %v6916_v15  ;;  %v6914_v63 = vmax.f32 %v6878_v28, 0.0  ;;  %v6838_v45 = vadd.f32 %v6707_v50, %v6500_v56  ;;  %v11282_v5 = vpop.f32.mrf.mxu0 }
 0x405   : > { %v6883_v54 = vadd.f32 %v11225_v25, %v6840_v38  ;;  %v8668_v53 = vpop.f32.mrf.mxu1 }
 0x406   : > { %7035 = vst.msk [vmem:[%s11259_s21] sm:$0xff] %vm3820_vm1, %v6999_v51  ;;  %v7002_v17 = vadd.f32 %v11246_v6, %v6959_v26  ;;  %v6957_v27 = vmul.f32 %v11238_v46, %v6914_v63  ;;  %v6881_v44 = vadd.f32 %v11225_v25, %v6838_v45  ;;  %v6841_v40 = vadd.f32 %v8668_v53, %v6503_v58 }
 0x407   : > { %v6919_v56 = vmax.f32 %v6883_v54, 0.0  ;;  %v6710_v23 = vpop.f32.mrf.mxu1  ;;  %v6504_v26 = vadd.f32 %v11143_v18, %v11114_v36  ;;  %v6507_v63 = vadd.f32 %v11151_v43, %v11117_v12  ;;  %v11298_v54 = vpop.f32.mrf.mxu0 }
 0x408   : > { %7038 = vst.msk [vmem:[%s11259_s21 + $0x18] sm:$0xff] %vm3820_vm1, %v7002_v17  ;;  %v7000_v60 = vadd.f32 %v11246_v6, %v6957_v27  ;;  %v6917_v13 = vmax.f32 %v6881_v44, 0.0  ;;  %v6884_v15 = vadd.f32 %v11225_v25, %v6841_v40  ;;  %v6839_v28 = vadd.f32 %v6710_v23, %v6501_v30 }
 0x409   : > { %v6962_v38 = vmul.f32 %v11238_v46, %v6919_v56  ;;  %v8671_v50 = vpop.f32.mrf.mxu1  ;;  %v6505_v40 = vadd.f32 %v11159_v11, %v11122_v57  ;;  %v6510_v23 = vadd.f32 %v11167_v0, %v11125_v7  ;;  %v11314_v57 = vpop.f32.mrf.mxu0 }
 0x40a   : > { %7036 = vst.msk [vmem:[%s11259_s21 + $0x8] sm:$0xff] %vm3820_vm1, %v7000_v60  ;;  %v6960_v47 = vmul.f32 %v11238_v46, %v6917_v13  ;;  %v6920_v10 = vmax.f32 %v6884_v15, 0.0  ;;  %v6882_v58 = vadd.f32 %v11225_v25, %v6839_v28  ;;  %v6844_v51 = vadd.f32 %v8671_v50, %v6506_v32 }
 0x40b   : > { %v7005_v45 = vadd.f32 %v11246_v6, %v6962_v38  ;;  %v6723_v30 = vpop.f32.mrf.mxu1  ;;  %v6508_v50 = vadd.f32 %v11175_v34, %v11130_v20 }
 0x40c   : > { %v7003_v53 = vadd.f32 %v11246_v6, %v6960_v47  ;;  %v6963_v17 = vmul.f32 %v11238_v46, %v6920_v10  ;;  %v6918_v27 = vmax.f32 %v6882_v58, 0.0  ;;  %v6887_v44 = vadd.f32 %v11225_v25, %v6844_v51 }
 0x40d   : > { %7041 = vst.msk [vmem:[%s11259_s21 + $0x30] sm:$0xff] %vm3820_vm1, %v7005_v45  ;;  %v6842_v36 = vadd.f32 %v6723_v30, %v6504_v26  ;;  %v8672_v12 = vpop.f32.mrf.mxu1  ;;  %v11328_v45 = vpop.f32.mrf.mxu0 }
 0x40e   : > { %7039 = vst.msk [vmem:[%s11259_s21 + $0x20] sm:$0xff] %vm3820_vm1, %v7003_v53  ;;  %v7006_v18 = vadd.f32 %v11246_v6, %v6963_v17  ;;  %v6961_v43 = vmul.f32 %v11238_v46, %v6918_v27  ;;  %v6923_v32 = vmax.f32 %v6887_v44, 0.0  ;;  %v6845_v56 = vadd.f32 %v8672_v12, %v6507_v63 }
 0x40f   : > { %v6885_v60 = vadd.f32 %v11225_v25, %v6842_v36  ;;  %v6726_v13 = vpop.f32.mrf.mxu1  ;;  %v6511_v17 = vadd.f32 %v11183_v24, %v11133_v2  ;;  %v6509_v27 = vadd.f32 %v11191_v59, %v11138_v4 }
 0x410   : > { %7042 = vst.msk [vmem:[%s11259_s21 + $0x38] sm:$0xff] %vm3820_vm1, %v7006_v18  ;;  %v7004_v11 = vadd.f32 %v11246_v6, %v6961_v43  ;;  %v6966_v15 = vmul.f32 %v11238_v46, %v6923_v32  ;;  %v6888_v28 = vadd.f32 %v11225_v25, %v6845_v56  ;;  %v6843_v38 = vadd.f32 %v6726_v13, %v6505_v40  ;;  %v11346_v56 = vpop.f32.mrf.mxu0 }
 0x411   : > { %v6921_v47 = vmax.f32 %v6885_v60, 0.0  ;;  %v8675_v7 = vpop.f32.mrf.mxu1  ;;  %v6514_v32 = vadd.f32 %v11199_v16, %v11141_v48  ;;  %v6512_v13 = vadd.f32 %v11207_v9, %v11146_v52 }
 0x412   : > { %7040 = vst.msk [vmem:[%s11259_s21 + $0x28] sm:$0xff] %vm3820_vm1, %v7004_v11  ;;  %v7009_v0 = vadd.f32 %v11246_v6, %v6966_v15  ;;  %v6924_v10 = vmax.f32 %v6888_v28, 0.0  ;;  %v6886_v58 = vadd.f32 %v11225_v25, %v6843_v38  ;;  %v6848_v51 = vadd.f32 %v8675_v7, %v6510_v23 }
 0x413   : > { %v6964_v26 = vmul.f32 %v11238_v46, %v6921_v47  ;;  %v6739_v63 = vpop.f32.mrf.mxu1 }
 0x414   : > { %7045 = vst.msk [vmem:[%s11259_s21 + $0x50] sm:$0xff] %vm3820_vm1, %v7009_v0  ;;  %v6967_v20 = vmul.f32 %v11238_v46, %v6924_v10  ;;  %v6922_v34 = vmax.f32 %v6886_v58, 0.0  ;;  %v6891_v30 = vadd.f32 %v11225_v25, %v6848_v51  ;;  %v6846_v53 = vadd.f32 %v6739_v63, %v6508_v50  ;;  %v11362_v0 = vpop.f32.mrf.mxu0 }
 0x415   : > { %v7007_v44 = vadd.f32 %v11246_v6, %v6964_v26  ;;  %v8676_v40 = vpop.f32.mrf.mxu1  ;;  %v6515_v50 = vadd.f32 %v11217_v29, %v11149_v3 }
 0x416   : > { %v7010_v36 = vadd.f32 %v11246_v6, %v6967_v20  ;;  %v6965_v12 = vmul.f32 %v11238_v46, %v6922_v34  ;;  %v6927_v18 = vmax.f32 %v6891_v30, 0.0  ;;  %v6889_v43 = vadd.f32 %v11225_v25, %v6846_v53 }
 0x417   : > { %7043 = vst.msk [vmem:[%s11259_s21 + $0x40] sm:$0xff] %vm3820_vm1, %v7007_v44  ;;  %v6849_v2 = vadd.f32 %v8676_v40, %v6511_v17  ;;  %v6742_v24 = vpop.f32.mrf.mxu1  ;;  %v6513_v34 = vadd.f32 %v11231_v35, %v11154_v31  ;;  %v6518_v30 = vadd.f32 %v11248_v22, %v11157_v19 }
 0x418   : > { %7046 = vst.msk [vmem:[%s11259_s21 + $0x58] sm:$0xff] %vm3820_vm1, %v7010_v36  ;;  %v7008_v4 = vadd.f32 %v11246_v6, %v6965_v12  ;;  %v6970_v59 = vmul.f32 %v11238_v46, %v6927_v18  ;;  %v6925_v23 = vmax.f32 %v6889_v43, 0.0  ;;  %v6847_v60 = vadd.f32 %v6742_v24, %v6509_v27  ;;  %v11378_v27 = vpop.f32.mrf.mxu0 }
 0x419   : > { %v6892_v48 = vadd.f32 %v11225_v25, %v6849_v2  ;;  %v8679_v16 = vpop.f32.mrf.mxu1  ;;  %v6516_v18 = vadd.f32 %v11266_v62, %v11162_v14  ;;  %v6519_v2 = vadd.f32 %v11282_v5, %v11165_v39 }
 0x41a   : > { %7044 = vst.msk [vmem:[%s11259_s21 + $0x48] sm:$0xff] %vm3820_vm1, %v7008_v4  ;;  %v7013_v11 = vadd.f32 %v11246_v6, %v6970_v59  ;;  %v6968_v15 = vmul.f32 %v11238_v46, %v6925_v23  ;;  %v6890_v28 = vadd.f32 %v11225_v25, %v6847_v60  ;;  %v6852_v38 = vadd.f32 %v8679_v16, %v6514_v32  ;;  %v11394_v14 = vpop.f32.mrf.mxu0 }
 0x41b   : > { %v6928_v47 = vmax.f32 %v6892_v48, 0.0  ;;  %v6755_v7 = vpop.f32.mrf.mxu1 }
 0x41c   : > { %7049 = vst.msk [vmem:[%s11259_s21 + $0x70] sm:$0xff] %vm3820_vm1, %v7013_v11  ;;  %v7011_v52 = vadd.f32 %v11246_v6, %v6968_v15  ;;  %v6926_v9 = vmax.f32 %v6890_v28, 0.0  ;;  %v6895_v10 = vadd.f32 %v11225_v25, %v6852_v38  ;;  %v6850_v58 = vadd.f32 %v6755_v7, %v6512_v13 }
 0x41d   : > { %v6971_v51 = vmul.f32 %v11238_v46, %v6928_v47  ;;  %v8680_v26 = vpop.f32.mrf.mxu1  ;;  %v6517_v13 = vadd.f32 %v11298_v54, %v11170_v33 }
 0x41e   : > { %7047 = vst.msk [vmem:[%s11259_s21 + $0x60] sm:$0xff] %vm3820_vm1, %v7011_v52  ;;  %v6969_v3 = vmul.f32 %v11238_v46, %v6926_v9  ;;  %v6931_v29 = vmax.f32 %v6895_v10, 0.0  ;;  %v6893_v63 = vadd.f32 %v11225_v25, %v6850_v58  ;;  %v6853_v20 = vadd.f32 %v8680_v26, %v6515_v50  ;;  %v8652_v50 = vpop.f32.mrf.mxu0 }
 0x41f   : > { %v7014_v53 = vadd.f32 %v11246_v6, %v6971_v51  ;;  %v6758_v17 = vpop.f32.mrf.mxu1  ;;  %v6522_v52 = vadd.f32 %v11314_v57, %v11173_v41  ;;  %v6520_v9 = vadd.f32 %v11328_v45, %v11178_v21 }
 0x420   : > { %v7012_v44 = vadd.f32 %v11246_v6, %v6969_v3  ;;  %v6974_v40 = vmul.f32 %v11238_v46, %v6931_v29  ;;  %v6929_v36 = vmax.f32 %v6893_v63, 0.0  ;;  %v6896_v12 = vadd.f32 %v11225_v25, %v6853_v20  ;;  %v6468_v20 = vpop.f32.mrf.mxu0 }
 0x421   : > { %7050 = vst.msk [vmem:[%s11259_s21 + $0x78] sm:$0xff] %vm3820_vm1, %v7014_v53  ;;  %v6851_v31 = vadd.f32 %v6758_v17, %v6513_v34  ;;  %v8683_v19 = vpop.f32.mrf.mxu1  ;;  %v6523_v63 = vadd.f32 %v11346_v56, %v11181_v37  ;;  %v6521_v53 = vadd.f32 %v11362_v0, %v11186_v1 }
 0x422   : > { %7048 = vst.msk [vmem:[%s11259_s21 + $0x68] sm:$0xff] %vm3820_vm1, %v7012_v44  ;;  %v7017_v35 = vadd.f32 %v11246_v6, %v6974_v40  ;;  %v6972_v22 = vmul.f32 %v11238_v46, %v6929_v36  ;;  %v6932_v43 = vmax.f32 %v6896_v12, 0.0  ;;  %v6856_v32 = vadd.f32 %v8683_v19, %v6518_v30  ;;  %v8655_v56 = vpop.f32.mrf.mxu0 }
 0x423   : > { %v6894_v24 = vadd.f32 %v11225_v25, %v6851_v31  ;;  %v6771_v4 = vpop.f32.mrf.mxu1 }
 0x424   : > { %7053 = vst.msk [vmem:[%s11259_s21 + $0x90] sm:$0xff] %vm3820_vm1, %v7017_v35  ;;  %v7015_v62 = vadd.f32 %v11246_v6, %v6972_v22  ;;  %v6975_v59 = vmul.f32 %v11238_v46, %v6932_v43  ;;  %v6899_v23 = vadd.f32 %v11225_v25, %v6856_v32  ;;  %v6854_v60 = vadd.f32 %v6771_v4, %v6516_v18 }
 0x425   : > { %v6930_v48 = vmax.f32 %v6894_v24, 0.0  ;;  %v8684_v39 = vpop.f32.mrf.mxu1  ;;  %v6526_v18 = vadd.f32 %v11378_v27, %v11189_v55 }
 0x426   : > { %7051 = vst.msk [vmem:[%s11259_s21 + $0x80] sm:$0xff] %vm3820_vm1, %v7015_v62  ;;  %v7018_v5 = vadd.f32 %v11246_v6, %v6975_v59  ;;  %v6935_v16 = vmax.f32 %v6899_v23, 0.0  ;;  %v6897_v11 = vadd.f32 %v11225_v25, %v6854_v60  ;;  %v6857_v15 = vadd.f32 %v8684_v39, %v6519_v2  ;;  %v6481_v2 = vpop.f32.mrf.mxu0 }
 0x427   : > { %v6973_v28 = vmul.f32 %v11238_v46, %v6930_v48  ;;  %v6774_v38 = vpop.f32.mrf.mxu1  ;;  %v6524_v62 = vadd.f32 %v11394_v14, %v11194_v61  ;;  %v6527_v59 = vadd.f32 %v8652_v50, %v11197_v8  ;;  %v6530_v50 = vadd.f32 %v8655_v56, %v11205_v49 }
 0x428   : > { %7054 = vst.msk [vmem:[%s11259_s21 + $0x98] sm:$0xff] %vm3820_vm1, %v7018_v5  ;;  %v6978_v47 = vmul.f32 %v11238_v46, %v6935_v16  ;;  %v6933_v33 = vmax.f32 %v6897_v11, 0.0  ;;  %v6900_v54 = vadd.f32 %v11225_v25, %v6857_v15  ;;  %v6855_v7 = vadd.f32 %v6774_v38, %v6517_v13  ;;  %v8656_v61 = vpop.f32.mrf.mxu0 }
 0x429   : > { %v7016_v10 = vadd.f32 %v11246_v6, %v6973_v28  ;;  %v8687_v58 = vpop.f32.mrf.mxu1  ;;  %v6525_v16 = vadd.f32 %v6468_v20, %v11202_v42 }
 0x42a   : > { %v7021_v51 = vadd.f32 %v11246_v6, %v6978_v47  ;;  %v6976_v26 = vmul.f32 %v11238_v46, %v6933_v33  ;;  %v6936_v3 = vmax.f32 %v6900_v54, 0.0  ;;  %v6898_v29 = vadd.f32 %v11225_v25, %v6855_v7 }
 0x42b   : > { %7052 = vst.msk [vmem:[%s11259_s21 + $0x88] sm:$0xff] %vm3820_vm1, %v7016_v10  ;;  %v6860_v41 = vadd.f32 %v8687_v58, %v6522_v52  ;;  %v6787_v57 = vpop.f32.mrf.mxu1 }
 0x42c   : > { %7057 = vst.msk [vmem:[%s11259_s21 + $0xb0] sm:$0xff] %vm3820_vm1, %v7021_v51  ;;  %v7019_v21 = vadd.f32 %v11246_v6, %v6976_v26  ;;  %v6979_v45 = vmul.f32 %v11238_v46, %v6936_v3  ;;  %v6934_v34 = vmax.f32 %v6898_v29, 0.0  ;;  %v6858_v30 = vadd.f32 %v6787_v57, %v6520_v9  ;;  %v11620_v9 = vld [vmem:[#allocation3_spill] sm:$0xff]  ;;  %v6484_v26 = vpop.f32.mrf.mxu0 }
 0x42d   : > { %v6903_v17 = vadd.f32 %v11225_v25, %v6860_v41  ;;  %v8688_v37 = vpop.f32.mrf.mxu1  ;;  %v6528_v10 = vadd.f32 %v6481_v2, %v11620_v9 }
 0x42e   : > { %7055 = vst.msk [vmem:[%s11259_s21 + $0xa0] sm:$0xff] %vm3820_vm1, %v7019_v21  ;;  %v7022_v44 = vadd.f32 %v11246_v6, %v6979_v45  ;;  %v6977_v40 = vmul.f32 %v11238_v46, %v6934_v34  ;;  %v6901_v36 = vadd.f32 %v11225_v25, %v6858_v30  ;;  %v6861_v12 = vadd.f32 %v8688_v37, %v6523_v63  ;;  %v11621_v30 = vld [vmem:[#allocation5_spill] sm:$0xff] }
 0x42f   : > { %v6939_v31 = vmax.f32 %v6903_v17, 0.0  ;;  %v6790_v19 = vpop.f32.mrf.mxu1  ;;  %v11622_v17 = vld [vmem:[#allocation7_spill] sm:$0xff] }
 0x430   : > { %7058 = vst.msk [vmem:[%s11259_s21 + $0xb8] sm:$0xff] %vm3820_vm1, %v7022_v44  ;;  %v7020_v1 = vadd.f32 %v11246_v6, %v6977_v40  ;;  %v6937_v0 = vmax.f32 %v6901_v36, 0.0  ;;  %v6904_v35 = vadd.f32 %v11225_v25, %v6861_v12  ;;  %v6859_v22 = vadd.f32 %v6790_v19, %v6521_v53 }
 0x431   : > { %v6982_v43 = vmul.f32 %v11238_v46, %v6939_v31  ;;  %v8691_v32 = vpop.f32.mrf.mxu1  ;;  %v6531_v53 = vadd.f32 %v8656_v61, %v11621_v30  ;;  %v6529_v37 = vadd.f32 %v6484_v26, %v11622_v17 }
 0x432   : > { %7056 = vst.msk [vmem:[%s11259_s21 + $0xa8] sm:$0xff] %vm3820_vm1, %v7020_v1  ;;  %v6980_v24 = vmul.f32 %v11238_v46, %v6937_v0  ;;  %v6940_v55 = vmax.f32 %v6904_v35, 0.0  ;;  %v6902_v27 = vadd.f32 %v11225_v25, %v6859_v22  ;;  %v6864_v4 = vadd.f32 %v8691_v32, %v6526_v18 }
 0x433   : > { %v7025_v23 = vadd.f32 %v11246_v6, %v6982_v43  ;;  %v6803_v60 = vpop.f32.mrf.mxu1 }
 0x434   : > { %v7023_v13 = vadd.f32 %v11246_v6, %v6980_v24  ;;  %v6983_v48 = vmul.f32 %v11238_v46, %v6940_v55  ;;  %v6938_v39 = vmax.f32 %v6902_v27, 0.0  ;;  %v6907_v5 = vadd.f32 %v11225_v25, %v6864_v4 }
 0x435   : > { %7061 = vst.msk [vmem:[%s11259_s21 + $0xd0] sm:$0xff] %vm3820_vm1, %v7025_v23  ;;  %v6862_v11 = vadd.f32 %v6803_v60, %v6524_v62  ;;  %v8692_v15 = vpop.f32.mrf.mxu1 }
 0x436   : > { %7059 = vst.msk [vmem:[%s11259_s21 + $0xc0] sm:$0xff] %vm3820_vm1, %v7023_v13  ;;  %v7026_v8 = vadd.f32 %v11246_v6, %v6983_v48  ;;  %v6981_v14 = vmul.f32 %v11238_v46, %v6938_v39  ;;  %v6943_v28 = vmax.f32 %v6907_v5, 0.0  ;;  %v6865_v38 = vadd.f32 %v8692_v15, %v6527_v59 }
 0x437   : > { %v6905_v47 = vadd.f32 %v11225_v25, %v6862_v11  ;;  %v6806_v33 = vpop.f32.mrf.mxu1 }
 0x438   : > { %7062 = vst.msk [vmem:[%s11259_s21 + $0xd8] sm:$0xff] %vm3820_vm1, %v7026_v8  ;;  %v7024_v42 = vadd.f32 %v11246_v6, %v6981_v14  ;;  %v6986_v54 = vmul.f32 %v11238_v46, %v6943_v28  ;;  %v6908_v7 = vadd.f32 %v11225_v25, %v6865_v38  ;;  %v6863_v52 = vadd.f32 %v6806_v33, %v6525_v16 }
 0x439   : > { %v6941_v58 = vmax.f32 %v6905_v47, 0.0  ;;  %v8695_v51 = vpop.f32.mrf.mxu1 }
 0x43a   : > { %7060 = vst.msk [vmem:[%s11259_s21 + $0xc8] sm:$0xff] %vm3820_vm1, %v7024_v42  ;;  %v7029_v49 = vadd.f32 %v11246_v6, %v6986_v54  ;;  %v6944_v3 = vmax.f32 %v6908_v7, 0.0  ;;  %v6906_v29 = vadd.f32 %v11225_v25, %v6863_v52  ;;  %v6868_v63 = vadd.f32 %v8695_v51, %v6530_v50 }
 0x43b   : > { %v6984_v41 = vmul.f32 %v11238_v46, %v6941_v58  ;;  %v6819_v57 = vpop.f32.mrf.mxu1 }
 0x43c   : > { %7065 = vst.msk [vmem:[%s11259_s21 + $0xf0] sm:$0xff] %vm3820_vm1, %v7029_v49  ;;  %v6987_v20 = vmul.f32 %v11238_v46, %v6944_v3  ;;  %v6942_v21 = vmax.f32 %v6906_v29, 0.0  ;;  %v6911_v45 = vadd.f32 %v11225_v25, %v6868_v63  ;;  %v6866_v34 = vadd.f32 %v6819_v57, %v6528_v10 }
 0x43d   : > { %v7027_v56 = vadd.f32 %v11246_v6, %v6984_v41  ;;  %v8696_v44 = vpop.f32.mrf.mxu1 }
 0x43e   : > { %v7030_v40 = vadd.f32 %v11246_v6, %v6987_v20  ;;  %v6985_v36 = vmul.f32 %v11238_v46, %v6942_v21  ;;  %v6947_v12 = vmax.f32 %v6911_v45, 0.0  ;;  %v6909_v18 = vadd.f32 %v11225_v25, %v6866_v34 }
 0x43f   : > { %7063 = vst.msk [vmem:[%s11259_s21 + $0xe0] sm:$0xff] %vm3820_vm1, %v7027_v56  ;;  %v6869_v31 = vadd.f32 %v8696_v44, %v6531_v53  ;;  %v6822_v19 = vpop.f32.mrf.mxu1 }
 0x440   : > { %7066 = vst.msk [vmem:[%s11259_s21 + $0xf8] sm:$0xff] %vm3820_vm1, %v7030_v40  ;;  %v7028_v1 = vadd.f32 %v11246_v6, %v6985_v36  ;;  %v6990_v0 = vmul.f32 %v11238_v46, %v6947_v12  ;;  %v6945_v35 = vmax.f32 %v6909_v18, 0.0  ;;  %v6867_v22 = vadd.f32 %v6822_v19, %v6529_v37 }
 0x441   : > { %v6912_v43 = vadd.f32 %v11225_v25, %v6869_v31 }
 0x442   : > { %7064 = vst.msk [vmem:[%s11259_s21 + $0xe8] sm:$0xff] %vm3820_vm1, %v7028_v1  ;;  %v7033_v32 = vadd.f32 %v11246_v6, %v6990_v0  ;;  %v6988_v2 = vmul.f32 %v11238_v46, %v6945_v35  ;;  %v6910_v24 = vadd.f32 %v11225_v25, %v6867_v22 }
 0x443   : > { %v6948_v55 = vmax.f32 %v6912_v43, 0.0 }
 0x444   : > { %7069 = vst.msk [vmem:[%s11259_s21 + $0x110] sm:$0xff] %vm3820_vm1, %v7033_v32  ;;  %v7031_v27 = vadd.f32 %v11246_v6, %v6988_v2  ;;  %v6946_v4 = vmax.f32 %v6910_v24, 0.0 }
 0x445   : > { %v6991_v62 = vmul.f32 %v11238_v46, %v6948_v55 }
 0x446   : > { %7067 = vst.msk [vmem:[%s11259_s21 + $0x100] sm:$0xff] %vm3820_vm1, %v7031_v27  ;;  %v6989_v59 = vmul.f32 %v11238_v46, %v6946_v4 }
 0x447   : > { %v7034_v23 = vadd.f32 %v11246_v6, %v6991_v62 }
 0x448   : > { %v7032_v60 = vadd.f32 %v11246_v6, %v6989_v59 }
 0x449   : > { %7070 = vst.msk [vmem:[%s11259_s21 + $0x118] sm:$0xff] %vm3820_vm1, %v7034_v23 }
 0x44a   : > { %7068 = vst.msk [vmem:[%s11259_s21 + $0x108] sm:$0xff] %vm3820_vm1, %v7032_v60 }
 0x44b PF: > { %s20_s13 = sadd.s32 1, %s8762_s13  }
 0x44c   : > { %p17_p4 = scmp.ge.s32.totalorder %s20_s13, 4  }
 0x44e   :  { %19 = sbr.rel (!%p17_p4) target bundleno = 1 (0x1), region = 106 }

</bundles_post_ra>
